<compile_context>
chip_gen: v6e
topology: v6e:2x2x1
jax: 0.10.0
libtpu: 0.0.40
codegen_flags: <defaults>
</compile_context>

<pallas_src>
import functools

import numpy as np
import jax
import jax.numpy as jnp
from jax.experimental import pallas as pl
from jax.experimental.pallas import tpu as pltpu


def _round_up(x, m):
    return ((x + m - 1) // m) * m


# ----------------------------------------------------------------------------
# Pallas kernel 1a: fused GEMM, whole K in one tile (no scratch accumulator).
# ----------------------------------------------------------------------------
def _gemm_fused_kernel(a_ref, w_ref, scale_ref, shift_ref, o_ref, *, relu):
    y = jnp.dot(a_ref[...], w_ref[...], preferred_element_type=jnp.float32)
    y = y * scale_ref[...] + shift_ref[...]
    if relu:
        y = jnp.maximum(y, 0.0)
    o_ref[...] = y.astype(o_ref.dtype)


# ----------------------------------------------------------------------------
# Pallas kernel 1b: general tiled GEMM with K-axis accumulation in VMEM.
# ----------------------------------------------------------------------------
def _gemm_acc_kernel(a_ref, w_ref, scale_ref, shift_ref, o_ref, acc_ref, *,
                     relu):
    @pl.when(pl.program_id(2) == 0)
    def _init():
        acc_ref[...] = jnp.zeros_like(acc_ref)

    acc_ref[...] += jnp.dot(a_ref[...], w_ref[...],
                            preferred_element_type=jnp.float32)

    @pl.when(pl.program_id(2) == pl.num_programs(2) - 1)
    def _epilogue():
        y = acc_ref[...] * scale_ref[...] + shift_ref[...]
        if relu:
            y = jnp.maximum(y, 0.0)
        o_ref[...] = y.astype(o_ref.dtype)


def matmul_scale_shift(a, w, scale=None, shift=None, *, relu=False,
                       out_dtype=jnp.float32):
    """a: (M, K), w: (K, N), scale/shift: (N,) -> (M, N) in out_dtype."""
    M, K = a.shape
    K2, N = w.shape
    assert K == K2
    if scale is None:
        scale = jnp.ones((N,), jnp.float32)
    if shift is None:
        shift = jnp.zeros((N,), jnp.float32)

    tm = min(512, _round_up(M, 8))
    tn = min(256, _round_up(N, 128))
    tk = min(1024, _round_up(K, 128))
    Mp, Np, Kp = _round_up(M, tm), _round_up(N, tn), _round_up(K, tk)

    a_p = jnp.pad(a.astype(jnp.bfloat16), ((0, Mp - M), (0, Kp - K)))
    w_p = jnp.pad(w.astype(jnp.bfloat16), ((0, Kp - K), (0, Np - N)))
    sc_p = jnp.pad(scale.astype(jnp.float32), (0, Np - N)).reshape(1, Np)
    sh_p = jnp.pad(shift.astype(jnp.float32), (0, Np - N)).reshape(1, Np)

    if Kp == tk:
        # Fast path: entire reduction in one MXU pass; every grid axis parallel.
        out = pl.pallas_call(
            functools.partial(_gemm_fused_kernel, relu=relu),
            out_shape=jax.ShapeDtypeStruct((Mp, Np), out_dtype),
            grid=(Mp // tm, Np // tn),
            in_specs=[
                pl.BlockSpec((tm, Kp), lambda i, j: (i, 0)),
                pl.BlockSpec((Kp, tn), lambda i, j: (0, j)),
                pl.BlockSpec((1, tn), lambda i, j: (0, j)),
                pl.BlockSpec((1, tn), lambda i, j: (0, j)),
            ],
            out_specs=pl.BlockSpec((tm, tn), lambda i, j: (i, j)),
            compiler_params=pltpu.CompilerParams(
                dimension_semantics=("parallel", "parallel")),
        )(a_p, w_p, sc_p, sh_p)
    else:
        out = pl.pallas_call(
            functools.partial(_gemm_acc_kernel, relu=relu),
            out_shape=jax.ShapeDtypeStruct((Mp, Np), out_dtype),
            grid=(Mp // tm, Np // tn, Kp // tk),
            in_specs=[
                pl.BlockSpec((tm, tk), lambda i, j, k: (i, k)),
                pl.BlockSpec((tk, tn), lambda i, j, k: (k, j)),
                pl.BlockSpec((1, tn), lambda i, j, k: (0, j)),
                pl.BlockSpec((1, tn), lambda i, j, k: (0, j)),
            ],
            out_specs=pl.BlockSpec((tm, tn), lambda i, j, k: (i, j)),
            scratch_shapes=[pltpu.VMEM((tm, tn), jnp.float32)],
            compiler_params=pltpu.CompilerParams(
                dimension_semantics=("parallel", "parallel", "arbitrary")),
        )(a_p, w_p, sc_p, sh_p)
    return out[:M, :N]


# ----------------------------------------------------------------------------
# Pallas kernel 2: 3x3 conv (pad=1) + folded BN + ReLU, no im2col in HBM.
# Grid = (Cout tiles, B, H); per step three padded rows (h, h+1, h+2) are
# streamed in and the 9 taps are accumulated in-kernel on the MXU.
# ----------------------------------------------------------------------------
def _conv3x3_kernel(x0_ref, x1_ref, x2_ref, w_ref, scale_ref, shift_ref, o_ref,
                    *, out_w):
    acc = jnp.zeros(o_ref.shape, jnp.float32)            # (W, tn)
    rows = (x0_ref, x1_ref, x2_ref)
    for dh in range(3):
        xr = rows[dh][...]                                # (W+2, Cin) bf16
        for dw in range(3):
            p = jnp.dot(xr, w_ref[3 * dh + dw],
                        preferred_element_type=jnp.float32)   # (W+2, tn) f32
            acc = acc + p[dw:dw + out_w, :]
    y = acc * scale_ref[...] + shift_ref[...]
    y = jnp.maximum(y, 0.0)
    o_ref[...] = y.astype(o_ref.dtype)


def conv3x3_bn_relu(x_nhwc, w, scale, shift, *, out_dtype=jnp.float32, tn=128):
    """x: NHWC, w: (Cout, Cin, 3, 3) torch layout, stride 1, pad 1."""
    B, H, W, Cin = x_nhwc.shape
    Cout = w.shape[0]
    assert w.shape == (Cout, Cin, 3, 3)
    assert W % 8 == 0

    xpad = jnp.pad(x_nhwc.astype(jnp.bfloat16), ((0, 0), (1, 1), (1, 1), (0, 0)))
    Wp = W + 2
    w9 = jnp.transpose(w, (2, 3, 1, 0)).reshape(9, Cin, Cout).astype(jnp.bfloat16)

    Np = _round_up(Cout, tn)
    if Np != Cout:
        w9 = jnp.pad(w9, ((0, 0), (0, 0), (0, Np - Cout)))
        scale = jnp.pad(scale, (0, Np - Cout))
        shift = jnp.pad(shift, (0, Np - Cout))
    sc = scale.astype(jnp.float32).reshape(1, Np)
    sh = shift.astype(jnp.float32).reshape(1, Np)

    out = pl.pallas_call(
        functools.partial(_conv3x3_kernel, out_w=W),
        out_shape=jax.ShapeDtypeStruct((B, H, W, Np), out_dtype),
        grid=(Np // tn, B, H),
        in_specs=[
            pl.BlockSpec((None, None, Wp, Cin), lambda n, b, h: (b, h, 0, 0)),
            pl.BlockSpec((None, None, Wp, Cin), lambda n, b, h: (b, h + 1, 0, 0)),
            pl.BlockSpec((None, None, Wp, Cin), lambda n, b, h: (b, h + 2, 0, 0)),
            pl.BlockSpec((9, Cin, tn), lambda n, b, h: (0, 0, n)),
            pl.BlockSpec((1, tn), lambda n, b, h: (0, n)),
            pl.BlockSpec((1, tn), lambda n, b, h: (0, n)),
        ],
        out_specs=pl.BlockSpec((None, None, W, tn), lambda n, b, h: (b, h, 0, n)),
        compiler_params=pltpu.CompilerParams(
            dimension_semantics=("parallel", "parallel", "parallel")),
    )(xpad, xpad, xpad, w9, sc, sh)
    return out[..., :Cout]


# ----------------------------------------------------------------------------
# Constant (static-shape) matrices for adaptive avg-pool & bilinear upsample.
# ----------------------------------------------------------------------------
def _adaptive_pool_matrix(out_size, in_size):
    """PyTorch AdaptiveAvgPool1d weighting matrix (out_size, in_size)."""
    P = np.zeros((out_size, in_size), np.float32)
    for i in range(out_size):
        s = (i * in_size) // out_size
        e = -((-(i + 1) * in_size) // out_size)          # ceil((i+1)*in/out)
        P[i, s:e] = 1.0 / (e - s)
    return P


def _interp_matrix(out_size, in_size):
    """Bilinear align_corners=True 1-D interpolation matrix (out_size, in_size)."""
    if in_size == 1:
        return np.ones((out_size, 1), np.float32)
    A = np.zeros((out_size, in_size), np.float32)
    if out_size == 1:
        A[0, 0] = 1.0
        return A
    scale = (in_size - 1) / (out_size - 1)
    for i in range(out_size):
        src = i * scale
        i0 = min(int(np.floor(src)), in_size - 1)
        i1 = min(i0 + 1, in_size - 1)
        f = src - i0
        A[i, i0] += 1.0 - f
        A[i, i1] += f
    return A


# ----------------------------------------------------------------------------
# PSPModule forward
# ----------------------------------------------------------------------------
def psp_forward(features_nchw, params, bin_sizes):
    B, Cin, H, W = features_nchw.shape
    S = len(bin_sizes)
    Cout = params["stage_scale"].shape[0] // S
    HW = H * W

    x = jnp.transpose(features_nchw, (0, 2, 3, 1)).astype(jnp.float32)  # NHWC

    # Static pooling / interpolation matrices (stage-major concatenation).
    P2_list, A2_list = [], []
    for bs in bin_sizes:
        Ph = _adaptive_pool_matrix(bs, H)
        Pw = _adaptive_pool_matrix(bs, W)
        P2_list.append(np.kron(Ph, Pw))                                  # (bs^2, HW)
        Ah = _interp_matrix(H, bs)
        Aw = _interp_matrix(W, bs)
        A2_list.append(np.einsum("ip,jq->ijpq", Ah, Aw).reshape(HW, bs * bs))
    P2 = jnp.asarray(np.concatenate(P2_list, axis=0))                    # (Ktot, HW)
    A2 = jnp.asarray(np.concatenate(A2_list, axis=1))                    # (HW, Ktot)

    # --- 1) Adaptive average pooling for all stages: one Pallas GEMM -------
    x_hw_bc = jnp.transpose(x.reshape(B, HW, Cin), (1, 0, 2)).reshape(HW, B * Cin)
    pooled = matmul_scale_shift(P2, x_hw_bc, out_dtype=jnp.bfloat16)     # (Ktot, B*Cin)

    # --- 2) 1x1 conv + BN + ReLU for all stages: one Pallas GEMM -----------
    a_rows, koff = [], 0
    for bs in bin_sizes:
        n = bs * bs
        blk = pooled[koff:koff + n].reshape(n, B, Cin)
        a_rows.append(jnp.transpose(blk, (1, 0, 2)).reshape(B * n, Cin))
        koff += n
    A_all = jnp.concatenate(a_rows, axis=0)                              # (B*Ktot, Cin)
    y_all = matmul_scale_shift(A_all, params["stage_w"],
                               params["stage_scale"], params["stage_shift"],
                               relu=True, out_dtype=jnp.bfloat16)        # (B*Ktot, S*Cout)

    # --- 3) Bilinear upsample (align_corners=True) of all stages: one GEMM -
    r_rows, roff = [], 0
    for s, bs in enumerate(bin_sizes):
        n = bs * bs
        y_s = y_all[roff:roff + B * n, s * Cout:(s + 1) * Cout].reshape(B, n, Cout)
        blk = jnp.zeros((n, B, S, Cout), y_s.dtype)
        blk = blk.at[:, :, s, :].set(jnp.transpose(y_s, (1, 0, 2)))
        r_rows.append(blk.reshape(n, B * S * Cout))
        roff += B * n
    R = jnp.concatenate(r_rows, axis=0)                                  # (Ktot, B*S*Cout)
    U = matmul_scale_shift(A2, R, out_dtype=jnp.bfloat16)                # (HW, B*S*Cout)
    U = jnp.transpose(U.reshape(H, W, B, S * Cout), (2, 0, 1, 3))        # (B,H,W,S*Cout)

    # --- 4) concat + bottleneck 3x3 conv + BN + ReLU ------------------------
    cat = jnp.concatenate([x.astype(jnp.bfloat16), U], axis=-1)          # (B,H,W,Cin+S*Cout)
    out = conv3x3_bn_relu(cat, params["bottleneck_w"],
                          params["bottleneck_scale"], params["bottleneck_shift"],
                          out_dtype=jnp.float32)
    # TODO(synk): nn.Dropout2d(0.1) is identity in eval mode; training-mode
    # channel dropout is not implemented here.
    return jnp.transpose(out, (0, 3, 1, 2))                              # NCHW


# ----------------------------------------------------------------------------
# Deterministic synthetic parameters (eval-mode BatchNorm folded)
# ----------------------------------------------------------------------------
def _bn_scale_shift(key, c, eps=1e-5):
    k1, k2, k3, k4 = jax.random.split(key, 4)
    gamma = 1.0 + 0.1 * jax.random.normal(k1, (c,), jnp.float32)
    beta = 0.1 * jax.random.normal(k2, (c,), jnp.float32)
    mean = 0.1 * jax.random.normal(k3, (c,), jnp.float32)
    var = jnp.abs(jax.random.normal(k4, (c,), jnp.float32)) + 0.5
    scale = gamma / jnp.sqrt(var + eps)
    shift = beta - mean * scale
    return scale, shift


def init_params(seed, in_channels, bin_sizes):
    S = len(bin_sizes)
    out_channels = in_channels // S
    keys = jax.random.split(jax.random.PRNGKey(seed), 2 * S + 2)

    stage_w, stage_scale, stage_shift = [], [], []
    for s in range(S):
        w = 0.05 * jax.random.normal(keys[2 * s], (out_channels, in_channels),
                                     jnp.float32)        # torch (Cout,Cin,1,1)
        sc, sh = _bn_scale_shift(keys[2 * s + 1], out_channels)
        stage_w.append(w.T)                               # (Cin, Cout)
        stage_scale.append(sc)
        stage_shift.append(sh)

    c_tot = in_channels + S * out_channels
    bw = 0.05 * jax.random.normal(keys[2 * S], (out_channels, c_tot, 3, 3),
                                  jnp.float32)
    bsc, bsh = _bn_scale_shift(keys[2 * S + 1], out_channels)

    return {
        "stage_w": jnp.concatenate(stage_w, axis=1),       # (Cin, S*Cout)
        "stage_scale": jnp.concatenate(stage_scale),       # (S*Cout,)
        "stage_shift": jnp.concatenate(stage_shift),       # (S*Cout,)
        "bottleneck_w": bw,                                # (Cout, Cin+S*Cout, 3, 3)
        "bottleneck_scale": bsc,
        "bottleneck_shift": bsh,
    }


# ----------------------------------------------------------------------------
if __name__ == "__main__":
    in_channels = 512
    bin_sizes = (1, 2, 3, 6)
    n_out = in_channels // len(bin_sizes)                 # 128
    B, H, W = 2, 16, 16

    params = init_params(42, in_channels, bin_sizes)
    x = jax.random.normal(jax.random.PRNGKey(0), (B, in_channels, H, W),
                          jnp.float32)

    forward = jax.jit(psp_forward, static_argnames=("bin_sizes",))
    out = forward(x, params, bin_sizes=bin_sizes)
    out = jax.block_until_ready(out)

    assert out.shape == (B, n_out, H, W), out.shape
    assert bool(jnp.all(jnp.isfinite(out)))
    print("KERNEL_OK")
</pallas_src>

<mosaic_0001>
module attributes {stable_mosaic.version = 11 : i64} {
  func.func @_gemm_fused_kernel(%arg0: i32, %arg1: i32, %arg2: memref<56x256xbf16, #tpu.memory_space<vmem>>, %arg3: memref<256x256xbf16, #tpu.memory_space<vmem>>, %arg4: memref<1x256xf32, #tpu.memory_space<vmem>>, %arg5: memref<1x256xf32, #tpu.memory_space<vmem>>, %arg6: memref<56x256xbf16, #tpu.memory_space<vmem>>) attributes {dimension_semantics = [#tpu.dimension_semantics<parallel>, #tpu.dimension_semantics<parallel>], iteration_bounds = array<i64: 1, 4>, scalar_prefetch = 0 : i64, scratch_operands = 0 : i64, tpu.core_type = #tpu.core_type<tc>, window_params = [{transform_indices = @transform_0, window_bounds = array<i64: 56, 256>}, {transform_indices = @transform_1, window_bounds = array<i64: 256, 256>}, {transform_indices = @transform_2, window_bounds = array<i64: 1, 256>}, {transform_indices = @transform_3, window_bounds = array<i64: 1, 256>}, {transform_indices = @transform_4, window_bounds = array<i64: 56, 256>}]} {
    %c0 = arith.constant 0 : index
    %c0_0 = arith.constant 0 : index
    %0 = vector.load %arg2[%c0, %c0_0] : memref<56x256xbf16, #tpu.memory_space<vmem>>, vector<56x256xbf16>
    %c0_1 = arith.constant 0 : index
    %c0_2 = arith.constant 0 : index
    %1 = vector.load %arg3[%c0_1, %c0_2] : memref<256x256xbf16, #tpu.memory_space<vmem>>, vector<256x256xbf16>
    %cst = arith.constant dense<0.000000e+00> : vector<56x256xf32>
    %2 = tpu.matmul %0, %1, %cst {dimension_numbers = #tpu.dot_dimension_numbers<[1], [0], [0], [1], [0, 0, 1, 1], [], []>} : vector<56x256xbf16>, vector<256x256xbf16>, vector<56x256xf32> -> vector<56x256xf32>
    %c0_3 = arith.constant 0 : index
    %c0_4 = arith.constant 0 : index
    %3 = vector.load %arg4[%c0_3, %c0_4] : memref<1x256xf32, #tpu.memory_space<vmem>>, vector<1x256xf32>
    %4 = vector.broadcast %3 : vector<1x256xf32> to vector<56x256xf32>
    %5 = arith.mulf %2, %4 : vector<56x256xf32>
    %c0_5 = arith.constant 0 : index
    %c0_6 = arith.constant 0 : index
    %6 = vector.load %arg5[%c0_5, %c0_6] : memref<1x256xf32, #tpu.memory_space<vmem>>, vector<1x256xf32>
    %7 = vector.broadcast %6 : vector<1x256xf32> to vector<56x256xf32>
    %8 = arith.addf %5, %7 : vector<56x256xf32>
    %9 = arith.truncf %8 : vector<56x256xf32> to vector<56x256xbf16>
    %c0_7 = arith.constant 0 : index
    %c0_8 = arith.constant 0 : index
    %10 = vector.load %arg6[%c0_7, %c0_8] : memref<56x256xbf16, #tpu.memory_space<vmem>>, vector<56x256xbf16>
    tpu.vector_store %arg6[%c0_7, %c0_8], %9 {strides = array<i32>} : memref<56x256xbf16, #tpu.memory_space<vmem>>, vector<56x256xbf16>,
    return
  }
  func.func @transform_0(%arg0: i32, %arg1: i32) -> (i32, i32) {
    %c0_i32 = arith.constant 0 : i32
    %c0_i32_0 = arith.constant 0 : i32
    return %arg0, %c0_i32 : i32, i32
  }
  func.func @transform_1(%arg0: i32, %arg1: i32) -> (i32, i32) {
    %c0_i32 = arith.constant 0 : i32
    %c0_i32_0 = arith.constant 0 : i32
    return %c0_i32, %arg1 : i32, i32
  }
  func.func @transform_2(%arg0: i32, %arg1: i32) -> (i32, i32) {
    %c0_i32 = arith.constant 0 : i32
    %c0_i32_0 = arith.constant 0 : i32
    return %c0_i32, %arg1 : i32, i32
  }
  func.func @transform_3(%arg0: i32, %arg1: i32) -> (i32, i32) {
    %c0_i32 = arith.constant 0 : i32
    %c0_i32_0 = arith.constant 0 : i32
    return %c0_i32, %arg1 : i32, i32
  }
  func.func @transform_4(%arg0: i32, %arg1: i32) -> (i32, i32) {
    %c0_i32 = arith.constant 0 : i32
    return %arg0, %arg1 : i32, i32
  }
}

module attributes {stable_mosaic.version = 11 : i64} {
  func.func @_gemm_fused_kernel(%arg0: i32, %arg1: i32, %arg2: memref<104x512xbf16, #tpu.memory_space<vmem>>, %arg3: memref<512x256xbf16, #tpu.memory_space<vmem>>, %arg4: memref<1x256xf32, #tpu.memory_space<vmem>>, %arg5: memref<1x256xf32, #tpu.memory_space<vmem>>, %arg6: memref<104x256xbf16, #tpu.memory_space<vmem>>) attributes {dimension_semantics = [#tpu.dimension_semantics<parallel>, #tpu.dimension_semantics<parallel>], iteration_bounds = array<i64: 1, 2>, scalar_prefetch = 0 : i64, scratch_operands = 0 : i64, tpu.core_type = #tpu.core_type<tc>, window_params = [{transform_indices = @transform_0, window_bounds = array<i64: 104, 512>}, {transform_indices = @transform_1, window_bounds = array<i64: 512, 256>}, {transform_indices = @transform_2, window_bounds = array<i64: 1, 256>}, {transform_indices = @transform_3, window_bounds = array<i64: 1, 256>}, {transform_indices = @transform_4, window_bounds = array<i64: 104, 256>}]} {
    %c0 = arith.constant 0 : index
    %c0_0 = arith.constant 0 : index
    %0 = vector.load %arg2[%c0, %c0_0] : memref<104x512xbf16, #tpu.memory_space<vmem>>, vector<104x512xbf16>
    %c0_1 = arith.constant 0 : index
    %c0_2 = arith.constant 0 : index
    %1 = vector.load %arg3[%c0_1, %c0_2] : memref<512x256xbf16, #tpu.memory_space<vmem>>, vector<512x256xbf16>
    %cst = arith.constant dense<0.000000e+00> : vector<104x256xf32>
    %2 = tpu.matmul %0, %1, %cst {dimension_numbers = #tpu.dot_dimension_numbers<[1], [0], [0], [1], [0, 0, 1, 1], [], []>} : vector<104x512xbf16>, vector<512x256xbf16>, vector<104x256xf32> -> vector<104x256xf32>
    %c0_3 = arith.constant 0 : index
    %c0_4 = arith.constant 0 : index
    %3 = vector.load %arg4[%c0_3, %c0_4] : memref<1x256xf32, #tpu.memory_space<vmem>>, vector<1x256xf32>
    %4 = vector.broadcast %3 : vector<1x256xf32> to vector<104x256xf32>
    %5 = arith.mulf %2, %4 : vector<104x256xf32>
    %c0_5 = arith.constant 0 : index
    %c0_6 = arith.constant 0 : index
    %6 = vector.load %arg5[%c0_5, %c0_6] : memref<1x256xf32, #tpu.memory_space<vmem>>, vector<1x256xf32>
    %7 = vector.broadcast %6 : vector<1x256xf32> to vector<104x256xf32>
    %8 = arith.addf %5, %7 : vector<104x256xf32>
    %cst_7 = arith.constant 0.000000e+00 : f32
    %9 = vector.broadcast %cst_7 : f32 to vector<104x256xf32>
    %10 = arith.maximumf %8, %9 : vector<104x256xf32>
    %11 = arith.truncf %10 : vector<104x256xf32> to vector<104x256xbf16>
    %c0_8 = arith.constant 0 : index
    %c0_9 = arith.constant 0 : index
    %12 = vector.load %arg6[%c0_8, %c0_9] : memref<104x256xbf16, #tpu.memory_space<vmem>>, vector<104x256xbf16>
    tpu.vector_store %arg6[%c0_8, %c0_9], %11 {strides = array<i32>} : memref<104x256xbf16, #tpu.memory_space<vmem>>, vector<104x256xbf16>,
    return
  }
  func.func @transform_0(%arg0: i32, %arg1: i32) -> (i32, i32) {
    %c0_i32 = arith.constant 0 : i32
    %c0_i32_0 = arith.constant 0 : i32
    return %arg0, %c0_i32 : i32, i32
  }
  func.func @transform_1(%arg0: i32, %arg1: i32) -> (i32, i32) {
    %c0_i32 = arith.constant 0 : i32
    %c0_i32_0 = arith.constant 0 : i32
    return %c0_i32, %arg1 : i32, i32
  }
  func.func @transform_2(%arg0: i32, %arg1: i32) -> (i32, i32) {
    %c0_i32 = arith.constant 0 : i32
    %c0_i32_0 = arith.constant 0 : i32
    return %c0_i32, %arg1 : i32, i32
  }
  func.func @transform_3(%arg0: i32, %arg1: i32) -> (i32, i32) {
    %c0_i32 = arith.constant 0 : i32
    %c0_i32_0 = arith.constant 0 : i32
    return %c0_i32, %arg1 : i32, i32
  }
  func.func @transform_4(%arg0: i32, %arg1: i32) -> (i32, i32) {
    %c0_i32 = arith.constant 0 : i32
    return %arg0, %arg1 : i32, i32
  }
}

module attributes {stable_mosaic.version = 11 : i64} {
  func.func @_gemm_fused_kernel(%arg0: i32, %arg1: i32, %arg2: memref<256x128xbf16, #tpu.memory_space<vmem>>, %arg3: memref<128x256xbf16, #tpu.memory_space<vmem>>, %arg4: memref<1x256xf32, #tpu.memory_space<vmem>>, %arg5: memref<1x256xf32, #tpu.memory_space<vmem>>, %arg6: memref<256x256xbf16, #tpu.memory_space<vmem>>) attributes {dimension_semantics = [#tpu.dimension_semantics<parallel>, #tpu.dimension_semantics<parallel>], iteration_bounds = array<i64: 1, 4>, scalar_prefetch = 0 : i64, scratch_operands = 0 : i64, tpu.core_type = #tpu.core_type<tc>, window_params = [{transform_indices = @transform_0, window_bounds = array<i64: 256, 128>}, {transform_indices = @transform_1, window_bounds = array<i64: 128, 256>}, {transform_indices = @transform_2, window_bounds = array<i64: 1, 256>}, {transform_indices = @transform_3, window_bounds = array<i64: 1, 256>}, {transform_indices = @transform_4, window_bounds = array<i64: 256, 256>}]} {
    %c0 = arith.constant 0 : index
    %c0_0 = arith.constant 0 : index
    %0 = vector.load %arg2[%c0, %c0_0] : memref<256x128xbf16, #tpu.memory_space<vmem>>, vector<256x128xbf16>
    %c0_1 = arith.constant 0 : index
    %c0_2 = arith.constant 0 : index
    %1 = vector.load %arg3[%c0_1, %c0_2] : memref<128x256xbf16, #tpu.memory_space<vmem>>, vector<128x256xbf16>
    %cst = arith.constant dense<0.000000e+00> : vector<256x256xf32>
    %2 = tpu.matmul %0, %1, %cst {dimension_numbers = #tpu.dot_dimension_numbers<[1], [0], [0], [1], [0, 0, 1, 1], [], []>} : vector<256x128xbf16>, vector<128x256xbf16>, vector<256x256xf32> -> vector<256x256xf32>
    %c0_3 = arith.constant 0 : index
    %c0_4 = arith.constant 0 : index
    %3 = vector.load %arg4[%c0_3, %c0_4] : memref<1x256xf32, #tpu.memory_space<vmem>>, vector<1x256xf32>
    %4 = vector.broadcast %3 : vector<1x256xf32> to vector<256x256xf32>
    %5 = arith.mulf %2, %4 : vector<256x256xf32>
    %c0_5 = arith.constant 0 : index
    %c0_6 = arith.constant 0 : index
    %6 = vector.load %arg5[%c0_5, %c0_6] : memref<1x256xf32, #tpu.memory_space<vmem>>, vector<1x256xf32>
    %7 = vector.broadcast %6 : vector<1x256xf32> to vector<256x256xf32>
    %8 = arith.addf %5, %7 : vector<256x256xf32>
    %9 = arith.truncf %8 : vector<256x256xf32> to vector<256x256xbf16>
    %c0_7 = arith.constant 0 : index
    %c0_8 = arith.constant 0 : index
    %10 = vector.load %arg6[%c0_7, %c0_8] : memref<256x256xbf16, #tpu.memory_space<vmem>>, vector<256x256xbf16>
    tpu.vector_store %arg6[%c0_7, %c0_8], %9 {strides = array<i32>} : memref<256x256xbf16, #tpu.memory_space<vmem>>, vector<256x256xbf16>,
    return
  }
  func.func @transform_0(%arg0: i32, %arg1: i32) -> (i32, i32) {
    %c0_i32 = arith.constant 0 : i32
    %c0_i32_0 = arith.constant 0 : i32
    return %arg0, %c0_i32 : i32, i32
  }
  func.func @transform_1(%arg0: i32, %arg1: i32) -> (i32, i32) {
    %c0_i32 = arith.constant 0 : i32
    %c0_i32_0 = arith.constant 0 : i32
    return %c0_i32, %arg1 : i32, i32
  }
  func.func @transform_2(%arg0: i32, %arg1: i32) -> (i32, i32) {
    %c0_i32 = arith.constant 0 : i32
    %c0_i32_0 = arith.constant 0 : i32
    return %c0_i32, %arg1 : i32, i32
  }
  func.func @transform_3(%arg0: i32, %arg1: i32) -> (i32, i32) {
    %c0_i32 = arith.constant 0 : i32
    %c0_i32_0 = arith.constant 0 : i32
    return %c0_i32, %arg1 : i32, i32
  }
  func.func @transform_4(%arg0: i32, %arg1: i32) -> (i32, i32) {
    %c0_i32 = arith.constant 0 : i32
    return %arg0, %arg1 : i32, i32
  }
}

module attributes {stable_mosaic.version = 11 : i64} {
  func.func @_conv3x3_kernel(%arg0: i32, %arg1: i32, %arg2: i32, %arg3: memref<1x1x18x1024xbf16, #tpu.memory_space<vmem>>, %arg4: memref<1x1x18x1024xbf16, #tpu.memory_space<vmem>>, %arg5: memref<1x1x18x1024xbf16, #tpu.memory_space<vmem>>, %arg6: memref<9x1024x128xbf16, #tpu.memory_space<vmem>>, %arg7: memref<1x128xf32, #tpu.memory_space<vmem>>, %arg8: memref<1x128xf32, #tpu.memory_space<vmem>>, %arg9: memref<1x1x16x128xf32, #tpu.memory_space<vmem>>) attributes {dimension_semantics = [#tpu.dimension_semantics<parallel>, #tpu.dimension_semantics<parallel>, #tpu.dimension_semantics<parallel>], iteration_bounds = array<i64: 1, 2, 16>, scalar_prefetch = 0 : i64, scratch_operands = 0 : i64, tpu.core_type = #tpu.core_type<tc>, window_params = [{transform_indices = @transform_0, window_bounds = array<i64: 1, 1, 18, 1024>}, {transform_indices = @transform_1, window_bounds = array<i64: 1, 1, 18, 1024>}, {transform_indices = @transform_2, window_bounds = array<i64: 1, 1, 18, 1024>}, {transform_indices = @transform_3, window_bounds = array<i64: 9, 1024, 128>}, {transform_indices = @transform_4, window_bounds = array<i64: 1, 128>}, {transform_indices = @transform_5, window_bounds = array<i64: 1, 128>}, {transform_indices = @transform_6, window_bounds = array<i64: 1, 1, 16, 128>}]} {
    %cst = arith.constant 0.000000e+00 : f32
    %0 = vector.broadcast %cst : f32 to vector<16x128xf32>
    %c0 = arith.constant 0 : index
    %c0_0 = arith.constant 0 : index
    %c0_1 = arith.constant 0 : index
    %c0_2 = arith.constant 0 : index
    %1 = vector.load %arg3[%c0, %c0_0, %c0_1, %c0_2] : memref<1x1x18x1024xbf16, #tpu.memory_space<vmem>>, vector<1x1x18x1024xbf16>
    %2 = vector.shape_cast %1 : vector<1x1x18x1024xbf16> to vector<18x1024xbf16>
    %c0_3 = arith.constant 0 : index
    %c0_4 = arith.constant 0 : index
    %c0_5 = arith.constant 0 : index
    %3 = vector.load %arg6[%c0_3, %c0_4, %c0_5] : memref<9x1024x128xbf16, #tpu.memory_space<vmem>>, vector<1x1024x128xbf16>
    %4 = vector.shape_cast %3 : vector<1x1024x128xbf16> to vector<1024x128xbf16>
    %cst_6 = arith.constant dense<0.000000e+00> : vector<18x128xf32>
    %5 = tpu.matmul %2, %4, %cst_6 {dimension_numbers = #tpu.dot_dimension_numbers<[1], [0], [0], [1], [0, 0, 1, 1], [], []>} : vector<18x1024xbf16>, vector<1024x128xbf16>, vector<18x128xf32> -> vector<18x128xf32>
    %6 = vector.extract_strided_slice %5 {offsets = [0, 0], sizes = [16, 128], strides = [1, 1]} : vector<18x128xf32> to vector<16x128xf32>
    %7 = arith.addf %0, %6 : vector<16x128xf32>
    %c1 = arith.constant 1 : index
    %c0_7 = arith.constant 0 : index
    %c0_8 = arith.constant 0 : index
    %8 = vector.load %arg6[%c1, %c0_7, %c0_8] : memref<9x1024x128xbf16, #tpu.memory_space<vmem>>, vector<1x1024x128xbf16>
    %9 = vector.shape_cast %8 : vector<1x1024x128xbf16> to vector<1024x128xbf16>
    %cst_9 = arith.constant dense<0.000000e+00> : vector<18x128xf32>
    %10 = tpu.matmul %2, %9, %cst_9 {dimension_numbers = #tpu.dot_dimension_numbers<[1], [0], [0], [1], [0, 0, 1, 1], [], []>} : vector<18x1024xbf16>, vector<1024x128xbf16>, vector<18x128xf32> -> vector<18x128xf32>
    %11 = vector.extract_strided_slice %10 {offsets = [1, 0], sizes = [16, 128], strides = [1, 1]} : vector<18x128xf32> to vector<16x128xf32>
    %12 = arith.addf %7, %11 : vector<16x128xf32>
    %c2 = arith.constant 2 : index
    %c0_10 = arith.constant 0 : index
    %c0_11 = arith.constant 0 : index
    %13 = vector.load %arg6[%c2, %c0_10, %c0_11] : memref<9x1024x128xbf16, #tpu.memory_space<vmem>>, vector<1x1024x128xbf16>
    %14 = vector.shape_cast %13 : vector<1x1024x128xbf16> to vector<1024x128xbf16>
    %cst_12 = arith.constant dense<0.000000e+00> : vector<18x128xf32>
    %15 = tpu.matmul %2, %14, %cst_12 {dimension_numbers = #tpu.dot_dimension_numbers<[1], [0], [0], [1], [0, 0, 1, 1], [], []>} : vector<18x1024xbf16>, vector<1024x128xbf16>, vector<18x128xf32> -> vector<18x128xf32>
    %16 = vector.extract_strided_slice %15 {offsets = [2, 0], sizes = [16, 128], strides = [1, 1]} : vector<18x128xf32> to vector<16x128xf32>
    %17 = arith.addf %12, %16 : vector<16x128xf32>
    %c0_13 = arith.constant 0 : index
    %c0_14 = arith.constant 0 : index
    %c0_15 = arith.constant 0 : index
    %c0_16 = arith.constant 0 : index
    %18 = vector.load %arg4[%c0_13, %c0_14, %c0_15, %c0_16] : memref<1x1x18x1024xbf16, #tpu.memory_space<vmem>>, vector<1x1x18x1024xbf16>
    %19 = vector.shape_cast %18 : vector<1x1x18x1024xbf16> to vector<18x1024xbf16>
    %c3 = arith.constant 3 : index
    %c0_17 = arith.constant 0 : index
    %c0_18 = arith.constant 0 : index
    %20 = vector.load %arg6[%c3, %c0_17, %c0_18] : memref<9x1024x128xbf16, #tpu.memory_space<vmem>>, vector<1x1024x128xbf16>
    %21 = vector.shape_cast %20 : vector<1x1024x128xbf16> to vector<1024x128xbf16>
    %cst_19 = arith.constant dense<0.000000e+00> : vector<18x128xf32>
    %22 = tpu.matmul %19, %21, %cst_19 {dimension_numbers = #tpu.dot_dimension_numbers<[1], [0], [0], [1], [0, 0, 1, 1], [], []>} : vector<18x1024xbf16>, vector<1024x128xbf16>, vector<18x128xf32> -> vector<18x128xf32>
    %23 = vector.extract_strided_slice %22 {offsets = [0, 0], sizes = [16, 128], strides = [1, 1]} : vector<18x128xf32> to vector<16x128xf32>
    %24 = arith.addf %17, %23 : vector<16x128xf32>
    %c4 = arith.constant 4 : index
    %c0_20 = arith.constant 0 : index
    %c0_21 = arith.constant 0 : index
    %25 = vector.load %arg6[%c4, %c0_20, %c0_21] : memref<9x1024x128xbf16, #tpu.memory_space<vmem>>, vector<1x1024x128xbf16>
    %26 = vector.shape_cast %25 : vector<1x1024x128xbf16> to vector<1024x128xbf16>
    %cst_22 = arith.constant dense<0.000000e+00> : vector<18x128xf32>
    %27 = tpu.matmul %19, %26, %cst_22 {dimension_numbers = #tpu.dot_dimension_numbers<[1], [0], [0], [1], [0, 0, 1, 1], [], []>} : vector<18x1024xbf16>, vector<1024x128xbf16>, vector<18x128xf32> -> vector<18x128xf32>
    %28 = vector.extract_strided_slice %27 {offsets = [1, 0], sizes = [16, 128], strides = [1, 1]} : vector<18x128xf32> to vector<16x128xf32>
    %29 = arith.addf %24, %28 : vector<16x128xf32>
    %c5 = arith.constant 5 : index
    %c0_23 = arith.constant 0 : index
    %c0_24 = arith.constant 0 : index
    %30 = vector.load %arg6[%c5, %c0_23, %c0_24] : memref<9x1024x128xbf16, #tpu.memory_space<vmem>>, vector<1x1024x128xbf16>
    %31 = vector.shape_cast %30 : vector<1x1024x128xbf16> to vector<1024x128xbf16>
    %cst_25 = arith.constant dense<0.000000e+00> : vector<18x128xf32>
    %32 = tpu.matmul %19, %31, %cst_25 {dimension_numbers = #tpu.dot_dimension_numbers<[1], [0], [0], [1], [0, 0, 1, 1], [], []>} : vector<18x1024xbf16>, vector<1024x128xbf16>, vector<18x128xf32> -> vector<18x128xf32>
    %33 = vector.extract_strided_slice %32 {offsets = [2, 0], sizes = [16, 128], strides = [1, 1]} : vector<18x128xf32> to vector<16x128xf32>
    %34 = arith.addf %29, %33 : vector<16x128xf32>
    %c0_26 = arith.constant 0 : index
    %c0_27 = arith.constant 0 : index
    %c0_28 = arith.constant 0 : index
    %c0_29 = arith.constant 0 : index
    %35 = vector.load %arg5[%c0_26, %c0_27, %c0_28, %c0_29] : memref<1x1x18x1024xbf16, #tpu.memory_space<vmem>>, vector<1x1x18x1024xbf16>
    %36 = vector.shape_cast %35 : vector<1x1x18x1024xbf16> to vector<18x1024xbf16>
    %c6 = arith.constant 6 : index
    %c0_30 = arith.constant 0 : index
    %c0_31 = arith.constant 0 : index
    %37 = vector.load %arg6[%c6, %c0_30, %c0_31] : memref<9x1024x128xbf16, #tpu.memory_space<vmem>>, vector<1x1024x128xbf16>
    %38 = vector.shape_cast %37 : vector<1x1024x128xbf16> to vector<1024x128xbf16>
    %cst_32 = arith.constant dense<0.000000e+00> : vector<18x128xf32>
    %39 = tpu.matmul %36, %38, %cst_32 {dimension_numbers = #tpu.dot_dimension_numbers<[1], [0], [0], [1], [0, 0, 1, 1], [], []>} : vector<18x1024xbf16>, vector<1024x128xbf16>, vector<18x128xf32> -> vector<18x128xf32>
    %40 = vector.extract_strided_slice %39 {offsets = [0, 0], sizes = [16, 128], strides = [1, 1]} : vector<18x128xf32> to vector<16x128xf32>
    %41 = arith.addf %34, %40 : vector<16x128xf32>
    %c7 = arith.constant 7 : index
    %c0_33 = arith.constant 0 : index
    %c0_34 = arith.constant 0 : index
    %42 = vector.load %arg6[%c7, %c0_33, %c0_34] : memref<9x1024x128xbf16, #tpu.memory_space<vmem>>, vector<1x1024x128xbf16>
    %43 = vector.shape_cast %42 : vector<1x1024x128xbf16> to vector<1024x128xbf16>
    %cst_35 = arith.constant dense<0.000000e+00> : vector<18x128xf32>
    %44 = tpu.matmul %36, %43, %cst_35 {dimension_numbers = #tpu.dot_dimension_numbers<[1], [0], [0], [1], [0, 0, 1, 1], [], []>} : vector<18x1024xbf16>, vector<1024x128xbf16>, vector<18x128xf32> -> vector<18x128xf32>
    %45 = vector.extract_strided_slice %44 {offsets = [1, 0], sizes = [16, 128], strides = [1, 1]} : vector<18x128xf32> to vector<16x128xf32>
    %46 = arith.addf %41, %45 : vector<16x128xf32>
    %c8 = arith.constant 8 : index
    %c0_36 = arith.constant 0 : index
    %c0_37 = arith.constant 0 : index
    %47 = vector.load %arg6[%c8, %c0_36, %c0_37] : memref<9x1024x128xbf16, #tpu.memory_space<vmem>>, vector<1x1024x128xbf16>
    %48 = vector.shape_cast %47 : vector<1x1024x128xbf16> to vector<1024x128xbf16>
    %cst_38 = arith.constant dense<0.000000e+00> : vector<18x128xf32>
    %49 = tpu.matmul %36, %48, %cst_38 {dimension_numbers = #tpu.dot_dimension_numbers<[1], [0], [0], [1], [0, 0, 1, 1], [], []>} : vector<18x1024xbf16>, vector<1024x128xbf16>, vector<18x128xf32> -> vector<18x128xf32>
    %50 = vector.extract_strided_slice %49 {offsets = [2, 0], sizes = [16, 128], strides = [1, 1]} : vector<18x128xf32> to vector<16x128xf32>
    %51 = arith.addf %46, %50 : vector<16x128xf32>
    %c0_39 = arith.constant 0 : index
    %c0_40 = arith.constant 0 : index
    %52 = vector.load %arg7[%c0_39, %c0_40] : memref<1x128xf32, #tpu.memory_space<vmem>>, vector<1x128xf32>
    %53 = vector.broadcast %52 : vector<1x128xf32> to vector<16x128xf32>
    %54 = arith.mulf %51, %53 : vector<16x128xf32>
    %c0_41 = arith.constant 0 : index
    %c0_42 = arith.constant 0 : index
    %55 = vector.load %arg8[%c0_41, %c0_42] : memref<1x128xf32, #tpu.memory_space<vmem>>, vector<1x128xf32>
    %56 = vector.broadcast %55 : vector<1x128xf32> to vector<16x128xf32>
    %57 = arith.addf %54, %56 : vector<16x128xf32>
    %cst_43 = arith.constant 0.000000e+00 : f32
    %58 = vector.broadcast %cst_43 : f32 to vector<16x128xf32>
    %59 = arith.maximumf %57, %58 : vector<16x128xf32>
    %c0_44 = arith.constant 0 : index
    %c0_45 = arith.constant 0 : index
    %c0_46 = arith.constant 0 : index
    %c0_47 = arith.constant 0 : index
    %60 = vector.load %arg9[%c0_44, %c0_45, %c0_46, %c0_47] : memref<1x1x16x128xf32, #tpu.memory_space<vmem>>, vector<1x1x16x128xf32>
    %61 = vector.shape_cast %60 : vector<1x1x16x128xf32> to vector<16x128xf32>
    %62 = vector.shape_cast %59 : vector<16x128xf32> to vector<1x1x16x128xf32>
    tpu.vector_store %arg9[%c0_44, %c0_45, %c0_46, %c0_47], %62 {strides = array<i32>} : memref<1x1x16x128xf32, #tpu.memory_space<vmem>>, vector<1x1x16x128xf32>,
    return
  }
  func.func @transform_0(%arg0: i32, %arg1: i32, %arg2: i32) -> (i32, i32, i32, i32) {
    %c0_i32 = arith.constant 0 : i32
    %c0_i32_0 = arith.constant 0 : i32
    %c0_i32_1 = arith.constant 0 : i32
    return %arg1, %arg2, %c0_i32, %c0_i32_0 : i32, i32, i32, i32
  }
  func.func @transform_1(%arg0: i32, %arg1: i32, %arg2: i32) -> (i32, i32, i32, i32) {
    %c1_i32 = arith.constant 1 : i32
    %0 = arith.addi %arg2, %c1_i32 : i32
    %c0_i32 = arith.constant 0 : i32
    %c0_i32_0 = arith.constant 0 : i32
    %c0_i32_1 = arith.constant 0 : i32
    return %arg1, %0, %c0_i32, %c0_i32_0 : i32, i32, i32, i32
  }
  func.func @transform_2(%arg0: i32, %arg1: i32, %arg2: i32) -> (i32, i32, i32, i32) {
    %c2_i32 = arith.constant 2 : i32
    %0 = arith.addi %arg2, %c2_i32 : i32
    %c0_i32 = arith.constant 0 : i32
    %c0_i32_0 = arith.constant 0 : i32
    %c0_i32_1 = arith.constant 0 : i32
    return %arg1, %0, %c0_i32, %c0_i32_0 : i32, i32, i32, i32
  }
  func.func @transform_3(%arg0: i32, %arg1: i32, %arg2: i32) -> (i32, i32, i32) {
    %c0_i32 = arith.constant 0 : i32
    %c0_i32_0 = arith.constant 0 : i32
    %c0_i32_1 = arith.constant 0 : i32
    return %c0_i32, %c0_i32_0, %arg0 : i32, i32, i32
  }
  func.func @transform_4(%arg0: i32, %arg1: i32, %arg2: i32) -> (i32, i32) {
    %c0_i32 = arith.constant 0 : i32
    %c0_i32_0 = arith.constant 0 : i32
    return %c0_i32, %arg0 : i32, i32
  }
  func.func @transform_5(%arg0: i32, %arg1: i32, %arg2: i32) -> (i32, i32) {
    %c0_i32 = arith.constant 0 : i32
    %c0_i32_0 = arith.constant 0 : i32
    return %c0_i32, %arg0 : i32, i32
  }
  func.func @transform_6(%arg0: i32, %arg1: i32, %arg2: i32) -> (i32, i32, i32, i32) {
    %c0_i32 = arith.constant 0 : i32
    %c0_i32_0 = arith.constant 0 : i32
    return %arg1, %arg2, %c0_i32, %arg0 : i32, i32, i32, i32
  }
}

</mosaic_0001>

<bundles_post_ra>
// kernel: psp_forward.4
= control target key start
LH: loop header
LB: loop body
LE: loop exit
PB: predicated region body
PF: predicated region fallthrough
CT: control target
= control target key end

     0   :  { %s1282_s15 = smov 0   ;;  %s1284_s16 = smov 0   ;;  %s1504_s0 = inlined_call_operand.vmem [shape: bf16[56,256], index: 0, kind: input, shape index: {}]   ;;  %s1505_s1 = inlined_call_operand.vmem [shape: bf16[256,1024], index: 1, kind: input, shape index: {}]   ;;  %s1506_s2 = inlined_call_operand.vmem [shape: f32[1,1024], index: 2, kind: input, shape index: {}]   ;;  %s1507_s3 = inlined_call_operand.vmem [shape: f32[1,1024], index: 3, kind: input, shape index: {}]   ;;  %s1508_s4 = inlined_call_operand.vmem [shape: bf16[56,1024], index: 4, kind: output, shape index: {}]  }
   0x1   :  { %s1286_s17 = smov 0   ;;  %s1288_s18 = smov 0  }
   0x2   :  { %s1290_s19 = smov 0  }
   0x3 LB: > { %s23_s20 = sadd.s32 1, %s1251_s18  ;;  %s1013_s21 = sadd.s32 4294967295, %s1255_s19   ;;  %s1255_s19 = sphi %s1290_s19, %s14_s19   ;;  %s1251_s18 = sphi %s1288_s18, %s1513_s18   ;;  %s1247_s17 = sphi %s1286_s17, %s1512_s17   ;;  %s1243_s16 = sphi %s1284_s16, %s1511_s16   ;;  %s1239_s15 = sphi %s1282_s15, %s1510_s15  }
   0x4   : > { %p24_p0 = scmp.ge.s32.totalorder %s23_s20, 4  ;;  %p66_p1 = scmp.ne.s32.totalorder %s1243_s16, %s1239_s15 }
   0x5   : > { %p67_p2 = scmp.eq.s32.totalorder %s1255_s19, 0  ;;  %p150_p4 = scmp.eq.s32.totalorder %s1013_s21, 3 }
   0x6   : > { %s1515_s20 = smov (%p24_p0, %s23_s20), 0  ;;  %s59_s23 = sadd.s32 1, %s1243_s16 }
   0x7   : > { %p68_p3 = por %p67_p2, %p66_p1  ;;  %s56_s22 = ssub.s32 %s1251_s18, %s1515_s20 }
   0x8   : > { %p57_p5 = scmp.eq.s32.totalorder %s56_s22, 0  ;;  %p1317_p6 = por %p150_p4, %p66_p1 }
   0x9   : > { %p1017_p7 = scmp.ge.s32.totalorder %s1255_s19, 4 }
   0xa   : > { %s1322_s25 = scalar_select %p57_p5, %s1243_s16, %s59_s23  }
   0xb   : > { %182 = sbr.rel (%p1017_p7) target bundleno = 52 (0x34), region = 20 }
  0x10   : > { %185 = sbr.rel (!%p68_p3) target bundleno = 52 (0x34), region = 24  ;;  %s187_s26 = sand.u32 (%p68_p3), 1, %s1243_s16  }
  0x11   : > { %s1076_s27 = sshll.u32 (%p68_p3), %s1251_s18, 3  ;;  %s1018_s28 = sshll.u32 (%p68_p3), %s187_s26, 8 }
  0x12   : > { %s1330_s5 = scalar_lea.vmem (%p68_p3), %s1505_s1, %s1076_s27  ;;  %s1335_s6 = scalar_lea.vmem (%p68_p3), [#allocation2], %s1018_s28 }
  0x13   : > { %v283_v0 = vld [vmem:[%s1330_s5] sm:$0xff] (%p68_p3) }
  0x14   : > { %v285_v1 = vld [vmem:[%s1330_s5 + $0x20] sm:$0xff] (%p68_p3)  ;;  %284 = vst [vmem:[%s1335_s6] sm:$0xff] (%p68_p3), %v283_v0 }
  0x15   : > { %v287_v2 = vld [vmem:[%s1330_s5 + $0x40] sm:$0xff]  ;;  %286 = vst [vmem:[%s1335_s6 + $0x8] sm:$0xff] %v285_v1 }
  0x16   : > { %288 = vst [vmem:[%s1335_s6 + $0x10] sm:$0xff] %v287_v2  ;;  %v289_v3 = vld [vmem:[%s1330_s5 + $0x60] sm:$0xff] }
  0x17   : > { %v291_v4 = vld [vmem:[%s1330_s5 + $0x80] sm:$0xff]  ;;  %290 = vst [vmem:[%s1335_s6 + $0x18] sm:$0xff] %v289_v3 }
  0x18   : > { %v293_v5 = vld [vmem:[%s1330_s5 + $0xa0] sm:$0xff]  ;;  %292 = vst [vmem:[%s1335_s6 + $0x20] sm:$0xff] %v291_v4 }
  0x19   : > { %294 = vst [vmem:[%s1335_s6 + $0x28] sm:$0xff] %v293_v5  ;;  %v295_v6 = vld [vmem:[%s1330_s5 + $0xc0] sm:$0xff] }
  0x1a   : > { %v297_v7 = vld [vmem:[%s1330_s5 + $0xe0] sm:$0xff]  ;;  %296 = vst [vmem:[%s1335_s6 + $0x30] sm:$0xff] %v295_v6 }
  0x1b   : > { %v299_v8 = vld [vmem:[%s1330_s5 + $0x100] sm:$0xff]  ;;  %298 = vst [vmem:[%s1335_s6 + $0x38] sm:$0xff] %v297_v7 }
  0x1c   : > { %300 = vst [vmem:[%s1335_s6 + $0x40] sm:$0xff] %v299_v8  ;;  %v301_v9 = vld [vmem:[%s1330_s5 + $0x120] sm:$0xff] }
  0x1d   : > { %v303_v10 = vld [vmem:[%s1330_s5 + $0x140] sm:$0xff]  ;;  %302 = vst [vmem:[%s1335_s6 + $0x48] sm:$0xff] %v301_v9 }
  0x1e   : > { %v305_v11 = vld [vmem:[%s1330_s5 + $0x160] sm:$0xff]  ;;  %304 = vst [vmem:[%s1335_s6 + $0x50] sm:$0xff] %v303_v10 }
  0x1f   : > { %306 = vst [vmem:[%s1335_s6 + $0x58] sm:$0xff] %v305_v11  ;;  %v307_v12 = vld [vmem:[%s1330_s5 + $0x180] sm:$0xff] }
  0x20   : > { %v309_v13 = vld [vmem:[%s1330_s5 + $0x1a0] sm:$0xff]  ;;  %308 = vst [vmem:[%s1335_s6 + $0x60] sm:$0xff] %v307_v12 }
  0x21   : > { %v311_v14 = vld [vmem:[%s1330_s5 + $0x1c0] sm:$0xff]  ;;  %310 = vst [vmem:[%s1335_s6 + $0x68] sm:$0xff] %v309_v13 }
  0x22   : > { %312 = vst [vmem:[%s1335_s6 + $0x70] sm:$0xff] %v311_v14  ;;  %v313_v15 = vld [vmem:[%s1330_s5 + $0x1e0] sm:$0xff] }
  0x23   : > { %v315_v16 = vld [vmem:[%s1330_s5 + $0x200] sm:$0xff]  ;;  %314 = vst [vmem:[%s1335_s6 + $0x78] sm:$0xff] %v313_v15 }
  0x24   : > { %v317_v17 = vld [vmem:[%s1330_s5 + $0x220] sm:$0xff]  ;;  %316 = vst [vmem:[%s1335_s6 + $0x80] sm:$0xff] %v315_v16 }
  0x25   : > { %318 = vst [vmem:[%s1335_s6 + $0x88] sm:$0xff] %v317_v17  ;;  %v319_v18 = vld [vmem:[%s1330_s5 + $0x240] sm:$0xff] }
  0x26   : > { %v321_v19 = vld [vmem:[%s1330_s5 + $0x260] sm:$0xff]  ;;  %320 = vst [vmem:[%s1335_s6 + $0x90] sm:$0xff] %v319_v18 }
  0x27   : > { %v323_v20 = vld [vmem:[%s1330_s5 + $0x280] sm:$0xff]  ;;  %322 = vst [vmem:[%s1335_s6 + $0x98] sm:$0xff] %v321_v19 }
  0x28   : > { %324 = vst [vmem:[%s1335_s6 + $0xa0] sm:$0xff] %v323_v20  ;;  %v325_v21 = vld [vmem:[%s1330_s5 + $0x2a0] sm:$0xff] }
  0x29   : > { %v327_v22 = vld [vmem:[%s1330_s5 + $0x2c0] sm:$0xff]  ;;  %326 = vst [vmem:[%s1335_s6 + $0xa8] sm:$0xff] %v325_v21 }
  0x2a   : > { %v329_v23 = vld [vmem:[%s1330_s5 + $0x2e0] sm:$0xff]  ;;  %328 = vst [vmem:[%s1335_s6 + $0xb0] sm:$0xff] %v327_v22 }
  0x2b   : > { %330 = vst [vmem:[%s1335_s6 + $0xb8] sm:$0xff] %v329_v23  ;;  %v331_v24 = vld [vmem:[%s1330_s5 + $0x300] sm:$0xff] }
  0x2c   : > { %v333_v25 = vld [vmem:[%s1330_s5 + $0x320] sm:$0xff]  ;;  %332 = vst [vmem:[%s1335_s6 + $0xc0] sm:$0xff] %v331_v24 }
  0x2d   : > { %v335_v26 = vld [vmem:[%s1330_s5 + $0x340] sm:$0xff]  ;;  %334 = vst [vmem:[%s1335_s6 + $0xc8] sm:$0xff] %v333_v25 }
  0x2e   : > { %336 = vst [vmem:[%s1335_s6 + $0xd0] sm:$0xff] %v335_v26  ;;  %v337_v27 = vld [vmem:[%s1330_s5 + $0x360] sm:$0xff] }
  0x2f   : > { %v339_v28 = vld [vmem:[%s1330_s5 + $0x380] sm:$0xff]  ;;  %338 = vst [vmem:[%s1335_s6 + $0xd8] sm:$0xff] %v337_v27 }
  0x30   : > { %v341_v29 = vld [vmem:[%s1330_s5 + $0x3a0] sm:$0xff]  ;;  %340 = vst [vmem:[%s1335_s6 + $0xe0] sm:$0xff] %v339_v28 }
  0x31   : > { %342 = vst [vmem:[%s1335_s6 + $0xe8] sm:$0xff] %v341_v29  ;;  %v343_v30 = vld [vmem:[%s1330_s5 + $0x3c0] sm:$0xff] }
  0x32   : > { %v345_v31 = vld [vmem:[%s1330_s5 + $0x3e0] sm:$0xff]  ;;  %344 = vst [vmem:[%s1335_s6 + $0xf0] sm:$0xff] %v343_v30 }
  0x33   : > { %346 = vst [vmem:[%s1335_s6 + $0xf8] sm:$0xff] %v345_v31 }
  0x34 PF: > { %p1021_p8 = scmp.ge.s32.totalorder %s1255_s19, 1  ;;  %p367_p9 = scmp.lt.s32.totalorder %s1255_s19, 5 }
  0x36   : > { %p368_p10 = pnand %p1021_p8, %p367_p9 }
  0x37   : > { %s374_s7 = sand.u32 (!%p368_p10), 1, %s1239_s15   ;;  %s1023_s6 = sshll.u32 (!%p368_p10), %s1247_s17, 1 }
  0x38   : > { %371 = sbr.rel (%p368_p10) target bundleno = 349 (0x15d), region = 70  ;;  %s1022_s8 = sshll.u32 (!%p368_p10), %s374_s7, 8 }
  0x39   : > { %s1409_s13 = scalar_lea.vmem (!%p368_p10), [#allocation2], %s1022_s8  ;;  %p421_p11 = scmp.lt.s32.totalorder (!%p368_p10), %s1023_s6, 7 }
  0x3a   : > { %s1117_s14 = smul.u32 (!%p368_p10), 56, %s374_s7 }
  0x3c   : > { %s1467_s15 = scalar_lea.vmem (!%p368_p10), [#allocation3], %s1117_s14 }
  0x3d   : > { %v1208_v32 = vld [vmem:[%s1504_s0 + $0x4] ss:$8 sps:$4 sm:$0xff]   ;;  %v1158_v34 = vld [vmem:[%s1409_s13 + $0x74] ss:$8 sps:$4 sm:$0xff]   ;;  %v1160_v35 = vld [vmem:[%s1409_s13 + $0x70] ss:$8 sps:$4 sm:$0xff]   ;;  %v741_v9 = vlaneseq }
  0x3e   : > { %v1211_v33 = vld [vmem:[%s1504_s0 + $0x24] ss:$8 sps:$4 sm:$0xff]   ;;  %700 = vmatprep.mubr.bf16.mxu0 %v1208_v32  ;;  %668 = vmatprep.subr.bf16.mxu0 %v1158_v34  ;;  %v1163_v37 = vld [vmem:[%s1409_s13 + $0x60] ss:$8 sps:$4 sm:$0xff]   ;;  %v1164_v38 = vld [vmem:[%s1409_s13 + $0x54] ss:$8 sps:$4 sm:$0xff]  }
  0x3f   : > { %720 = vmatprep.mubr.bf16.mxu1 %v1211_v33  ;;  %1085 = vmatprep.subr.bf16.mxu1 %v1158_v34  ;;  %v1161_v36 = vld [vmem:[%s1409_s13 + $0x64] ss:$8 sps:$4 sm:$0xff]   ;;  %v1166_v39 = vld [vmem:[%s1409_s13 + $0x50] ss:$8 sps:$4 sm:$0xff]   ;;  %v1169_v41 = vld [vmem:[%s1409_s13 + $0x40] ss:$8 sps:$4 sm:$0xff]  }
  0x40   : > { %669 = vmatpush1.bf16.msra.mxu0 %v1160_v35  ;;  %1101 = vmatpush1.bf16.msra.mxu1 %v1160_v35  ;;  %v1167_v40 = vld [vmem:[%s1409_s13 + $0x44] ss:$8 sps:$4 sm:$0xff]   ;;  %v1170_v42 = vld [vmem:[%s1409_s13 + $0x34] ss:$8 sps:$4 sm:$0xff]   ;;  %v1172_v43 = vld [vmem:[%s1409_s13 + $0x30] ss:$8 sps:$4 sm:$0xff]  }
  0x41   : > { %670 = vmatprep.subr.bf16.mxu0 %v1161_v36  ;;  %1086 = vmatprep.subr.bf16.mxu1 %v1161_v36  ;;  %v1173_v44 = vld [vmem:[%s1409_s13 + $0x24] ss:$8 sps:$4 sm:$0xff]   ;;  %v1175_v45 = vld [vmem:[%s1409_s13 + $0x20] ss:$8 sps:$4 sm:$0xff]   ;;  %v1176_v46 = vld [vmem:[%s1409_s13 + $0x14] ss:$8 sps:$4 sm:$0xff]  }
  0x42   : > { %v1178_v47 = vld [vmem:[%s1409_s13 + $0x10] ss:$8 sps:$4 sm:$0xff]   ;;  %v1179_v48 = vld [vmem:[%s1409_s13 + $0x4] ss:$8 sps:$4 sm:$0xff]   ;;  %v1181_v49 = vld [vmem:[%s1409_s13] ss:$8 sps:$4 sm:$0xff]  }
  0x43   : > { %v1182_v50 = vld [vmem:[%s1409_s13 + $0xf4] ss:$8 sps:$4 sm:$0xff]   ;;  %v1184_v51 = vld [vmem:[%s1409_s13 + $0xf0] ss:$8 sps:$4 sm:$0xff]   ;;  %v1185_v52 = vld [vmem:[%s1409_s13 + $0xe4] ss:$8 sps:$4 sm:$0xff]  }
  0x44   : > { %671 = vmatpush1.bf16.msra.mxu0 %v1163_v37  ;;  %1102 = vmatpush1.bf16.msra.mxu1 %v1163_v37  ;;  %v1187_v53 = vld [vmem:[%s1409_s13 + $0xe0] ss:$8 sps:$4 sm:$0xff]   ;;  %v1188_v54 = vld [vmem:[%s1409_s13 + $0xd4] ss:$8 sps:$4 sm:$0xff]   ;;  %v1190_v55 = vld [vmem:[%s1409_s13 + $0xd0] ss:$8 sps:$4 sm:$0xff]  }
  0x45   : > { %672 = vmatprep.subr.bf16.mxu0 %v1164_v38  ;;  %1087 = vmatprep.subr.bf16.mxu1 %v1164_v38  ;;  %v1191_v56 = vld [vmem:[%s1409_s13 + $0xc4] ss:$8 sps:$4 sm:$0xff]   ;;  %v1193_v57 = vld [vmem:[%s1409_s13 + $0xc0] ss:$8 sps:$4 sm:$0xff]   ;;  %v1194_v58 = vld [vmem:[%s1409_s13 + $0xb4] ss:$8 sps:$4 sm:$0xff]  }
  0x46   : > { %v1196_v59 = vld [vmem:[%s1409_s13 + $0xb0] ss:$8 sps:$4 sm:$0xff]   ;;  %v1197_v60 = vld [vmem:[%s1409_s13 + $0xa4] ss:$8 sps:$4 sm:$0xff]   ;;  %v1199_v61 = vld [vmem:[%s1409_s13 + $0xa0] ss:$8 sps:$4 sm:$0xff]  }
  0x47   : > { %v1200_v62 = vld [vmem:[%s1409_s13 + $0x94] ss:$8 sps:$4 sm:$0xff]   ;;  %v1202_v63 = vld [vmem:[%s1409_s13 + $0x90] ss:$8 sps:$4 sm:$0xff]   ;;  %v1203_v0 = vld [vmem:[%s1409_s13 + $0x84] ss:$8 sps:$4 sm:$0xff]  }
  0x48   : > { %673 = vmatpush1.bf16.msra.mxu0 %v1166_v39  ;;  %1103 = vmatpush1.bf16.msra.mxu1 %v1166_v39  ;;  %v1205_v1 = vld [vmem:[%s1409_s13 + $0x80] ss:$8 sps:$4 sm:$0xff]   ;;  %v438_v2 = vld [vmem:[%s1504_s0 + $0x30] sm:$0xff]  ;;  %s1517_s6 = smov (!%p421_p11, %s1023_s6), 7  ;;  %v742_v10 = vshrl.u32 %v741_v9, 7  ;;  %s1084_s7 = sshll.u32 (%p1317_p6), %s1247_s17, 3 }
  0x49   : > { %674 = vmatprep.subr.bf16.mxu0 %v1167_v40  ;;  %1088 = vmatprep.subr.bf16.mxu1 %v1167_v40  ;;  %v1206_v3 = vld [vmem:[%s1504_s0] ss:$8 sps:$4 sm:$0xff]   ;;  %v1212_v5 = vld [vmem:[%s1504_s0 + $0x14] ss:$8 sps:$4 sm:$0xff]   ;;  %v1032_v6 = vcombine.high %v438_v2, %v438_v2  ;;  %v1215_v7 = vld [vmem:[%s1504_s0 + $0x10] ss:$8 sps:$4 sm:$0xff]   ;;  %v1031_v8 = vcombine.low %v438_v2, %v438_v2  ;;  %s423_s10 = scalar_lea.vmem %s1506_s2, %s1517_s6  ;;  %s428_s13 = scalar_lea.vmem %s1507_s3, %s1517_s6 }
  0x4a   : > { %v1209_v4 = vld [vmem:[%s1504_s0 + $0x20] ss:$8 sps:$4 sm:$0xff]   ;;  %v743_v11 = vsub.s32 0, %v742_v10  ;;  %v747_v13 = vsub.s32 1, %v742_v10  ;;  %s854_s23 = scalar_lea.vmem (%p1317_p6), %s1508_s4, %s1084_s7 }
  0x4b   : > { %v739_v12 = vld [vmem:[%s423_s10] sm:$0x3] }
  0x4c   : > { %675 = vmatpush1.bf16.msra.mxu0 %v1169_v41  ;;  %1104 = vmatpush1.bf16.msra.mxu1 %v1169_v41  ;;  %v744_v14 = vrot.slane %v739_v12, %v743_v11  ;;  %v765_v15 = vld [vmem:[%s428_s13] sm:$0x3]  ;;  %v748_v16 = vrot.slane %v739_v12, %v747_v13 }
  0x4d   : > { %676 = vmatprep.subr.bf16.mxu0 %v1170_v42  ;;  %1089 = vmatprep.subr.bf16.mxu1 %v1170_v42  ;;  %v770_v20 = vrot.slane %v765_v15, %v743_v11  ;;  %v774_v22 = vrot.slane %v765_v15, %v747_v13 }
  0x50   : > { %677 = vmatpush1.bf16.msra.mxu0 %v1172_v43  ;;  %1105 = vmatpush1.bf16.msra.mxu1 %v1172_v43 }
  0x51   : > { %678 = vmatprep.subr.bf16.mxu0 %v1173_v44  ;;  %1090 = vmatprep.subr.bf16.mxu1 %v1173_v44 }
  0x54   : > { %679 = vmatpush1.bf16.msra.mxu0 %v1175_v45  ;;  %1106 = vmatpush1.bf16.msra.mxu1 %v1175_v45 }
  0x55   : > { %680 = vmatprep.subr.bf16.mxu0 %v1176_v46  ;;  %1091 = vmatprep.subr.bf16.mxu1 %v1176_v46 }
  0x58   : > { %681 = vmatpush1.bf16.msra.mxu0 %v1178_v47  ;;  %1107 = vmatpush1.bf16.msra.mxu1 %v1178_v47 }
  0x59   : > { %682 = vmatprep.subr.bf16.mxu0 %v1179_v48  ;;  %1092 = vmatprep.subr.bf16.mxu1 %v1179_v48 }
  0x5c   : > { %683 = vmatpush1.bf16.msra.mxu0 %v1181_v49  ;;  %1108 = vmatpush1.bf16.msra.mxu1 %v1181_v49 }
  0x5d   : > { %684 = vmatprep.subr.bf16.mxu0 %v1182_v50  ;;  %1093 = vmatprep.subr.bf16.mxu1 %v1182_v50 }
  0x60   : > { %685 = vmatpush2.bf16.msra.mxu0 %v1184_v51  ;;  %1109 = vmatpush2.bf16.msra.mxu1 %v1184_v51 }
  0x61   : > { %686 = vmatprep.subr.bf16.mxu0 %v1185_v52  ;;  %1094 = vmatprep.subr.bf16.mxu1 %v1185_v52 }
  0x64   : > { %687 = vmatpush2.bf16.msra.mxu0 %v1187_v53  ;;  %1110 = vmatpush2.bf16.msra.mxu1 %v1187_v53 }
  0x65   : > { %688 = vmatprep.subr.bf16.mxu0 %v1188_v54  ;;  %1095 = vmatprep.subr.bf16.mxu1 %v1188_v54 }
  0x68   : > { %689 = vmatpush2.bf16.msra.mxu0 %v1190_v55  ;;  %1111 = vmatpush2.bf16.msra.mxu1 %v1190_v55 }
  0x69   : > { %690 = vmatprep.subr.bf16.mxu0 %v1191_v56  ;;  %1096 = vmatprep.subr.bf16.mxu1 %v1191_v56 }
  0x6c   : > { %691 = vmatpush2.bf16.msra.mxu0 %v1193_v57  ;;  %1112 = vmatpush2.bf16.msra.mxu1 %v1193_v57 }
  0x6d   : > { %692 = vmatprep.subr.bf16.mxu0 %v1194_v58  ;;  %1097 = vmatprep.subr.bf16.mxu1 %v1194_v58 }
  0x70   : > { %693 = vmatpush2.bf16.msra.mxu0 %v1196_v59  ;;  %1113 = vmatpush2.bf16.msra.mxu1 %v1196_v59 }
  0x71   : > { %694 = vmatprep.subr.bf16.mxu0 %v1197_v60  ;;  %1098 = vmatprep.subr.bf16.mxu1 %v1197_v60 }
  0x74   : > { %695 = vmatpush2.bf16.msra.mxu0 %v1199_v61  ;;  %1114 = vmatpush2.bf16.msra.mxu1 %v1199_v61 }
  0x75   : > { %696 = vmatprep.subr.bf16.mxu0 %v1200_v62  ;;  %1099 = vmatprep.subr.bf16.mxu1 %v1200_v62 }
  0x78   : > { %697 = vmatpush2.bf16.msra.mxu0 %v1202_v63  ;;  %1115 = vmatpush2.bf16.msra.mxu1 %v1202_v63 }
  0x79   : > { %698 = vmatprep.subr.bf16.mxu0 %v1203_v0  ;;  %1100 = vmatprep.subr.bf16.mxu1 %v1203_v0 }
  0x7c   : > { %699 = vmatpush2.bf16.msra.mxu0 %v1205_v1  ;;  %1116 = vmatpush2.bf16.msra.mxu1 %v1205_v1 }
  0x7f   : > { %701 = vmatmul.mubr.bf16.vlgmr.msra.gmra.mxu0 %v1206_v3  ;;  %721 = vmatmul.mubr.bf16.vlgmr.msra.gmra.mxu1 %v1209_v4 }
  0x80   : > { %710 = vmatprep.mubr.bf16.mxu0 %v1212_v5  ;;  %730 = vmatprep.mubr.bf16.mxu1 %v1032_v6 }
  0x87   : > { %711 = vmatmul.mubr.bf16.gmra.mxu0 %v1215_v7  ;;  %731 = vmatmul.mubr.bf16.gmra.mxu1 %v1031_v8 }
 0x13f   : > { %v702_v17 = vpop.f32.mrf.mxu0  ;;  %v722_v18 = vpop.f32.mrf.mxu1 }
 0x140   : > { %v751_v19 = vmul.f32 %v744_v14, %v702_v17  ;;  %v759_v21 = vmul.f32 %v744_v14, %v722_v18 }
 0x141   : > { %v704_v23 = vpop.f32.mrf.mxu0  ;;  %v724_v24 = vpop.f32.mrf.mxu1 }
 0x142   : > { %v785_v25 = vadd.f32 %v770_v20, %v759_v21  ;;  %v752_v26 = vmul.f32 %v748_v16, %v704_v23  ;;  %v760_v27 = vmul.f32 %v748_v16, %v724_v24  ;;  %v777_v30 = vadd.f32 %v770_v20, %v751_v19 }
 0x143   : > { %v706_v28 = vpop.f32.mrf.mxu0  ;;  %v726_v29 = vpop.f32.mrf.mxu1 }
 0x144   : > { %v778_v31 = vadd.f32 %v774_v22, %v752_v26  ;;  %v786_v32 = vadd.f32 %v774_v22, %v760_v27  ;;  %v753_v33 = vmul.f32 %v744_v14, %v706_v28  ;;  %v761_v34 = vmul.f32 %v744_v14, %v726_v29 }
 0x145   : > { %v708_v35 = vpop.f32.mrf.mxu0  ;;  %v728_v36 = vpop.f32.mrf.mxu1 }
 0x146   : > { %v1077_v37 = vpack.c.bf16 %v778_v31, %v777_v30  ;;  %v1081_v38 = vpack.c.bf16 %v786_v32, %v785_v25  ;;  %v754_v39 = vmul.f32 %v748_v16, %v708_v35  ;;  %v762_v40 = vmul.f32 %v748_v16, %v728_v36 }
 0x147   : > { %v712_v41 = vpop.f32.mrf.mxu0  ;;  %v732_v42 = vpop.f32.mrf.mxu1  ;;  %v779_v45 = vadd.f32 %v770_v20, %v753_v33  ;;  %v787_v46 = vadd.f32 %v770_v20, %v761_v34 }
 0x148   : > { %835 = vst [vmem:[%s1467_s15] sm:$0xff] %v1077_v37  ;;  %839 = vst [vmem:[%s1467_s15 + $0x20] sm:$0xff] %v1081_v38  ;;  %v755_v43 = vmul.f32 %v744_v14, %v712_v41  ;;  %v763_v44 = vmul.f32 %v744_v14, %v732_v42  ;;  %v780_v47 = vadd.f32 %v774_v22, %v754_v39 }
 0x149   : > { %v788_v48 = vadd.f32 %v774_v22, %v762_v40  ;;  %v714_v49 = vpop.f32.mrf.mxu0  ;;  %v734_v50 = vpop.f32.mrf.mxu1 }
 0x14a   : > { %v789_v51 = vadd.f32 %v770_v20, %v763_v44  ;;  %v756_v52 = vmul.f32 %v748_v16, %v714_v49  ;;  %v764_v53 = vmul.f32 %v748_v16, %v734_v50  ;;  %v1078_v54 = vpack.c.bf16 %v780_v47, %v779_v45 }
 0x14b   : > { %v1082_v55 = vpack.c.bf16 %v788_v48, %v787_v46  ;;  %v716_v56 = vpop.f32.mrf.mxu0  ;;  %v736_v57 = vpop.f32.mrf.mxu1  ;;  %v781_v58 = vadd.f32 %v770_v20, %v755_v43 }
 0x14c   : > { %v782_v59 = vadd.f32 %v774_v22, %v756_v52  ;;  %v790_v60 = vadd.f32 %v774_v22, %v764_v53  ;;  %v757_v61 = vmul.f32 %v744_v14, %v716_v56  ;;  %836 = vst [vmem:[%s1467_s15 + $0x8] sm:$0xff] %v1078_v54 }
 0x14d   : > { %840 = vst [vmem:[%s1467_s15 + $0x28] sm:$0xff] %v1082_v55  ;;  %v718_v62 = vpop.f32.mrf.mxu0  ;;  %v737_v63 = vpop.f32.mrf.mxu1 }
 0x14e   : > { %v1079_v0 = vpack.c.bf16 %v782_v59, %v781_v58  ;;  %v1083_v1 = vpack.c.bf16 %v790_v60, %v789_v51  ;;  %v758_v2 = vmul.f32 %v748_v16, %v718_v62  ;;  %v783_v3 = vadd.f32 %v770_v20, %v757_v61 }
 0x14f   : > { %v895_v6 = vld [vmem:[%s1467_s15] sm:$0xff] (%p1317_p6) }
 0x150   : > { %837 = vst [vmem:[%s1467_s15 + $0x10] sm:$0xff] %v1079_v0  ;;  %841 = vst [vmem:[%s1467_s15 + $0x30] sm:$0xff] %v1083_v1  ;;  %v784_v4 = vadd.f32 %v774_v22, %v758_v2  ;;  %848 = sbr.rel (!%p1317_p6) target bundleno = 349 (0x15d), region = 78  ;;  %v903_v10 = vld [vmem:[%s1467_s15 + $0x20] sm:$0xff] (%p1317_p6) }
 0x151   : > { %896 = vst [vmem:[%s854_s23] sm:$0xff] (%p1317_p6), %v895_v6  ;;  %904 = vst [vmem:[%s854_s23 + $0x80] sm:$0xff] (%p1317_p6), %v903_v10 }
 0x152   : > { %v1080_v5 = vpack.c.bf16 %v784_v4, %v783_v3 }
 0x153   : > { %v897_v7 = vld [vmem:[%s1467_s15 + $0x8] sm:$0xff] (%p1317_p6) }
 0x154   : > { %838 = vst [vmem:[%s1467_s15 + $0x18] sm:$0xff] %v1080_v5  ;;  %v905_v11 = vld [vmem:[%s1467_s15 + $0x28] sm:$0xff] (%p1317_p6)  ;;  %898 = vst [vmem:[%s854_s23 + $0x20] sm:$0xff] (%p1317_p6), %v897_v7 }
 0x155   : > { %906 = vst [vmem:[%s854_s23 + $0xa0] sm:$0xff] %v905_v11 }
 0x157   : > { %v899_v8 = vld [vmem:[%s1467_s15 + $0x10] sm:$0xff] }
 0x158   : > { %900 = vst [vmem:[%s854_s23 + $0x40] sm:$0xff] %v899_v8  ;;  %v907_v12 = vld [vmem:[%s1467_s15 + $0x30] sm:$0xff] }
 0x159   : > { %908 = vst [vmem:[%s854_s23 + $0xc0] sm:$0xff] %v907_v12 }
 0x15b   : > { %v901_v9 = vld [vmem:[%s1467_s15 + $0x18] sm:$0xff] }
 0x15c   : > { %902 = vst [vmem:[%s854_s23 + $0x60] sm:$0xff] %v901_v9 }
 0x15d PF: > { %s14_s19 = sadd.s32 1, %s1255_s19   ;;  %s1510_s15 = smov %s1243_s16 }
 0x15e   : > { %p11_p12 = scmp.ge.s32.totalorder %s14_s19, 6   ;;  %s1511_s16 = smov %s1322_s25 }
 0x15f   : > { %s1512_s17 = smov %s1251_s18  ;;  %s1513_s18 = smov %s1515_s20 }
 0x160   :  { %13 = sbr.rel (!%p11_p12) target bundleno = 3 (0x3), region = 156 }

// kernel: psp_forward.5
= control target key start
LH: loop header
LB: loop body
LE: loop exit
PB: predicated region body
PF: predicated region fallthrough
CT: control target
= control target key end

     0   :  { %s2074_s15 = smov 0   ;;  %s2076_s16 = smov 0   ;;  %s2521_s0 = inlined_call_operand.vmem [shape: bf16[104,512], index: 0, kind: input, shape index: {}]   ;;  %s2522_s1 = inlined_call_operand.vmem [shape: bf16[512,512], index: 1, kind: input, shape index: {}]   ;;  %s2523_s2 = inlined_call_operand.vmem [shape: f32[1,512], index: 2, kind: input, shape index: {}]   ;;  %s2524_s3 = inlined_call_operand.vmem [shape: f32[1,512], index: 3, kind: input, shape index: {}]   ;;  %s2525_s4 = inlined_call_operand.vmem [shape: bf16[104,512], index: 4, kind: output, shape index: {}]  }
   0x1   :  { %s2078_s17 = smov 0   ;;  %s2080_s18 = smov 0  }
   0x2   :  { %s2082_s19 = smov 0  }
   0x3 LB: > { %s23_s20 = sadd.s32 1, %s2043_s18  ;;  %s1696_s21 = sadd.s32 4294967295, %s2047_s19   ;;  %s2047_s19 = sphi %s2082_s19, %s14_s19   ;;  %s2043_s18 = sphi %s2080_s18, %s2530_s18   ;;  %s2039_s17 = sphi %s2078_s17, %s2529_s17   ;;  %s2035_s16 = sphi %s2076_s16, %s2528_s16   ;;  %s2031_s15 = sphi %s2074_s15, %s2527_s15  }
   0x4   : > { %p24_p0 = scmp.ge.s32.totalorder %s23_s20, 2  ;;  %p66_p1 = scmp.ne.s32.totalorder %s2035_s16, %s2031_s15 }
   0x5   : > { %p67_p2 = scmp.eq.s32.totalorder %s2047_s19, 0  ;;  %p150_p4 = scmp.eq.s32.totalorder %s1696_s21, 1 }
   0x6   : > { %s2532_s20 = smov (%p24_p0, %s23_s20), 0  ;;  %s59_s23 = sadd.s32 1, %s2035_s16 }
   0x7   : > { %p68_p3 = por %p67_p2, %p66_p1  ;;  %s56_s22 = ssub.s32 %s2043_s18, %s2532_s20 }
   0x8   : > { %p57_p5 = scmp.eq.s32.totalorder %s56_s22, 0  ;;  %p2109_p6 = por %p150_p4, %p66_p1 }
   0x9   : > { %p1700_p7 = scmp.ge.s32.totalorder %s2047_s19, 2 }
   0xa   : > { %s2114_s25 = scalar_select %p57_p5, %s2035_s16, %s59_s23  }
   0xb   : > { %182 = sbr.rel (%p1700_p7) target bundleno = 52 (0x34), region = 20 }
  0x10   : > { %185 = sbr.rel (!%p68_p3) target bundleno = 52 (0x34), region = 24  ;;  %s187_s26 = sand.u32 (%p68_p3), 1, %s2035_s16  }
  0x11   : > { %s1817_s27 = sshll.u32 (%p68_p3), %s2043_s18, 3  ;;  %s1701_s28 = sshll.u32 (%p68_p3), %s187_s26, 9 }
  0x12   : > { %s2122_s5 = scalar_lea.vmem (%p68_p3), %s2522_s1, %s1817_s27  ;;  %s2127_s6 = scalar_lea.vmem (%p68_p3), [#allocation2], %s1701_s28 }
  0x13   : > { %v347_v0 = vld [vmem:[%s2122_s5] sm:$0xff] (%p68_p3)  ;;  %v349_v1 = vld [vmem:[%s2122_s5 + $0x10] sm:$0xff] (%p68_p3) }
  0x14   : > { %v351_v2 = vld [vmem:[%s2122_s5 + $0x20] sm:$0xff] (%p68_p3)  ;;  %348 = vst [vmem:[%s2127_s6] sm:$0xff] (%p68_p3), %v347_v0  ;;  %350 = vst [vmem:[%s2127_s6 + $0x8] sm:$0xff] (%p68_p3), %v349_v1  ;;  %v353_v3 = vld [vmem:[%s2122_s5 + $0x30] sm:$0xff] (%p68_p3) }
  0x15   : > { %352 = vst [vmem:[%s2127_s6 + $0x10] sm:$0xff] %v351_v2  ;;  %v355_v4 = vld [vmem:[%s2122_s5 + $0x40] sm:$0xff]  ;;  %v357_v5 = vld [vmem:[%s2122_s5 + $0x50] sm:$0xff]  ;;  %354 = vst [vmem:[%s2127_s6 + $0x18] sm:$0xff] %v353_v3 }
  0x16   : > { %356 = vst [vmem:[%s2127_s6 + $0x20] sm:$0xff] %v355_v4  ;;  %358 = vst [vmem:[%s2127_s6 + $0x28] sm:$0xff] %v357_v5  ;;  %v359_v6 = vld [vmem:[%s2122_s5 + $0x60] sm:$0xff]  ;;  %v361_v7 = vld [vmem:[%s2122_s5 + $0x70] sm:$0xff] }
  0x17   : > { %v363_v8 = vld [vmem:[%s2122_s5 + $0x80] sm:$0xff]  ;;  %360 = vst [vmem:[%s2127_s6 + $0x30] sm:$0xff] %v359_v6  ;;  %362 = vst [vmem:[%s2127_s6 + $0x38] sm:$0xff] %v361_v7  ;;  %v365_v9 = vld [vmem:[%s2122_s5 + $0x90] sm:$0xff] }
  0x18   : > { %364 = vst [vmem:[%s2127_s6 + $0x40] sm:$0xff] %v363_v8  ;;  %v367_v10 = vld [vmem:[%s2122_s5 + $0xa0] sm:$0xff]  ;;  %v369_v11 = vld [vmem:[%s2122_s5 + $0xb0] sm:$0xff]  ;;  %366 = vst [vmem:[%s2127_s6 + $0x48] sm:$0xff] %v365_v9 }
  0x19   : > { %368 = vst [vmem:[%s2127_s6 + $0x50] sm:$0xff] %v367_v10  ;;  %370 = vst [vmem:[%s2127_s6 + $0x58] sm:$0xff] %v369_v11  ;;  %v371_v12 = vld [vmem:[%s2122_s5 + $0xc0] sm:$0xff]  ;;  %v373_v13 = vld [vmem:[%s2122_s5 + $0xd0] sm:$0xff] }
  0x1a   : > { %v375_v14 = vld [vmem:[%s2122_s5 + $0xe0] sm:$0xff]  ;;  %372 = vst [vmem:[%s2127_s6 + $0x60] sm:$0xff] %v371_v12  ;;  %374 = vst [vmem:[%s2127_s6 + $0x68] sm:$0xff] %v373_v13  ;;  %v377_v15 = vld [vmem:[%s2122_s5 + $0xf0] sm:$0xff] }
  0x1b   : > { %376 = vst [vmem:[%s2127_s6 + $0x70] sm:$0xff] %v375_v14  ;;  %v379_v16 = vld [vmem:[%s2122_s5 + $0x100] sm:$0xff]  ;;  %v381_v17 = vld [vmem:[%s2122_s5 + $0x110] sm:$0xff]  ;;  %378 = vst [vmem:[%s2127_s6 + $0x78] sm:$0xff] %v377_v15 }
  0x1c   : > { %380 = vst [vmem:[%s2127_s6 + $0x80] sm:$0xff] %v379_v16  ;;  %382 = vst [vmem:[%s2127_s6 + $0x88] sm:$0xff] %v381_v17  ;;  %v383_v18 = vld [vmem:[%s2122_s5 + $0x120] sm:$0xff]  ;;  %v385_v19 = vld [vmem:[%s2122_s5 + $0x130] sm:$0xff] }
  0x1d   : > { %v387_v20 = vld [vmem:[%s2122_s5 + $0x140] sm:$0xff]  ;;  %384 = vst [vmem:[%s2127_s6 + $0x90] sm:$0xff] %v383_v18  ;;  %386 = vst [vmem:[%s2127_s6 + $0x98] sm:$0xff] %v385_v19  ;;  %v389_v21 = vld [vmem:[%s2122_s5 + $0x150] sm:$0xff] }
  0x1e   : > { %388 = vst [vmem:[%s2127_s6 + $0xa0] sm:$0xff] %v387_v20  ;;  %v391_v22 = vld [vmem:[%s2122_s5 + $0x160] sm:$0xff]  ;;  %v393_v23 = vld [vmem:[%s2122_s5 + $0x170] sm:$0xff]  ;;  %390 = vst [vmem:[%s2127_s6 + $0xa8] sm:$0xff] %v389_v21 }
  0x1f   : > { %392 = vst [vmem:[%s2127_s6 + $0xb0] sm:$0xff] %v391_v22  ;;  %394 = vst [vmem:[%s2127_s6 + $0xb8] sm:$0xff] %v393_v23  ;;  %v395_v24 = vld [vmem:[%s2122_s5 + $0x180] sm:$0xff]  ;;  %v397_v25 = vld [vmem:[%s2122_s5 + $0x190] sm:$0xff] }
  0x20   : > { %v399_v26 = vld [vmem:[%s2122_s5 + $0x1a0] sm:$0xff]  ;;  %396 = vst [vmem:[%s2127_s6 + $0xc0] sm:$0xff] %v395_v24  ;;  %398 = vst [vmem:[%s2127_s6 + $0xc8] sm:$0xff] %v397_v25  ;;  %v401_v27 = vld [vmem:[%s2122_s5 + $0x1b0] sm:$0xff] }
  0x21   : > { %400 = vst [vmem:[%s2127_s6 + $0xd0] sm:$0xff] %v399_v26  ;;  %v403_v28 = vld [vmem:[%s2122_s5 + $0x1c0] sm:$0xff]  ;;  %v405_v29 = vld [vmem:[%s2122_s5 + $0x1d0] sm:$0xff]  ;;  %402 = vst [vmem:[%s2127_s6 + $0xd8] sm:$0xff] %v401_v27 }
  0x22   : > { %404 = vst [vmem:[%s2127_s6 + $0xe0] sm:$0xff] %v403_v28  ;;  %406 = vst [vmem:[%s2127_s6 + $0xe8] sm:$0xff] %v405_v29  ;;  %v407_v30 = vld [vmem:[%s2122_s5 + $0x1e0] sm:$0xff]  ;;  %v409_v31 = vld [vmem:[%s2122_s5 + $0x1f0] sm:$0xff] }
  0x23   : > { %v411_v32 = vld [vmem:[%s2122_s5 + $0x200] sm:$0xff]  ;;  %408 = vst [vmem:[%s2127_s6 + $0xf0] sm:$0xff] %v407_v30  ;;  %410 = vst [vmem:[%s2127_s6 + $0xf8] sm:$0xff] %v409_v31  ;;  %v413_v33 = vld [vmem:[%s2122_s5 + $0x210] sm:$0xff] }
  0x24   : > { %412 = vst [vmem:[%s2127_s6 + $0x100] sm:$0xff] %v411_v32  ;;  %v415_v34 = vld [vmem:[%s2122_s5 + $0x220] sm:$0xff]  ;;  %v417_v35 = vld [vmem:[%s2122_s5 + $0x230] sm:$0xff]  ;;  %414 = vst [vmem:[%s2127_s6 + $0x108] sm:$0xff] %v413_v33 }
  0x25   : > { %416 = vst [vmem:[%s2127_s6 + $0x110] sm:$0xff] %v415_v34  ;;  %418 = vst [vmem:[%s2127_s6 + $0x118] sm:$0xff] %v417_v35  ;;  %v419_v36 = vld [vmem:[%s2122_s5 + $0x240] sm:$0xff]  ;;  %v421_v37 = vld [vmem:[%s2122_s5 + $0x250] sm:$0xff] }
  0x26   : > { %v423_v38 = vld [vmem:[%s2122_s5 + $0x260] sm:$0xff]  ;;  %420 = vst [vmem:[%s2127_s6 + $0x120] sm:$0xff] %v419_v36  ;;  %422 = vst [vmem:[%s2127_s6 + $0x128] sm:$0xff] %v421_v37  ;;  %v425_v39 = vld [vmem:[%s2122_s5 + $0x270] sm:$0xff] }
  0x27   : > { %424 = vst [vmem:[%s2127_s6 + $0x130] sm:$0xff] %v423_v38  ;;  %v427_v40 = vld [vmem:[%s2122_s5 + $0x280] sm:$0xff]  ;;  %v429_v41 = vld [vmem:[%s2122_s5 + $0x290] sm:$0xff]  ;;  %426 = vst [vmem:[%s2127_s6 + $0x138] sm:$0xff] %v425_v39 }
  0x28   : > { %428 = vst [vmem:[%s2127_s6 + $0x140] sm:$0xff] %v427_v40  ;;  %430 = vst [vmem:[%s2127_s6 + $0x148] sm:$0xff] %v429_v41  ;;  %v431_v42 = vld [vmem:[%s2122_s5 + $0x2a0] sm:$0xff]  ;;  %v433_v43 = vld [vmem:[%s2122_s5 + $0x2b0] sm:$0xff] }
  0x29   : > { %v435_v44 = vld [vmem:[%s2122_s5 + $0x2c0] sm:$0xff]  ;;  %432 = vst [vmem:[%s2127_s6 + $0x150] sm:$0xff] %v431_v42  ;;  %434 = vst [vmem:[%s2127_s6 + $0x158] sm:$0xff] %v433_v43  ;;  %v437_v45 = vld [vmem:[%s2122_s5 + $0x2d0] sm:$0xff] }
  0x2a   : > { %436 = vst [vmem:[%s2127_s6 + $0x160] sm:$0xff] %v435_v44  ;;  %v439_v46 = vld [vmem:[%s2122_s5 + $0x2e0] sm:$0xff]  ;;  %v441_v47 = vld [vmem:[%s2122_s5 + $0x2f0] sm:$0xff]  ;;  %438 = vst [vmem:[%s2127_s6 + $0x168] sm:$0xff] %v437_v45 }
  0x2b   : > { %440 = vst [vmem:[%s2127_s6 + $0x170] sm:$0xff] %v439_v46  ;;  %442 = vst [vmem:[%s2127_s6 + $0x178] sm:$0xff] %v441_v47  ;;  %v443_v48 = vld [vmem:[%s2122_s5 + $0x300] sm:$0xff]  ;;  %v445_v49 = vld [vmem:[%s2122_s5 + $0x310] sm:$0xff] }
  0x2c   : > { %v447_v50 = vld [vmem:[%s2122_s5 + $0x320] sm:$0xff]  ;;  %444 = vst [vmem:[%s2127_s6 + $0x180] sm:$0xff] %v443_v48  ;;  %446 = vst [vmem:[%s2127_s6 + $0x188] sm:$0xff] %v445_v49  ;;  %v449_v51 = vld [vmem:[%s2122_s5 + $0x330] sm:$0xff] }
  0x2d   : > { %448 = vst [vmem:[%s2127_s6 + $0x190] sm:$0xff] %v447_v50  ;;  %v451_v52 = vld [vmem:[%s2122_s5 + $0x340] sm:$0xff]  ;;  %v453_v53 = vld [vmem:[%s2122_s5 + $0x350] sm:$0xff]  ;;  %450 = vst [vmem:[%s2127_s6 + $0x198] sm:$0xff] %v449_v51 }
  0x2e   : > { %452 = vst [vmem:[%s2127_s6 + $0x1a0] sm:$0xff] %v451_v52  ;;  %454 = vst [vmem:[%s2127_s6 + $0x1a8] sm:$0xff] %v453_v53  ;;  %v455_v54 = vld [vmem:[%s2122_s5 + $0x360] sm:$0xff]  ;;  %v457_v55 = vld [vmem:[%s2122_s5 + $0x370] sm:$0xff] }
  0x2f   : > { %v459_v56 = vld [vmem:[%s2122_s5 + $0x380] sm:$0xff]  ;;  %456 = vst [vmem:[%s2127_s6 + $0x1b0] sm:$0xff] %v455_v54  ;;  %458 = vst [vmem:[%s2127_s6 + $0x1b8] sm:$0xff] %v457_v55  ;;  %v461_v57 = vld [vmem:[%s2122_s5 + $0x390] sm:$0xff] }
  0x30   : > { %460 = vst [vmem:[%s2127_s6 + $0x1c0] sm:$0xff] %v459_v56  ;;  %v463_v58 = vld [vmem:[%s2122_s5 + $0x3a0] sm:$0xff]  ;;  %v465_v59 = vld [vmem:[%s2122_s5 + $0x3b0] sm:$0xff]  ;;  %462 = vst [vmem:[%s2127_s6 + $0x1c8] sm:$0xff] %v461_v57 }
  0x31   : > { %464 = vst [vmem:[%s2127_s6 + $0x1d0] sm:$0xff] %v463_v58  ;;  %466 = vst [vmem:[%s2127_s6 + $0x1d8] sm:$0xff] %v465_v59  ;;  %v467_v60 = vld [vmem:[%s2122_s5 + $0x3c0] sm:$0xff]  ;;  %v469_v61 = vld [vmem:[%s2122_s5 + $0x3d0] sm:$0xff] }
  0x32   : > { %v471_v62 = vld [vmem:[%s2122_s5 + $0x3e0] sm:$0xff]  ;;  %468 = vst [vmem:[%s2127_s6 + $0x1e0] sm:$0xff] %v467_v60  ;;  %470 = vst [vmem:[%s2127_s6 + $0x1e8] sm:$0xff] %v469_v61  ;;  %v473_v63 = vld [vmem:[%s2122_s5 + $0x3f0] sm:$0xff] }
  0x33   : > { %472 = vst [vmem:[%s2127_s6 + $0x1f0] sm:$0xff] %v471_v62  ;;  %474 = vst [vmem:[%s2127_s6 + $0x1f8] sm:$0xff] %v473_v63 }
  0x34 PF: > { %p1704_p8 = scmp.ge.s32.totalorder %s2047_s19, 1  ;;  %p495_p9 = scmp.lt.s32.totalorder %s2047_s19, 3 }
  0x36   : > { %p496_p10 = pnand %p1704_p8, %p495_p9 }
  0x37   : > { %s502_s7 = sand.u32 (!%p496_p10), 1, %s2031_s15   ;;  %s1706_s11 = sshll.u32 (!%p496_p10), %s2039_s17, 1 }
  0x38   : > { %499 = sbr.rel (%p496_p10) target bundleno = 390 (0x186), region = 70  ;;  %s1705_s8 = sshll.u32 (!%p496_p10), %s502_s7, 9 }
  0x39   : > { %s2265_s13 = scalar_lea.vmem (!%p496_p10), [#allocation2], %s1705_s8  ;;  %p549_p11 = scmp.lt.s32.totalorder (!%p496_p10), %s1706_s11, 3 }
  0x3a   : > { %s1832_s26 = smul.u32 (!%p496_p10), 104, %s502_s7 }
  0x3c   : > { %s2429_s15 = scalar_lea.vmem (!%p496_p10), [#allocation3], %s1832_s26 }
  0x3d   : > { %v1971_v0 = vld [vmem:[%s2521_s0 + $0x4] ss:$16 sps:$4 sm:$0xff]   ;;  %v1974_v1 = vld [vmem:[%s2521_s0 + $0xc] ss:$16 sps:$4 sm:$0xff]   ;;  %v1877_v4 = vld [vmem:[%s2265_s13 + $0x70] ss:$8 sps:$4 sm:$0xff]  }
  0x3e   : > { %v1873_v2 = vld [vmem:[%s2265_s13 + $0x74] ss:$8 sps:$4 sm:$0xff]   ;;  %1136 = vmatprep.mubr.bf16.mxu0 %v1971_v0  ;;  %1237 = vmatprep.mubr.bf16.mxu1 %v1974_v1  ;;  %v1878_v5 = vld [vmem:[%s2265_s13 + $0x170] ss:$8 sps:$4 sm:$0xff]   ;;  %v1879_v6 = vld [vmem:[%s2265_s13 + $0x64] ss:$8 sps:$4 sm:$0xff]  }
  0x3f   : > { %v1875_v3 = vld [vmem:[%s2265_s13 + $0x174] ss:$8 sps:$4 sm:$0xff]   ;;  %1104 = vmatprep.subr.bf16.mxu0 %v1873_v2  ;;  %v1881_v7 = vld [vmem:[%s2265_s13 + $0x164] ss:$8 sps:$4 sm:$0xff]   ;;  %v1883_v8 = vld [vmem:[%s2265_s13 + $0x60] ss:$8 sps:$4 sm:$0xff]  }
  0x40   : > { %1205 = vmatprep.subr.bf16.mxu1 %v1875_v3  ;;  %1105 = vmatpush1.bf16.msra.mxu0 %v1877_v4  ;;  %v1884_v9 = vld [vmem:[%s2265_s13 + $0x160] ss:$8 sps:$4 sm:$0xff]   ;;  %v1885_v10 = vld [vmem:[%s2265_s13 + $0x54] ss:$8 sps:$4 sm:$0xff]   ;;  %v1889_v12 = vld [vmem:[%s2265_s13 + $0x50] ss:$8 sps:$4 sm:$0xff]  }
  0x41   : > { %1206 = vmatpush1.bf16.msra.mxu1 %v1878_v5  ;;  %1106 = vmatprep.subr.bf16.mxu0 %v1879_v6  ;;  %v1887_v11 = vld [vmem:[%s2265_s13 + $0x154] ss:$8 sps:$4 sm:$0xff]   ;;  %v1890_v13 = vld [vmem:[%s2265_s13 + $0x150] ss:$8 sps:$4 sm:$0xff]   ;;  %v1891_v14 = vld [vmem:[%s2265_s13 + $0x44] ss:$8 sps:$4 sm:$0xff]  }
  0x42   : > { %1207 = vmatprep.subr.bf16.mxu1 %v1881_v7  ;;  %v1893_v15 = vld [vmem:[%s2265_s13 + $0x144] ss:$8 sps:$4 sm:$0xff]   ;;  %v1895_v16 = vld [vmem:[%s2265_s13 + $0x40] ss:$8 sps:$4 sm:$0xff]   ;;  %v1897_v18 = vld [vmem:[%s2265_s13 + $0x34] ss:$8 sps:$4 sm:$0xff]  }
  0x43   : > { %v1896_v17 = vld [vmem:[%s2265_s13 + $0x140] ss:$8 sps:$4 sm:$0xff]   ;;  %v1899_v19 = vld [vmem:[%s2265_s13 + $0x134] ss:$8 sps:$4 sm:$0xff]   ;;  %v1901_v20 = vld [vmem:[%s2265_s13 + $0x30] ss:$8 sps:$4 sm:$0xff]  }
  0x44   : > { %1107 = vmatpush1.bf16.msra.mxu0 %v1883_v8  ;;  %v1902_v21 = vld [vmem:[%s2265_s13 + $0x130] ss:$8 sps:$4 sm:$0xff]   ;;  %v1903_v22 = vld [vmem:[%s2265_s13 + $0x24] ss:$8 sps:$4 sm:$0xff]   ;;  %v1907_v24 = vld [vmem:[%s2265_s13 + $0x20] ss:$8 sps:$4 sm:$0xff]  }
  0x45   : > { %1208 = vmatpush1.bf16.msra.mxu1 %v1884_v9  ;;  %1108 = vmatprep.subr.bf16.mxu0 %v1885_v10  ;;  %v1905_v23 = vld [vmem:[%s2265_s13 + $0x124] ss:$8 sps:$4 sm:$0xff]   ;;  %v1908_v25 = vld [vmem:[%s2265_s13 + $0x120] ss:$8 sps:$4 sm:$0xff]   ;;  %v1909_v26 = vld [vmem:[%s2265_s13 + $0x14] ss:$8 sps:$4 sm:$0xff]  }
  0x46   : > { %1209 = vmatprep.subr.bf16.mxu1 %v1887_v11  ;;  %v1911_v27 = vld [vmem:[%s2265_s13 + $0x114] ss:$8 sps:$4 sm:$0xff]   ;;  %v1913_v28 = vld [vmem:[%s2265_s13 + $0x10] ss:$8 sps:$4 sm:$0xff]   ;;  %v1915_v30 = vld [vmem:[%s2265_s13 + $0x4] ss:$8 sps:$4 sm:$0xff]  }
  0x47   : > { %v1914_v29 = vld [vmem:[%s2265_s13 + $0x110] ss:$8 sps:$4 sm:$0xff]   ;;  %v1917_v31 = vld [vmem:[%s2265_s13 + $0x104] ss:$8 sps:$4 sm:$0xff]   ;;  %v1919_v32 = vld [vmem:[%s2265_s13] ss:$8 sps:$4 sm:$0xff]  }
  0x48   : > { %1109 = vmatpush1.bf16.msra.mxu0 %v1889_v12  ;;  %v1920_v33 = vld [vmem:[%s2265_s13 + $0x100] ss:$8 sps:$4 sm:$0xff]   ;;  %v1921_v34 = vld [vmem:[%s2265_s13 + $0xf4] ss:$8 sps:$4 sm:$0xff]   ;;  %v1925_v36 = vld [vmem:[%s2265_s13 + $0xf0] ss:$8 sps:$4 sm:$0xff]  }
  0x49   : > { %1210 = vmatpush1.bf16.msra.mxu1 %v1890_v13  ;;  %1110 = vmatprep.subr.bf16.mxu0 %v1891_v14  ;;  %v1923_v35 = vld [vmem:[%s2265_s13 + $0x1f4] ss:$8 sps:$4 sm:$0xff]   ;;  %v1926_v37 = vld [vmem:[%s2265_s13 + $0x1f0] ss:$8 sps:$4 sm:$0xff]   ;;  %v1927_v38 = vld [vmem:[%s2265_s13 + $0xe4] ss:$8 sps:$4 sm:$0xff]  }
  0x4a   : > { %1211 = vmatprep.subr.bf16.mxu1 %v1893_v15  ;;  %v1929_v39 = vld [vmem:[%s2265_s13 + $0x1e4] ss:$8 sps:$4 sm:$0xff]   ;;  %v1931_v40 = vld [vmem:[%s2265_s13 + $0xe0] ss:$8 sps:$4 sm:$0xff]   ;;  %v1933_v42 = vld [vmem:[%s2265_s13 + $0xd4] ss:$8 sps:$4 sm:$0xff]  }
  0x4b   : > { %v1932_v41 = vld [vmem:[%s2265_s13 + $0x1e0] ss:$8 sps:$4 sm:$0xff]   ;;  %v1935_v43 = vld [vmem:[%s2265_s13 + $0x1d4] ss:$8 sps:$4 sm:$0xff]   ;;  %v1937_v44 = vld [vmem:[%s2265_s13 + $0xd0] ss:$8 sps:$4 sm:$0xff]  }
  0x4c   : > { %1111 = vmatpush1.bf16.msra.mxu0 %v1895_v16  ;;  %v1938_v45 = vld [vmem:[%s2265_s13 + $0x1d0] ss:$8 sps:$4 sm:$0xff]   ;;  %v1939_v46 = vld [vmem:[%s2265_s13 + $0xc4] ss:$8 sps:$4 sm:$0xff]   ;;  %v1943_v48 = vld [vmem:[%s2265_s13 + $0xc0] ss:$8 sps:$4 sm:$0xff]  }
  0x4d   : > { %1212 = vmatpush1.bf16.msra.mxu1 %v1896_v17  ;;  %1112 = vmatprep.subr.bf16.mxu0 %v1897_v18  ;;  %v1941_v47 = vld [vmem:[%s2265_s13 + $0x1c4] ss:$8 sps:$4 sm:$0xff]   ;;  %v1944_v49 = vld [vmem:[%s2265_s13 + $0x1c0] ss:$8 sps:$4 sm:$0xff]   ;;  %v1945_v50 = vld [vmem:[%s2265_s13 + $0xb4] ss:$8 sps:$4 sm:$0xff]  }
  0x4e   : > { %1213 = vmatprep.subr.bf16.mxu1 %v1899_v19  ;;  %v1947_v51 = vld [vmem:[%s2265_s13 + $0x1b4] ss:$8 sps:$4 sm:$0xff]   ;;  %v1949_v52 = vld [vmem:[%s2265_s13 + $0xb0] ss:$8 sps:$4 sm:$0xff]   ;;  %v1951_v54 = vld [vmem:[%s2265_s13 + $0xa4] ss:$8 sps:$4 sm:$0xff]  }
  0x4f   : > { %v1950_v53 = vld [vmem:[%s2265_s13 + $0x1b0] ss:$8 sps:$4 sm:$0xff]   ;;  %v1953_v55 = vld [vmem:[%s2265_s13 + $0x1a4] ss:$8 sps:$4 sm:$0xff]   ;;  %v1955_v56 = vld [vmem:[%s2265_s13 + $0xa0] ss:$8 sps:$4 sm:$0xff]  }
  0x50   : > { %1113 = vmatpush1.bf16.msra.mxu0 %v1901_v20  ;;  %v1956_v57 = vld [vmem:[%s2265_s13 + $0x1a0] ss:$8 sps:$4 sm:$0xff]   ;;  %v1957_v58 = vld [vmem:[%s2265_s13 + $0x94] ss:$8 sps:$4 sm:$0xff]   ;;  %v1961_v60 = vld [vmem:[%s2265_s13 + $0x90] ss:$8 sps:$4 sm:$0xff]  }
  0x51   : > { %1214 = vmatpush1.bf16.msra.mxu1 %v1902_v21  ;;  %1114 = vmatprep.subr.bf16.mxu0 %v1903_v22  ;;  %v1959_v59 = vld [vmem:[%s2265_s13 + $0x194] ss:$8 sps:$4 sm:$0xff]   ;;  %v1962_v61 = vld [vmem:[%s2265_s13 + $0x190] ss:$8 sps:$4 sm:$0xff]   ;;  %v1963_v62 = vld [vmem:[%s2265_s13 + $0x84] ss:$8 sps:$4 sm:$0xff]  }
  0x52   : > { %1215 = vmatprep.subr.bf16.mxu1 %v1905_v23  ;;  %v1965_v63 = vld [vmem:[%s2265_s13 + $0x184] ss:$8 sps:$4 sm:$0xff]   ;;  %v1967_v0 = vld [vmem:[%s2265_s13 + $0x80] ss:$8 sps:$4 sm:$0xff]   ;;  %s2534_s11 = smov (!%p549_p11, %s1706_s11), 3  ;;  %s1831_s7 = sshll.u32 (%p2109_p6), %s2039_s17, 3 }
  0x53   : > { %v1968_v1 = vld [vmem:[%s2265_s13 + $0x180] ss:$8 sps:$4 sm:$0xff]   ;;  %v1975_v4 = vld [vmem:[%s2521_s0 + $0x24] ss:$16 sps:$4 sm:$0xff]   ;;  %v1977_v5 = vld [vmem:[%s2521_s0 + $0x2c] ss:$16 sps:$4 sm:$0xff]   ;;  %s551_s14 = scalar_lea.vmem %s2523_s2, %s2534_s11  ;;  %s556_s23 = scalar_lea.vmem %s2524_s3, %s2534_s11 }
  0x54   : > { %1115 = vmatpush1.bf16.msra.mxu0 %v1907_v24  ;;  %v1969_v2 = vld [vmem:[%s2521_s0] ss:$16 sps:$4 sm:$0xff]   ;;  %v1972_v3 = vld [vmem:[%s2521_s0 + $0x8] ss:$16 sps:$4 sm:$0xff]   ;;  %v1981_v8 = vld [vmem:[%s2521_s0 + $0x44] ss:$16 sps:$4 sm:$0xff]   ;;  %s1513_s29 = scalar_lea.vmem (%p2109_p6), %s2525_s4, %s1831_s7 }
  0x55   : > { %1216 = vmatpush1.bf16.msra.mxu1 %v1908_v25  ;;  %1116 = vmatprep.subr.bf16.mxu0 %v1909_v26  ;;  %v1979_v6 = vld [vmem:[%s2521_s0 + $0x20] ss:$16 sps:$4 sm:$0xff]   ;;  %v1980_v7 = vld [vmem:[%s2521_s0 + $0x28] ss:$16 sps:$4 sm:$0xff]   ;;  %v1983_v9 = vld [vmem:[%s2521_s0 + $0x4c] ss:$16 sps:$4 sm:$0xff]  }
  0x56   : > { %1217 = vmatprep.subr.bf16.mxu1 %v1911_v27  ;;  %v1985_v10 = vld [vmem:[%s2521_s0 + $0x40] ss:$16 sps:$4 sm:$0xff]   ;;  %v1986_v11 = vld [vmem:[%s2521_s0 + $0x48] ss:$16 sps:$4 sm:$0xff]   ;;  %v1987_v12 = vld [vmem:[%s2521_s0 + $0x64] ss:$16 sps:$4 sm:$0xff]  }
  0x57   : > { %v1989_v13 = vld [vmem:[%s2521_s0 + $0x6c] ss:$16 sps:$4 sm:$0xff]   ;;  %v1991_v14 = vld [vmem:[%s2521_s0 + $0x60] ss:$16 sps:$4 sm:$0xff]   ;;  %v1992_v15 = vld [vmem:[%s2521_s0 + $0x68] ss:$16 sps:$4 sm:$0xff]  }
  0x58   : > { %1117 = vmatpush1.bf16.msra.mxu0 %v1913_v28  ;;  %v1993_v16 = vld [vmem:[%s2521_s0 + $0x84] ss:$16 sps:$4 sm:$0xff]   ;;  %v1995_v17 = vld [vmem:[%s2521_s0 + $0x8c] ss:$16 sps:$4 sm:$0xff]   ;;  %v1997_v18 = vld [vmem:[%s2521_s0 + $0x80] ss:$16 sps:$4 sm:$0xff]  }
  0x59   : > { %1218 = vmatpush1.bf16.msra.mxu1 %v1914_v29  ;;  %1118 = vmatprep.subr.bf16.mxu0 %v1915_v30  ;;  %v1998_v19 = vld [vmem:[%s2521_s0 + $0x88] ss:$16 sps:$4 sm:$0xff]   ;;  %v1999_v20 = vld [vmem:[%s2521_s0 + $0xa4] ss:$16 sps:$4 sm:$0xff]   ;;  %v2001_v21 = vld [vmem:[%s2521_s0 + $0xac] ss:$16 sps:$4 sm:$0xff]   ;;  %v1308_v30 = vlaneseq }
  0x5a   : > { %1219 = vmatprep.subr.bf16.mxu1 %v1917_v31  ;;  %v584_v22 = vld [vmem:[%s2521_s0 + $0xc0] sm:$0xff]  ;;  %v585_v23 = vld [vmem:[%s2521_s0 + $0xc8] sm:$0xff] }
  0x5b   : > { %v2003_v24 = vld [vmem:[%s2521_s0 + $0xa0] ss:$16 sps:$4 sm:$0xff]   ;;  %v2004_v25 = vld [vmem:[%s2521_s0 + $0xa8] ss:$16 sps:$4 sm:$0xff]   ;;  %v1733_v26 = vcombine.high %v584_v22, %v584_v22  ;;  %v1735_v27 = vcombine.high %v585_v23, %v585_v23  ;;  %v1732_v28 = vcombine.low %v584_v22, %v584_v22  ;;  %v1734_v29 = vcombine.low %v585_v23, %v585_v23 }
  0x5c   : > { %1119 = vmatpush1.bf16.msra.mxu0 %v1919_v32  ;;  %v1309_v31 = vshrl.u32 %v1308_v30, 7 }
  0x5d   : > { %1220 = vmatpush1.bf16.msra.mxu1 %v1920_v33  ;;  %1120 = vmatprep.subr.bf16.mxu0 %v1921_v34  ;;  %v1306_v33 = vld [vmem:[%s551_s14] sm:$0x3] }
  0x5e   : > { %1221 = vmatprep.subr.bf16.mxu1 %v1923_v35  ;;  %v1310_v32 = vsub.s32 0, %v1309_v31  ;;  %v1314_v34 = vsub.s32 1, %v1309_v31  ;;  %v1344_v35 = vld [vmem:[%s556_s23] sm:$0x3] }
  0x60   : > { %1121 = vmatpush2.bf16.msra.mxu0 %v1925_v36  ;;  %v2410_v36 = vrot.slane %v1306_v33, %v1310_v32 }
  0x61   : > { %1222 = vmatpush2.bf16.msra.mxu1 %v1926_v37  ;;  %1122 = vmatprep.subr.bf16.mxu0 %v1927_v38 }
  0x62   : > { %1223 = vmatprep.subr.bf16.mxu1 %v1929_v39 }
  0x64   : > { %1123 = vmatpush2.bf16.msra.mxu0 %v1931_v40  ;;  %v2412_v40 = vrot.slane %v1344_v35, %v1310_v32 }
  0x65   : > { %1224 = vmatpush2.bf16.msra.mxu1 %v1932_v41  ;;  %1124 = vmatprep.subr.bf16.mxu0 %v1933_v42  ;;  %v2414_v41 = vrot.slane %v1306_v33, %v1314_v34 }
  0x66   : > { %1225 = vmatprep.subr.bf16.mxu1 %v1935_v43 }
  0x68   : > { %1125 = vmatpush2.bf16.msra.mxu0 %v1937_v44 }
  0x69   : > { %1226 = vmatpush2.bf16.msra.mxu1 %v1938_v45  ;;  %1126 = vmatprep.subr.bf16.mxu0 %v1939_v46  ;;  %v2417_v46 = vrot.slane %v1344_v35, %v1314_v34 }
  0x6a   : > { %1227 = vmatprep.subr.bf16.mxu1 %v1941_v47 }
  0x6c   : > { %1127 = vmatpush2.bf16.msra.mxu0 %v1943_v48 }
  0x6d   : > { %1228 = vmatpush2.bf16.msra.mxu1 %v1944_v49  ;;  %1128 = vmatprep.subr.bf16.mxu0 %v1945_v50 }
  0x6e   : > { %1229 = vmatprep.subr.bf16.mxu1 %v1947_v51 }
  0x70   : > { %1129 = vmatpush2.bf16.msra.mxu0 %v1949_v52 }
  0x71   : > { %1230 = vmatpush2.bf16.msra.mxu1 %v1950_v53  ;;  %1130 = vmatprep.subr.bf16.mxu0 %v1951_v54 }
  0x72   : > { %1231 = vmatprep.subr.bf16.mxu1 %v1953_v55 }
  0x74   : > { %1131 = vmatpush2.bf16.msra.mxu0 %v1955_v56 }
  0x75   : > { %1232 = vmatpush2.bf16.msra.mxu1 %v1956_v57  ;;  %1132 = vmatprep.subr.bf16.mxu0 %v1957_v58 }
  0x76   : > { %1233 = vmatprep.subr.bf16.mxu1 %v1959_v59 }
  0x78   : > { %1133 = vmatpush2.bf16.msra.mxu0 %v1961_v60 }
  0x79   : > { %1234 = vmatpush2.bf16.msra.mxu1 %v1962_v61  ;;  %1134 = vmatprep.subr.bf16.mxu0 %v1963_v62 }
  0x7a   : > { %1235 = vmatprep.subr.bf16.mxu1 %v1965_v63 }
  0x7c   : > { %1135 = vmatpush2.bf16.msra.mxu0 %v1967_v0 }
  0x7d   : > { %1236 = vmatpush2.bf16.msra.mxu1 %v1968_v1 }
  0x7f   : > { %1137 = vmatmul.mubr.bf16.vlgmr.msra.gmra.mxu0 %v1969_v2 }
  0x80   : > { %1238 = vmatmul.mubr.bf16.vlgmr.msra.gmra.mxu1 %v1972_v3  ;;  %1146 = vmatprep.mubr.bf16.mxu0 %v1975_v4 }
  0x81   : > { %1247 = vmatprep.mubr.bf16.mxu1 %v1977_v5 }
  0x87   : > { %1147 = vmatmul.mubr.bf16.gmra.mxu0 %v1979_v6 }
  0x88   : > { %1248 = vmatmul.mubr.bf16.gmra.mxu1 %v1980_v7  ;;  %1156 = vmatprep.mubr.bf16.mxu0 %v1981_v8 }
  0x89   : > { %1257 = vmatprep.mubr.bf16.mxu1 %v1983_v9 }
  0x8f   : > { %1157 = vmatmul.mubr.bf16.gmra.mxu0 %v1985_v10 }
  0x90   : > { %1258 = vmatmul.mubr.bf16.gmra.mxu1 %v1986_v11  ;;  %1166 = vmatprep.mubr.bf16.mxu0 %v1987_v12 }
  0x91   : > { %1267 = vmatprep.mubr.bf16.mxu1 %v1989_v13 }
  0x97   : > { %1167 = vmatmul.mubr.bf16.gmra.mxu0 %v1991_v14 }
  0x98   : > { %1268 = vmatmul.mubr.bf16.gmra.mxu1 %v1992_v15  ;;  %1176 = vmatprep.mubr.bf16.mxu0 %v1993_v16 }
  0x99   : > { %1277 = vmatprep.mubr.bf16.mxu1 %v1995_v17 }
  0x9f   : > { %1177 = vmatmul.mubr.bf16.gmra.mxu0 %v1997_v18 }
  0xa0   : > { %1278 = vmatmul.mubr.bf16.gmra.mxu1 %v1998_v19  ;;  %1186 = vmatprep.mubr.bf16.mxu0 %v1999_v20 }
  0xa1   : > { %1287 = vmatprep.mubr.bf16.mxu1 %v2001_v21 }
  0xa7   : > { %1187 = vmatmul.mubr.bf16.gmra.mxu0 %v2003_v24 }
  0xa8   : > { %1288 = vmatmul.mubr.bf16.gmra.mxu1 %v2004_v25  ;;  %1196 = vmatprep.mubr.bf16.mxu0 %v1733_v26 }
  0xa9   : > { %1297 = vmatprep.mubr.bf16.mxu1 %v1735_v27 }
  0xaf   : > { %1197 = vmatmul.mubr.bf16.gmra.mxu0 %v1732_v28 }
  0xb0   : > { %1298 = vmatmul.mubr.bf16.gmra.mxu1 %v1734_v29 }
 0x13f   : > { %v1138_v37 = vpop.f32.mrf.mxu0 }
 0x140   : > { %v1239_v38 = vpop.f32.mrf.mxu1 }
 0x141   : > { %v1240_v39 = vadd.f32 %v1239_v38, %v1138_v37  ;;  %v1140_v42 = vpop.f32.mrf.mxu0 }
 0x142   : > { %v1241_v43 = vpop.f32.mrf.mxu1 }
 0x143   : > { %v1318_v44 = vmul.f32 %v2410_v36, %v1240_v39  ;;  %v1242_v45 = vadd.f32 %v1241_v43, %v1140_v42  ;;  %v1142_v47 = vpop.f32.mrf.mxu0 }
 0x144   : > { %v1243_v48 = vpop.f32.mrf.mxu1 }
 0x145   : > { %v1356_v49 = vadd.f32 %v2412_v40, %v1318_v44  ;;  %v1319_v50 = vmul.f32 %v2414_v41, %v1242_v45  ;;  %v1244_v51 = vadd.f32 %v1243_v48, %v1142_v47  ;;  %v1144_v52 = vpop.f32.mrf.mxu0 }
 0x146   : > { %v1245_v53 = vpop.f32.mrf.mxu1 }
 0x147   : > { %v1357_v54 = vadd.f32 %v2417_v46, %v1319_v50  ;;  %v1320_v55 = vmul.f32 %v2410_v36, %v1244_v51  ;;  %v1246_v56 = vadd.f32 %v1245_v53, %v1144_v52  ;;  %v1382_v57 = vmax.f32 %v1356_v49, 0.0  ;;  %v1148_v58 = vpop.f32.mrf.mxu0 }
 0x148   : > { %v1249_v59 = vpop.f32.mrf.mxu1 }
 0x149   : > { %v1383_v60 = vmax.f32 %v1357_v54, 0.0  ;;  %v1358_v61 = vadd.f32 %v2412_v40, %v1320_v55  ;;  %v1321_v62 = vmul.f32 %v2414_v41, %v1246_v56  ;;  %v1250_v63 = vadd.f32 %v1249_v59, %v1148_v58  ;;  %v1150_v0 = vpop.f32.mrf.mxu0 }
 0x14a   : > { %v1251_v1 = vpop.f32.mrf.mxu1 }
 0x14b   : > { %v1818_v2 = vpack.c.bf16 %v1383_v60, %v1382_v57  ;;  %v1359_v3 = vadd.f32 %v2417_v46, %v1321_v62  ;;  %v1322_v4 = vmul.f32 %v2410_v36, %v1250_v63  ;;  %v1252_v5 = vadd.f32 %v1251_v1, %v1150_v0  ;;  %v1152_v6 = vpop.f32.mrf.mxu0 }
 0x14c   : > { %v1253_v7 = vpop.f32.mrf.mxu1  ;;  %v1384_v8 = vmax.f32 %v1358_v61, 0.0 }
 0x14d   : > { %1488 = vst [vmem:[%s2429_s15] sm:$0xff] %v1818_v2  ;;  %v1385_v9 = vmax.f32 %v1359_v3, 0.0  ;;  %v1254_v10 = vadd.f32 %v1253_v7, %v1152_v6  ;;  %v1360_v11 = vadd.f32 %v2412_v40, %v1322_v4  ;;  %v1323_v12 = vmul.f32 %v2414_v41, %v1252_v5  ;;  %v1154_v13 = vpop.f32.mrf.mxu0 }
 0x14e   : > { %v1255_v14 = vpop.f32.mrf.mxu1 }
 0x14f   : > { %v1819_v15 = vpack.c.bf16 %v1385_v9, %v1384_v8  ;;  %v1324_v16 = vmul.f32 %v2410_v36, %v1254_v10  ;;  %v1256_v17 = vadd.f32 %v1255_v14, %v1154_v13  ;;  %v1361_v18 = vadd.f32 %v2417_v46, %v1323_v12  ;;  %v1158_v19 = vpop.f32.mrf.mxu0 }
 0x150   : > { %v1259_v20 = vpop.f32.mrf.mxu1  ;;  %v1386_v24 = vmax.f32 %v1360_v11, 0.0 }
 0x151   : > { %1489 = vst [vmem:[%s2429_s15 + $0x8] sm:$0xff] %v1819_v15  ;;  %v1362_v21 = vadd.f32 %v2412_v40, %v1324_v16  ;;  %v1325_v22 = vmul.f32 %v2414_v41, %v1256_v17  ;;  %v1260_v23 = vadd.f32 %v1259_v20, %v1158_v19  ;;  %v1387_v25 = vmax.f32 %v1361_v18, 0.0  ;;  %v1160_v26 = vpop.f32.mrf.mxu0 }
 0x152   : > { %v1261_v27 = vpop.f32.mrf.mxu1 }
 0x153   : > { %v1363_v28 = vadd.f32 %v2417_v46, %v1325_v22  ;;  %v1326_v29 = vmul.f32 %v2410_v36, %v1260_v23  ;;  %v1262_v30 = vadd.f32 %v1261_v27, %v1160_v26  ;;  %v1820_v31 = vpack.c.bf16 %v1387_v25, %v1386_v24  ;;  %v1162_v33 = vpop.f32.mrf.mxu0 }
 0x154   : > { %v1388_v32 = vmax.f32 %v1362_v21, 0.0  ;;  %v1263_v34 = vpop.f32.mrf.mxu1 }
 0x155   : > { %v1389_v35 = vmax.f32 %v1363_v28, 0.0  ;;  %v1364_v37 = vadd.f32 %v2412_v40, %v1326_v29  ;;  %v1327_v38 = vmul.f32 %v2414_v41, %v1262_v30  ;;  %v1264_v39 = vadd.f32 %v1263_v34, %v1162_v33  ;;  %1490 = vst [vmem:[%s2429_s15 + $0x10] sm:$0xff] %v1820_v31  ;;  %v1164_v42 = vpop.f32.mrf.mxu0 }
 0x156   : > { %v1265_v43 = vpop.f32.mrf.mxu1 }
 0x157   : > { %v1821_v44 = vpack.c.bf16 %v1389_v35, %v1388_v32  ;;  %v1365_v45 = vadd.f32 %v2417_v46, %v1327_v38  ;;  %v1328_v47 = vmul.f32 %v2410_v36, %v1264_v39  ;;  %v1266_v48 = vadd.f32 %v1265_v43, %v1164_v42  ;;  %v1168_v49 = vpop.f32.mrf.mxu0 }
 0x158   : > { %v1269_v50 = vpop.f32.mrf.mxu1  ;;  %v1390_v51 = vmax.f32 %v1364_v37, 0.0 }
 0x159   : > { %1491 = vst [vmem:[%s2429_s15 + $0x18] sm:$0xff] %v1821_v44  ;;  %v1391_v52 = vmax.f32 %v1365_v45, 0.0  ;;  %v1270_v53 = vadd.f32 %v1269_v50, %v1168_v49  ;;  %v1366_v54 = vadd.f32 %v2412_v40, %v1328_v47  ;;  %v1329_v55 = vmul.f32 %v2414_v41, %v1266_v48  ;;  %v1170_v56 = vpop.f32.mrf.mxu0 }
 0x15a   : > { %v1271_v57 = vpop.f32.mrf.mxu1 }
 0x15b   : > { %v1822_v58 = vpack.c.bf16 %v1391_v52, %v1390_v51  ;;  %v1330_v59 = vmul.f32 %v2410_v36, %v1270_v53  ;;  %v1272_v60 = vadd.f32 %v1271_v57, %v1170_v56  ;;  %v1367_v61 = vadd.f32 %v2417_v46, %v1329_v55  ;;  %v1172_v62 = vpop.f32.mrf.mxu0 }
 0x15c   : > { %v1273_v63 = vpop.f32.mrf.mxu1  ;;  %v1392_v3 = vmax.f32 %v1366_v54, 0.0 }
 0x15d   : > { %1492 = vst [vmem:[%s2429_s15 + $0x20] sm:$0xff] %v1822_v58  ;;  %v1368_v0 = vadd.f32 %v2412_v40, %v1330_v59  ;;  %v1331_v1 = vmul.f32 %v2414_v41, %v1272_v60  ;;  %v1274_v2 = vadd.f32 %v1273_v63, %v1172_v62  ;;  %v1393_v4 = vmax.f32 %v1367_v61, 0.0  ;;  %v1174_v5 = vpop.f32.mrf.mxu0 }
 0x15e   : > { %v1275_v6 = vpop.f32.mrf.mxu1 }
 0x15f   : > { %v1369_v7 = vadd.f32 %v2417_v46, %v1331_v1  ;;  %v1332_v8 = vmul.f32 %v2410_v36, %v1274_v2  ;;  %v1276_v9 = vadd.f32 %v1275_v6, %v1174_v5  ;;  %v1823_v10 = vpack.c.bf16 %v1393_v4, %v1392_v3  ;;  %v1178_v12 = vpop.f32.mrf.mxu0 }
 0x160   : > { %v1394_v11 = vmax.f32 %v1368_v0, 0.0  ;;  %v1279_v13 = vpop.f32.mrf.mxu1 }
 0x161   : > { %v1395_v14 = vmax.f32 %v1369_v7, 0.0  ;;  %v1370_v15 = vadd.f32 %v2412_v40, %v1332_v8  ;;  %v1333_v16 = vmul.f32 %v2414_v41, %v1276_v9  ;;  %v1280_v17 = vadd.f32 %v1279_v13, %v1178_v12  ;;  %1493 = vst [vmem:[%s2429_s15 + $0x28] sm:$0xff] %v1823_v10  ;;  %v1180_v18 = vpop.f32.mrf.mxu0 }
 0x162   : > { %v1281_v19 = vpop.f32.mrf.mxu1 }
 0x163   : > { %v1824_v20 = vpack.c.bf16 %v1395_v14, %v1394_v11  ;;  %v1371_v21 = vadd.f32 %v2417_v46, %v1333_v16  ;;  %v1334_v22 = vmul.f32 %v2410_v36, %v1280_v17  ;;  %v1282_v23 = vadd.f32 %v1281_v19, %v1180_v18  ;;  %v1182_v24 = vpop.f32.mrf.mxu0 }
 0x164   : > { %v1283_v25 = vpop.f32.mrf.mxu1  ;;  %v1396_v26 = vmax.f32 %v1370_v15, 0.0 }
 0x165   : > { %1494 = vst [vmem:[%s2429_s15 + $0x30] sm:$0xff] %v1824_v20  ;;  %v1397_v27 = vmax.f32 %v1371_v21, 0.0  ;;  %v1284_v28 = vadd.f32 %v1283_v25, %v1182_v24  ;;  %v1372_v29 = vadd.f32 %v2412_v40, %v1334_v22  ;;  %v1335_v30 = vmul.f32 %v2414_v41, %v1282_v23  ;;  %v1184_v31 = vpop.f32.mrf.mxu0 }
 0x166   : > { %v1285_v32 = vpop.f32.mrf.mxu1 }
 0x167   : > { %v1825_v33 = vpack.c.bf16 %v1397_v27, %v1396_v26  ;;  %v1336_v34 = vmul.f32 %v2410_v36, %v1284_v28  ;;  %v1286_v35 = vadd.f32 %v1285_v32, %v1184_v31  ;;  %v1373_v37 = vadd.f32 %v2417_v46, %v1335_v30  ;;  %v1188_v38 = vpop.f32.mrf.mxu0  ;;  %v1572_v28 = vld [vmem:[%s2429_s15 + $0x18] sm:$0xff] (%p2109_p6) }
 0x168   : > { %v1289_v39 = vpop.f32.mrf.mxu1  ;;  %v1398_v45 = vmax.f32 %v1372_v29, 0.0  ;;  %v1574_v29 = vld [vmem:[%s2429_s15 + $0x20] sm:$0xff] (%p2109_p6)  ;;  %v1576_v30 = vld [vmem:[%s2429_s15 + $0x28] sm:$0xff] (%p2109_p6)  ;;  %1573 = vst [vmem:[%s1513_s29 + $0x30] sm:$0xff] (%p2109_p6), %v1572_v28 }
 0x169   : > { %1495 = vst [vmem:[%s2429_s15 + $0x38] sm:$0xff] %v1825_v33  ;;  %v1374_v42 = vadd.f32 %v2412_v40, %v1336_v34  ;;  %v1337_v43 = vmul.f32 %v2414_v41, %v1286_v35  ;;  %v1290_v44 = vadd.f32 %v1289_v39, %v1188_v38  ;;  %v1399_v47 = vmax.f32 %v1373_v37, 0.0  ;;  %v1190_v48 = vpop.f32.mrf.mxu0  ;;  %1575 = vst [vmem:[%s1513_s29 + $0x40] sm:$0xff] (%p2109_p6), %v1574_v29 }
 0x16a   : > { %v1291_v49 = vpop.f32.mrf.mxu1  ;;  %1577 = vst [vmem:[%s1513_s29 + $0x50] sm:$0xff] (%p2109_p6), %v1576_v30 }
 0x16b   : > { %v1375_v50 = vadd.f32 %v2417_v46, %v1337_v43  ;;  %v1338_v51 = vmul.f32 %v2410_v36, %v1290_v44  ;;  %v1292_v52 = vadd.f32 %v1291_v49, %v1190_v48  ;;  %v1826_v53 = vpack.c.bf16 %v1399_v47, %v1398_v45  ;;  %v1192_v55 = vpop.f32.mrf.mxu0 }
 0x16c   : > { %v1400_v54 = vmax.f32 %v1374_v42, 0.0  ;;  %v1293_v56 = vpop.f32.mrf.mxu1  ;;  %v1578_v31 = vld [vmem:[%s2429_s15 + $0x30] sm:$0xff] (%p2109_p6) }
 0x16d   : > { %v1401_v57 = vmax.f32 %v1375_v50, 0.0  ;;  %v1376_v58 = vadd.f32 %v2412_v40, %v1338_v51  ;;  %v1339_v59 = vmul.f32 %v2414_v41, %v1292_v52  ;;  %v1294_v60 = vadd.f32 %v1293_v56, %v1192_v55  ;;  %1496 = vst [vmem:[%s2429_s15 + $0x40] sm:$0xff] %v1826_v53  ;;  %v1194_v61 = vpop.f32.mrf.mxu0  ;;  %1579 = vst [vmem:[%s1513_s29 + $0x60] sm:$0xff] (%p2109_p6), %v1578_v31 }
 0x16e   : > { %v1295_v62 = vpop.f32.mrf.mxu1 }
 0x16f   : > { %v1827_v63 = vpack.c.bf16 %v1401_v57, %v1400_v54  ;;  %v1377_v0 = vadd.f32 %v2417_v46, %v1339_v59  ;;  %v1340_v1 = vmul.f32 %v2410_v36, %v1294_v60  ;;  %v1296_v2 = vadd.f32 %v1295_v62, %v1194_v61  ;;  %v1198_v3 = vpop.f32.mrf.mxu0 }
 0x170   : > { %v1299_v4 = vpop.f32.mrf.mxu1  ;;  %v1402_v5 = vmax.f32 %v1376_v58, 0.0  ;;  %v1580_v32 = vld [vmem:[%s2429_s15 + $0x38] sm:$0xff] (%p2109_p6) }
 0x171   : > { %1497 = vst [vmem:[%s2429_s15 + $0x48] sm:$0xff] %v1827_v63  ;;  %v1403_v6 = vmax.f32 %v1377_v0, 0.0  ;;  %v1300_v7 = vadd.f32 %v1299_v4, %v1198_v3  ;;  %v1378_v8 = vadd.f32 %v2412_v40, %v1340_v1  ;;  %v1341_v9 = vmul.f32 %v2414_v41, %v1296_v2  ;;  %v1200_v10 = vpop.f32.mrf.mxu0  ;;  %1581 = vst [vmem:[%s1513_s29 + $0x70] sm:$0xff] (%p2109_p6), %v1580_v32 }
 0x172   : > { %v1301_v11 = vpop.f32.mrf.mxu1 }
 0x173   : > { %v1828_v12 = vpack.c.bf16 %v1403_v6, %v1402_v5  ;;  %v1342_v13 = vmul.f32 %v2410_v36, %v1300_v7  ;;  %v1302_v14 = vadd.f32 %v1301_v11, %v1200_v10  ;;  %v1379_v15 = vadd.f32 %v2417_v46, %v1341_v9  ;;  %v1202_v16 = vpop.f32.mrf.mxu0 }
 0x174   : > { %v1303_v17 = vpop.f32.mrf.mxu1  ;;  %v1404_v20 = vmax.f32 %v1378_v8, 0.0  ;;  %v1582_v33 = vld [vmem:[%s2429_s15 + $0x40] sm:$0xff] (%p2109_p6) }
 0x175   : > { %1498 = vst [vmem:[%s2429_s15 + $0x50] sm:$0xff] %v1828_v12  ;;  %v1380_v18 = vadd.f32 %v2412_v40, %v1342_v13  ;;  %v1343_v19 = vmul.f32 %v2414_v41, %v1302_v14  ;;  %v1405_v21 = vmax.f32 %v1379_v15, 0.0  ;;  %v1203_v22 = vpop.f32.mrf.mxu0  ;;  %v1566_v40 = vld [vmem:[%s2429_s15] sm:$0xff] (%p2109_p6)  ;;  %v1568_v41 = vld [vmem:[%s2429_s15 + $0x8] sm:$0xff] (%p2109_p6)  ;;  %1583 = vst [vmem:[%s1513_s29 + $0x80] sm:$0xff] (%p2109_p6), %v1582_v33 }
 0x176   : > { %v1304_v23 = vpop.f32.mrf.mxu1  ;;  %1567 = vst [vmem:[%s1513_s29] sm:$0xff] (%p2109_p6), %v1566_v40  ;;  %1569 = vst [vmem:[%s1513_s29 + $0x10] sm:$0xff] (%p2109_p6), %v1568_v41 }
 0x177   : > { %v1381_v24 = vadd.f32 %v2417_v46, %v1343_v19  ;;  %v1829_v25 = vpack.c.bf16 %v1405_v21, %v1404_v20  ;;  %v1406_v36 = vmax.f32 %v1380_v18, 0.0  ;;  %v1570_v46 = vld [vmem:[%s2429_s15 + $0x10] sm:$0xff] (%p2109_p6) }
 0x178   : > { %1571 = vst [vmem:[%s1513_s29 + $0x20] sm:$0xff] (%p2109_p6), %v1570_v46  ;;  %v1584_v34 = vld [vmem:[%s2429_s15 + $0x48] sm:$0xff] (%p2109_p6) }
 0x179   : > { %v1407_v26 = vmax.f32 %v1381_v24, 0.0  ;;  %1499 = vst [vmem:[%s2429_s15 + $0x58] sm:$0xff] %v1829_v25  ;;  %1507 = sbr.rel (!%p2109_p6) target bundleno = 390 (0x186), region = 78  ;;  %1585 = vst [vmem:[%s1513_s29 + $0x90] sm:$0xff] (%p2109_p6), %v1584_v34 }
 0x17b   : > { %v1830_v27 = vpack.c.bf16 %v1407_v26, %v1406_v36 }
 0x17c   : > { %v1586_v35 = vld [vmem:[%s2429_s15 + $0x50] sm:$0xff] (%p2109_p6) }
 0x17d   : > { %1500 = vst [vmem:[%s2429_s15 + $0x60] sm:$0xff] %v1830_v27  ;;  %1587 = vst [vmem:[%s1513_s29 + $0xa0] sm:$0xff] (%p2109_p6), %v1586_v35 }
 0x180   : > { %v1588_v37 = vld [vmem:[%s2429_s15 + $0x58] sm:$0xff] }
 0x181   : > { %1589 = vst [vmem:[%s1513_s29 + $0xb0] sm:$0xff] %v1588_v37 }
 0x184   : > { %v1590_v38 = vld [vmem:[%s2429_s15 + $0x60] sm:$0xff] }
 0x185   : > { %1591 = vst [vmem:[%s1513_s29 + $0xc0] sm:$0xff] %v1590_v38 }
 0x186 PF: > { %s14_s19 = sadd.s32 1, %s2047_s19   ;;  %s2527_s15 = smov %s2035_s16 }
 0x187   : > { %p11_p12 = scmp.ge.s32.totalorder %s14_s19, 4   ;;  %s2528_s16 = smov %s2114_s25 }
 0x188   : > { %s2529_s17 = smov %s2043_s18  ;;  %s2530_s18 = smov %s2532_s20 }
 0x189   :  { %13 = sbr.rel (!%p11_p12) target bundleno = 3 (0x3), region = 156 }

// kernel: psp_forward.6
= control target key start
LH: loop header
LB: loop body
LE: loop exit
PB: predicated region body
PF: predicated region fallthrough
CT: control target
= control target key end

     0   :  { %s1709_s15 = smov 0   ;;  %s1711_s16 = smov 0   ;;  %s2128_s0 = inlined_call_operand.vmem [shape: bf16[256,128], index: 0, kind: input, shape index: {}]   ;;  %s2129_s1 = inlined_call_operand.vmem [shape: bf16[128,1024], index: 1, kind: input, shape index: {}]   ;;  %s2130_s2 = inlined_call_operand.vmem [shape: f32[1,1024], index: 2, kind: input, shape index: {}]   ;;  %s2131_s3 = inlined_call_operand.vmem [shape: f32[1,1024], index: 3, kind: input, shape index: {}]   ;;  %s2132_s4 = inlined_call_operand.vmem [shape: bf16[256,1024], index: 4, kind: output, shape index: {}]  }
   0x1   :  { %s1713_s17 = smov 0   ;;  %s1715_s18 = smov 0  }
   0x2   :  { %s1717_s19 = smov 0  }
   0x3 LB: > { %s23_s20 = sadd.s32 1, %s1677_s18  ;;  %s1430_s21 = sadd.s32 4294967295, %s1681_s19   ;;  %s1681_s19 = sphi %s1717_s19, %s14_s19   ;;  %s1677_s18 = sphi %s1715_s18, %s2137_s18   ;;  %s1673_s17 = sphi %s1713_s17, %s2136_s17   ;;  %s1669_s16 = sphi %s1711_s16, %s2135_s16   ;;  %s1665_s15 = sphi %s1709_s15, %s2134_s15  }
   0x4   : > { %p24_p0 = scmp.ge.s32.totalorder %s23_s20, 4  ;;  %p66_p1 = scmp.ne.s32.totalorder %s1669_s16, %s1665_s15 }
   0x5   : > { %p67_p2 = scmp.eq.s32.totalorder %s1681_s19, 0  ;;  %p150_p4 = scmp.eq.s32.totalorder %s1430_s21, 3 }
   0x6   : > { %s2139_s20 = smov (%p24_p0, %s23_s20), 0  ;;  %s59_s23 = sadd.s32 1, %s1669_s16 }
   0x7   : > { %p68_p3 = por %p67_p2, %p66_p1  ;;  %s56_s22 = ssub.s32 %s1677_s18, %s2139_s20 }
   0x8   : > { %p57_p5 = scmp.eq.s32.totalorder %s56_s22, 0  ;;  %p1744_p6 = por %p150_p4, %p66_p1 }
   0x9   : > { %p1434_p7 = scmp.ge.s32.totalorder %s1681_s19, 4 }
   0xa   : > { %s1749_s25 = scalar_select %p57_p5, %s1669_s16, %s59_s23  }
   0xb   : > { %181 = sbr.rel (%p1434_p7) target bundleno = 36 (0x24), region = 20 }
  0x10   : > { %184 = sbr.rel (!%p68_p3) target bundleno = 36 (0x24), region = 24  ;;  %s186_s26 = sand.u32 (%p68_p3), 1, %s1669_s16  }
  0x11   : > { %s1512_s27 = sshll.u32 (%p68_p3), %s1677_s18, 3  ;;  %s1435_s28 = sshll.u32 (%p68_p3), %s186_s26, 7 }
  0x12   : > { %s1757_s5 = scalar_lea.vmem (%p68_p3), %s2129_s1, %s1512_s27  ;;  %s188_s6 = scalar_lea.vmem (%p68_p3), [#allocation2], %s1435_s28 }
  0x13   : > { %v250_v0 = vld [vmem:[%s1757_s5] sm:$0xff] (%p68_p3) }
  0x14   : > { %v252_v1 = vld [vmem:[%s1757_s5 + $0x20] sm:$0xff] (%p68_p3)  ;;  %251 = vst [vmem:[%s188_s6] sm:$0xff] (%p68_p3), %v250_v0 }
  0x15   : > { %v254_v2 = vld [vmem:[%s1757_s5 + $0x40] sm:$0xff]  ;;  %253 = vst [vmem:[%s188_s6 + $0x8] sm:$0xff] %v252_v1 }
  0x16   : > { %255 = vst [vmem:[%s188_s6 + $0x10] sm:$0xff] %v254_v2  ;;  %v256_v3 = vld [vmem:[%s1757_s5 + $0x60] sm:$0xff] }
  0x17   : > { %v258_v4 = vld [vmem:[%s1757_s5 + $0x80] sm:$0xff]  ;;  %257 = vst [vmem:[%s188_s6 + $0x18] sm:$0xff] %v256_v3 }
  0x18   : > { %v260_v5 = vld [vmem:[%s1757_s5 + $0xa0] sm:$0xff]  ;;  %259 = vst [vmem:[%s188_s6 + $0x20] sm:$0xff] %v258_v4 }
  0x19   : > { %261 = vst [vmem:[%s188_s6 + $0x28] sm:$0xff] %v260_v5  ;;  %v262_v6 = vld [vmem:[%s1757_s5 + $0xc0] sm:$0xff] }
  0x1a   : > { %v264_v7 = vld [vmem:[%s1757_s5 + $0xe0] sm:$0xff]  ;;  %263 = vst [vmem:[%s188_s6 + $0x30] sm:$0xff] %v262_v6 }
  0x1b   : > { %v266_v8 = vld [vmem:[%s1757_s5 + $0x100] sm:$0xff]  ;;  %265 = vst [vmem:[%s188_s6 + $0x38] sm:$0xff] %v264_v7 }
  0x1c   : > { %267 = vst [vmem:[%s188_s6 + $0x40] sm:$0xff] %v266_v8  ;;  %v268_v9 = vld [vmem:[%s1757_s5 + $0x120] sm:$0xff] }
  0x1d   : > { %v270_v10 = vld [vmem:[%s1757_s5 + $0x140] sm:$0xff]  ;;  %269 = vst [vmem:[%s188_s6 + $0x48] sm:$0xff] %v268_v9 }
  0x1e   : > { %v272_v11 = vld [vmem:[%s1757_s5 + $0x160] sm:$0xff]  ;;  %271 = vst [vmem:[%s188_s6 + $0x50] sm:$0xff] %v270_v10 }
  0x1f   : > { %273 = vst [vmem:[%s188_s6 + $0x58] sm:$0xff] %v272_v11  ;;  %v274_v12 = vld [vmem:[%s1757_s5 + $0x180] sm:$0xff] }
  0x20   : > { %v276_v13 = vld [vmem:[%s1757_s5 + $0x1a0] sm:$0xff]  ;;  %275 = vst [vmem:[%s188_s6 + $0x60] sm:$0xff] %v274_v12 }
  0x21   : > { %v278_v14 = vld [vmem:[%s1757_s5 + $0x1c0] sm:$0xff]  ;;  %277 = vst [vmem:[%s188_s6 + $0x68] sm:$0xff] %v276_v13 }
  0x22   : > { %279 = vst [vmem:[%s188_s6 + $0x70] sm:$0xff] %v278_v14  ;;  %v280_v15 = vld [vmem:[%s1757_s5 + $0x1e0] sm:$0xff] }
  0x23   : > { %281 = vst [vmem:[%s188_s6 + $0x78] sm:$0xff] %v280_v15 }
  0x24 PF: > { %p1438_p8 = scmp.ge.s32.totalorder %s1681_s19, 1  ;;  %p302_p9 = scmp.lt.s32.totalorder %s1681_s19, 5 }
  0x26   : > { %p303_p10 = pnand %p1438_p8, %p302_p9 }
  0x27   : > { %s309_s7 = sand.u32 (!%p303_p10), 1, %s1665_s15  }
  0x28   : > { %306 = sbr.rel (%p303_p10) target bundleno = 350 (0x15e), region = 70  ;;  %s1439_s8 = sshll.u32 (!%p303_p10), %s309_s7, 7 }
  0x29   : > { %s1782_s9 = scalar_lea.vmem (!%p303_p10), [#allocation2], %s1439_s8  ;;  %s1441_s8 = sshll.u32 (!%p303_p10), %s1673_s17, 1 }
  0x2a   : > { %p354_p11 = scmp.lt.s32.totalorder (!%p303_p10), %s1441_s8, 7  ;;  %s1440_s21 = sshll.u32 (!%p303_p10), %s309_s7, 8 }
  0x2b   : > { %s1891_s15 = scalar_lea.vmem (!%p303_p10), [#allocation3], %s1440_s21 }
  0x2d   : > { %v1683_v16 = vmov 0   ;;  %v1603_v17 = vld [vmem:[%s1782_s9 + $0x74] ss:$8 sps:$4 sm:$0xff]   ;;  %v1605_v18 = vld [vmem:[%s1782_s9 + $0x70] ss:$8 sps:$4 sm:$0xff]   ;;  %v1627_v33 = vld [vmem:[%s2128_s0] sm:$0xff]   ;;  %v785_v49 = vlaneseq }
  0x2e   : > { %622 = vmatprep.mubr.bf16.mxu0 %v1683_v16  ;;  %702 = vmatprep.mubr.bf16.mxu1 %v1683_v16  ;;  %v1606_v19 = vld [vmem:[%s1782_s9 + $0x64] ss:$8 sps:$4 sm:$0xff]   ;;  %v1608_v20 = vld [vmem:[%s1782_s9 + $0x60] ss:$8 sps:$4 sm:$0xff]   ;;  %v1609_v21 = vld [vmem:[%s1782_s9 + $0x54] ss:$8 sps:$4 sm:$0xff]  }
  0x2f   : > { %590 = vmatprep.subr.bf16.mxu0 %v1603_v17  ;;  %1546 = vmatprep.subr.bf16.mxu1 %v1603_v17  ;;  %v1611_v22 = vld [vmem:[%s1782_s9 + $0x50] ss:$8 sps:$4 sm:$0xff]   ;;  %v1612_v23 = vld [vmem:[%s1782_s9 + $0x44] ss:$8 sps:$4 sm:$0xff]   ;;  %v1614_v24 = vld [vmem:[%s1782_s9 + $0x40] ss:$8 sps:$4 sm:$0xff]  }
  0x30   : > { %591 = vmatpush1.bf16.msra.mxu0 %v1605_v18  ;;  %1554 = vmatpush1.bf16.msra.mxu1 %v1605_v18  ;;  %v1615_v25 = vld [vmem:[%s1782_s9 + $0x34] ss:$8 sps:$4 sm:$0xff]   ;;  %v1617_v26 = vld [vmem:[%s1782_s9 + $0x30] ss:$8 sps:$4 sm:$0xff]   ;;  %v1618_v27 = vld [vmem:[%s1782_s9 + $0x24] ss:$8 sps:$4 sm:$0xff]  }
  0x31   : > { %592 = vmatprep.subr.bf16.mxu0 %v1606_v19  ;;  %1547 = vmatprep.subr.bf16.mxu1 %v1606_v19  ;;  %v1620_v28 = vld [vmem:[%s1782_s9 + $0x20] ss:$8 sps:$4 sm:$0xff]   ;;  %v1621_v29 = vld [vmem:[%s1782_s9 + $0x14] ss:$8 sps:$4 sm:$0xff]   ;;  %v1623_v30 = vld [vmem:[%s1782_s9 + $0x10] ss:$8 sps:$4 sm:$0xff]  }
  0x32   : > { %v1624_v31 = vld [vmem:[%s1782_s9 + $0x4] ss:$8 sps:$4 sm:$0xff]   ;;  %v1626_v32 = vld [vmem:[%s1782_s9] ss:$8 sps:$4 sm:$0xff]   ;;  %v1631_v37 = vld [vmem:[%s2128_s0 + $0x10] sm:$0xff]   ;;  %s2141_s8 = smov (!%p354_p11, %s1441_s8), 7 }
  0x33   : > { %v1628_v34 = vld [vmem:[%s2128_s0 + $0x40] sm:$0xff]   ;;  %v1629_v35 = vld [vmem:[%s2128_s0 + $0x8] sm:$0xff]   ;;  %v1632_v38 = vld [vmem:[%s2128_s0 + $0x50] sm:$0xff]   ;;  %v786_v50 = vshrl.u32 %v785_v49, 7  ;;  %s356_s11 = scalar_lea.vmem %s2130_s2, %s2141_s8  ;;  %s361_s14 = scalar_lea.vmem %s2131_s3, %s2141_s8 }
  0x34   : > { %593 = vmatpush1.bf16.msra.mxu0 %v1608_v20  ;;  %1555 = vmatpush1.bf16.msra.mxu1 %v1608_v20  ;;  %v1630_v36 = vld [vmem:[%s2128_s0 + $0x48] sm:$0xff]   ;;  %v1633_v39 = vld [vmem:[%s2128_s0 + $0x18] sm:$0xff]   ;;  %v1635_v41 = vld [vmem:[%s2128_s0 + $0x20] sm:$0xff]   ;;  %s1545_s7 = sshll.u32 (%p1744_p6), %s1673_s17, 3 }
  0x35   : > { %594 = vmatprep.subr.bf16.mxu0 %v1609_v21  ;;  %1548 = vmatprep.subr.bf16.mxu1 %v1609_v21  ;;  %v1634_v40 = vld [vmem:[%s2128_s0 + $0x58] sm:$0xff]   ;;  %v1636_v42 = vld [vmem:[%s2128_s0 + $0x60] sm:$0xff]   ;;  %v1637_v43 = vld [vmem:[%s2128_s0 + $0x28] sm:$0xff]   ;;  %v787_v51 = vsub.s32 0, %v786_v50  ;;  %v791_v53 = vsub.s32 1, %v786_v50  ;;  %s2050_s26 = scalar_lea.vmem (%p1744_p6), %s2132_s4, %s1545_s7 }
  0x36   : > { %v1638_v44 = vld [vmem:[%s2128_s0 + $0x68] sm:$0xff]   ;;  %v1639_v45 = vld [vmem:[%s2128_s0 + $0x30] sm:$0xff]   ;;  %v1641_v47 = vld [vmem:[%s2128_s0 + $0x38] sm:$0xff]  }
  0x37   : > { %v1640_v46 = vld [vmem:[%s2128_s0 + $0x70] sm:$0xff]   ;;  %v1642_v48 = vld [vmem:[%s2128_s0 + $0x78] sm:$0xff]   ;;  %v783_v52 = vld [vmem:[%s356_s11] sm:$0x3] }
  0x38   : > { %595 = vmatpush1.bf16.msra.mxu0 %v1611_v22  ;;  %1556 = vmatpush1.bf16.msra.mxu1 %v1611_v22  ;;  %v1869_v54 = vrot.slane %v783_v52, %v787_v51  ;;  %v859_v55 = vld [vmem:[%s361_s14] sm:$0x3]  ;;  %v1871_v56 = vrot.slane %v783_v52, %v791_v53 }
  0x39   : > { %596 = vmatprep.subr.bf16.mxu0 %v1612_v23  ;;  %1549 = vmatprep.subr.bf16.mxu1 %v1612_v23  ;;  %v1874_v60 = vrot.slane %v859_v55, %v787_v51  ;;  %v1877_v62 = vrot.slane %v859_v55, %v791_v53 }
  0x3c   : > { %597 = vmatpush1.bf16.msra.mxu0 %v1614_v24  ;;  %1557 = vmatpush1.bf16.msra.mxu1 %v1614_v24 }
  0x3d   : > { %598 = vmatprep.subr.bf16.mxu0 %v1615_v25  ;;  %1550 = vmatprep.subr.bf16.mxu1 %v1615_v25 }
  0x40   : > { %599 = vmatpush1.bf16.msra.mxu0 %v1617_v26  ;;  %1558 = vmatpush1.bf16.msra.mxu1 %v1617_v26 }
  0x41   : > { %600 = vmatprep.subr.bf16.mxu0 %v1618_v27  ;;  %1551 = vmatprep.subr.bf16.mxu1 %v1618_v27 }
  0x44   : > { %601 = vmatpush1.bf16.msra.mxu0 %v1620_v28  ;;  %1559 = vmatpush1.bf16.msra.mxu1 %v1620_v28 }
  0x45   : > { %602 = vmatprep.subr.bf16.mxu0 %v1621_v29  ;;  %1552 = vmatprep.subr.bf16.mxu1 %v1621_v29 }
  0x48   : > { %603 = vmatpush1.bf16.msra.mxu0 %v1623_v30  ;;  %1560 = vmatpush1.bf16.msra.mxu1 %v1623_v30 }
  0x49   : > { %604 = vmatprep.subr.bf16.mxu0 %v1624_v31  ;;  %1553 = vmatprep.subr.bf16.mxu1 %v1624_v31 }
  0x4c   : > { %605 = vmatpush1.bf16.msra.mxu0 %v1626_v32  ;;  %1561 = vmatpush1.bf16.msra.mxu1 %v1626_v32 }
  0x4f   : > { %623 = vmatmul.mubr.bf16.vlgmr.msra.gmra.mxu0 %v1627_v33  ;;  %703 = vmatmul.mubr.bf16.vlgmr.msra.gmra.mxu1 %v1628_v34 }
  0x50   : > { %632 = vmatprep.mubr.bf16.mxu0 %v1683_v16  ;;  %712 = vmatprep.mubr.bf16.mxu1 %v1683_v16 }
  0x57   : > { %633 = vmatmul.mubr.bf16.gmra.mxu0 %v1629_v35  ;;  %713 = vmatmul.mubr.bf16.gmra.mxu1 %v1630_v36 }
  0x58   : > { %642 = vmatprep.mubr.bf16.mxu0 %v1683_v16  ;;  %722 = vmatprep.mubr.bf16.mxu1 %v1683_v16 }
  0x5f   : > { %643 = vmatmul.mubr.bf16.gmra.mxu0 %v1631_v37  ;;  %723 = vmatmul.mubr.bf16.gmra.mxu1 %v1632_v38 }
  0x60   : > { %652 = vmatprep.mubr.bf16.mxu0 %v1683_v16  ;;  %732 = vmatprep.mubr.bf16.mxu1 %v1683_v16 }
  0x67   : > { %653 = vmatmul.mubr.bf16.gmra.mxu0 %v1633_v39  ;;  %733 = vmatmul.mubr.bf16.gmra.mxu1 %v1634_v40 }
  0x68   : > { %662 = vmatprep.mubr.bf16.mxu0 %v1683_v16  ;;  %742 = vmatprep.mubr.bf16.mxu1 %v1683_v16 }
  0x6f   : > { %663 = vmatmul.mubr.bf16.gmra.mxu0 %v1635_v41  ;;  %743 = vmatmul.mubr.bf16.gmra.mxu1 %v1636_v42 }
  0x70   : > { %672 = vmatprep.mubr.bf16.mxu0 %v1683_v16  ;;  %752 = vmatprep.mubr.bf16.mxu1 %v1683_v16 }
  0x77   : > { %673 = vmatmul.mubr.bf16.gmra.mxu0 %v1637_v43  ;;  %753 = vmatmul.mubr.bf16.gmra.mxu1 %v1638_v44 }
  0x78   : > { %682 = vmatprep.mubr.bf16.mxu0 %v1683_v16  ;;  %762 = vmatprep.mubr.bf16.mxu1 %v1683_v16 }
  0x7f   : > { %683 = vmatmul.mubr.bf16.gmra.mxu0 %v1639_v45  ;;  %763 = vmatmul.mubr.bf16.gmra.mxu1 %v1640_v46 }
  0x80   : > { %692 = vmatprep.mubr.bf16.mxu0 %v1683_v16  ;;  %772 = vmatprep.mubr.bf16.mxu1 %v1683_v16 }
  0x87   : > { %693 = vmatmul.mubr.bf16.gmra.mxu0 %v1641_v47  ;;  %773 = vmatmul.mubr.bf16.gmra.mxu1 %v1642_v48 }
 0x10f   : > { %v624_v57 = vpop.f32.mrf.mxu0  ;;  %v704_v58 = vpop.f32.mrf.mxu1 }
 0x110   : > { %v795_v59 = vmul.f32 %v1869_v54, %v624_v57  ;;  %v827_v61 = vmul.f32 %v1869_v54, %v704_v58 }
 0x111   : > { %v626_v63 = vpop.f32.mrf.mxu0  ;;  %v706_v0 = vpop.f32.mrf.mxu1 }
 0x112   : > { %v796_v1 = vmul.f32 %v1871_v56, %v626_v63  ;;  %v828_v2 = vmul.f32 %v1871_v56, %v706_v0  ;;  %v871_v5 = vadd.f32 %v1874_v60, %v795_v59  ;;  %v903_v6 = vadd.f32 %v1874_v60, %v827_v61 }
 0x113   : > { %v628_v3 = vpop.f32.mrf.mxu0  ;;  %v708_v4 = vpop.f32.mrf.mxu1 }
 0x114   : > { %v872_v7 = vadd.f32 %v1877_v62, %v796_v1  ;;  %v904_v8 = vadd.f32 %v1877_v62, %v828_v2  ;;  %v797_v9 = vmul.f32 %v1869_v54, %v628_v3  ;;  %v829_v10 = vmul.f32 %v1869_v54, %v708_v4 }
 0x115   : > { %v630_v11 = vpop.f32.mrf.mxu0  ;;  %v710_v12 = vpop.f32.mrf.mxu1 }
 0x116   : > { %v1513_v13 = vpack.c.bf16 %v872_v7, %v871_v5  ;;  %v1529_v14 = vpack.c.bf16 %v904_v8, %v903_v6  ;;  %v798_v15 = vmul.f32 %v1871_v56, %v630_v11  ;;  %v830_v16 = vmul.f32 %v1871_v56, %v710_v12 }
 0x117   : > { %v634_v17 = vpop.f32.mrf.mxu0  ;;  %v714_v18 = vpop.f32.mrf.mxu1  ;;  %v873_v21 = vadd.f32 %v1874_v60, %v797_v9  ;;  %v905_v22 = vadd.f32 %v1874_v60, %v829_v10 }
 0x118   : > { %1127 = vst [vmem:[%s1891_s15] sm:$0xff] %v1513_v13  ;;  %1143 = vst [vmem:[%s1891_s15 + $0x80] sm:$0xff] %v1529_v14  ;;  %v799_v19 = vmul.f32 %v1869_v54, %v634_v17  ;;  %v831_v20 = vmul.f32 %v1869_v54, %v714_v18  ;;  %v874_v23 = vadd.f32 %v1877_v62, %v798_v15 }
 0x119   : > { %v906_v24 = vadd.f32 %v1877_v62, %v830_v16  ;;  %v636_v25 = vpop.f32.mrf.mxu0  ;;  %v716_v26 = vpop.f32.mrf.mxu1 }
 0x11a   : > { %v800_v27 = vmul.f32 %v1871_v56, %v636_v25  ;;  %v832_v28 = vmul.f32 %v1871_v56, %v716_v26  ;;  %v1514_v29 = vpack.c.bf16 %v874_v23, %v873_v21  ;;  %v875_v33 = vadd.f32 %v1874_v60, %v799_v19 }
 0x11b   : > { %v1530_v30 = vpack.c.bf16 %v906_v24, %v905_v22  ;;  %v638_v31 = vpop.f32.mrf.mxu0  ;;  %v718_v32 = vpop.f32.mrf.mxu1  ;;  %v907_v34 = vadd.f32 %v1874_v60, %v831_v20 }
 0x11c   : > { %v876_v35 = vadd.f32 %v1877_v62, %v800_v27  ;;  %v908_v36 = vadd.f32 %v1877_v62, %v832_v28  ;;  %1128 = vst [vmem:[%s1891_s15 + $0x8] sm:$0xff] %v1514_v29  ;;  %v801_v37 = vmul.f32 %v1869_v54, %v638_v31  ;;  %v833_v38 = vmul.f32 %v1869_v54, %v718_v32 }
 0x11d   : > { %1144 = vst [vmem:[%s1891_s15 + $0x88] sm:$0xff] %v1530_v30  ;;  %v640_v39 = vpop.f32.mrf.mxu0  ;;  %v720_v40 = vpop.f32.mrf.mxu1 }
 0x11e   : > { %v1515_v41 = vpack.c.bf16 %v876_v35, %v875_v33  ;;  %v1531_v42 = vpack.c.bf16 %v908_v36, %v907_v34  ;;  %v802_v43 = vmul.f32 %v1871_v56, %v640_v39  ;;  %v834_v44 = vmul.f32 %v1871_v56, %v720_v40 }
 0x11f   : > { %v644_v45 = vpop.f32.mrf.mxu0  ;;  %v724_v46 = vpop.f32.mrf.mxu1  ;;  %v877_v49 = vadd.f32 %v1874_v60, %v801_v37  ;;  %v909_v50 = vadd.f32 %v1874_v60, %v833_v38 }
 0x120   : > { %1129 = vst [vmem:[%s1891_s15 + $0x10] sm:$0xff] %v1515_v41  ;;  %1145 = vst [vmem:[%s1891_s15 + $0x90] sm:$0xff] %v1531_v42  ;;  %v803_v47 = vmul.f32 %v1869_v54, %v644_v45  ;;  %v835_v48 = vmul.f32 %v1869_v54, %v724_v46  ;;  %v878_v51 = vadd.f32 %v1877_v62, %v802_v43 }
 0x121   : > { %v910_v52 = vadd.f32 %v1877_v62, %v834_v44  ;;  %v646_v53 = vpop.f32.mrf.mxu0  ;;  %v726_v55 = vpop.f32.mrf.mxu1 }
 0x122   : > { %v804_v57 = vmul.f32 %v1871_v56, %v646_v53  ;;  %v836_v58 = vmul.f32 %v1871_v56, %v726_v55  ;;  %v1516_v59 = vpack.c.bf16 %v878_v51, %v877_v49  ;;  %v879_v1 = vadd.f32 %v1874_v60, %v803_v47 }
 0x123   : > { %v1532_v61 = vpack.c.bf16 %v910_v52, %v909_v50  ;;  %v648_v63 = vpop.f32.mrf.mxu0  ;;  %v728_v0 = vpop.f32.mrf.mxu1  ;;  %v911_v2 = vadd.f32 %v1874_v60, %v835_v48 }
 0x124   : > { %v880_v3 = vadd.f32 %v1877_v62, %v804_v57  ;;  %v912_v4 = vadd.f32 %v1877_v62, %v836_v58  ;;  %1130 = vst [vmem:[%s1891_s15 + $0x18] sm:$0xff] %v1516_v59  ;;  %v805_v5 = vmul.f32 %v1869_v54, %v648_v63  ;;  %v837_v6 = vmul.f32 %v1869_v54, %v728_v0 }
 0x125   : > { %1146 = vst [vmem:[%s1891_s15 + $0x98] sm:$0xff] %v1532_v61  ;;  %v650_v7 = vpop.f32.mrf.mxu0  ;;  %v730_v8 = vpop.f32.mrf.mxu1 }
 0x126   : > { %v1517_v9 = vpack.c.bf16 %v880_v3, %v879_v1  ;;  %v1533_v10 = vpack.c.bf16 %v912_v4, %v911_v2  ;;  %v806_v11 = vmul.f32 %v1871_v56, %v650_v7  ;;  %v838_v12 = vmul.f32 %v1871_v56, %v730_v8 }
 0x127   : > { %v654_v13 = vpop.f32.mrf.mxu0  ;;  %v734_v14 = vpop.f32.mrf.mxu1  ;;  %v881_v17 = vadd.f32 %v1874_v60, %v805_v5  ;;  %v913_v18 = vadd.f32 %v1874_v60, %v837_v6 }
 0x128   : > { %1131 = vst [vmem:[%s1891_s15 + $0x20] sm:$0xff] %v1517_v9  ;;  %1147 = vst [vmem:[%s1891_s15 + $0xa0] sm:$0xff] %v1533_v10  ;;  %v807_v15 = vmul.f32 %v1869_v54, %v654_v13  ;;  %v839_v16 = vmul.f32 %v1869_v54, %v734_v14  ;;  %v882_v19 = vadd.f32 %v1877_v62, %v806_v11 }
 0x129   : > { %v914_v20 = vadd.f32 %v1877_v62, %v838_v12  ;;  %v656_v21 = vpop.f32.mrf.mxu0  ;;  %v736_v22 = vpop.f32.mrf.mxu1 }
 0x12a   : > { %v808_v23 = vmul.f32 %v1871_v56, %v656_v21  ;;  %v840_v24 = vmul.f32 %v1871_v56, %v736_v22  ;;  %v1518_v25 = vpack.c.bf16 %v882_v19, %v881_v17  ;;  %v883_v29 = vadd.f32 %v1874_v60, %v807_v15 }
 0x12b   : > { %v1534_v26 = vpack.c.bf16 %v914_v20, %v913_v18  ;;  %v658_v27 = vpop.f32.mrf.mxu0  ;;  %v738_v28 = vpop.f32.mrf.mxu1  ;;  %v915_v30 = vadd.f32 %v1874_v60, %v839_v16 }
 0x12c   : > { %v884_v31 = vadd.f32 %v1877_v62, %v808_v23  ;;  %v916_v32 = vadd.f32 %v1877_v62, %v840_v24  ;;  %1132 = vst [vmem:[%s1891_s15 + $0x28] sm:$0xff] %v1518_v25  ;;  %v809_v33 = vmul.f32 %v1869_v54, %v658_v27  ;;  %v841_v34 = vmul.f32 %v1869_v54, %v738_v28 }
 0x12d   : > { %1148 = vst [vmem:[%s1891_s15 + $0xa8] sm:$0xff] %v1534_v26  ;;  %v660_v35 = vpop.f32.mrf.mxu0  ;;  %v740_v36 = vpop.f32.mrf.mxu1 }
 0x12e   : > { %v1519_v37 = vpack.c.bf16 %v884_v31, %v883_v29  ;;  %v1535_v38 = vpack.c.bf16 %v916_v32, %v915_v30  ;;  %v810_v39 = vmul.f32 %v1871_v56, %v660_v35  ;;  %v842_v40 = vmul.f32 %v1871_v56, %v740_v36 }
 0x12f   : > { %v664_v41 = vpop.f32.mrf.mxu0  ;;  %v744_v42 = vpop.f32.mrf.mxu1  ;;  %v885_v45 = vadd.f32 %v1874_v60, %v809_v33  ;;  %v917_v46 = vadd.f32 %v1874_v60, %v841_v34 }
 0x130   : > { %1133 = vst [vmem:[%s1891_s15 + $0x30] sm:$0xff] %v1519_v37  ;;  %1149 = vst [vmem:[%s1891_s15 + $0xb0] sm:$0xff] %v1535_v38  ;;  %v811_v43 = vmul.f32 %v1869_v54, %v664_v41  ;;  %v843_v44 = vmul.f32 %v1869_v54, %v744_v42  ;;  %v886_v47 = vadd.f32 %v1877_v62, %v810_v39 }
 0x131   : > { %v918_v48 = vadd.f32 %v1877_v62, %v842_v40  ;;  %v666_v49 = vpop.f32.mrf.mxu0  ;;  %v746_v50 = vpop.f32.mrf.mxu1 }
 0x132   : > { %v812_v51 = vmul.f32 %v1871_v56, %v666_v49  ;;  %v844_v52 = vmul.f32 %v1871_v56, %v746_v50  ;;  %v1520_v53 = vpack.c.bf16 %v886_v47, %v885_v45  ;;  %v887_v59 = vadd.f32 %v1874_v60, %v811_v43 }
 0x133   : > { %v1536_v55 = vpack.c.bf16 %v918_v48, %v917_v46  ;;  %v668_v57 = vpop.f32.mrf.mxu0  ;;  %v748_v58 = vpop.f32.mrf.mxu1  ;;  %v919_v61 = vadd.f32 %v1874_v60, %v843_v44 }
 0x134   : > { %v888_v63 = vadd.f32 %v1877_v62, %v812_v51  ;;  %v920_v0 = vadd.f32 %v1877_v62, %v844_v52  ;;  %1134 = vst [vmem:[%s1891_s15 + $0x38] sm:$0xff] %v1520_v53  ;;  %v813_v1 = vmul.f32 %v1869_v54, %v668_v57  ;;  %v845_v2 = vmul.f32 %v1869_v54, %v748_v58 }
 0x135   : > { %1150 = vst [vmem:[%s1891_s15 + $0xb8] sm:$0xff] %v1536_v55  ;;  %v670_v3 = vpop.f32.mrf.mxu0  ;;  %v750_v4 = vpop.f32.mrf.mxu1 }
 0x136   : > { %v1521_v5 = vpack.c.bf16 %v888_v63, %v887_v59  ;;  %v1537_v6 = vpack.c.bf16 %v920_v0, %v919_v61  ;;  %v814_v7 = vmul.f32 %v1871_v56, %v670_v3  ;;  %v846_v8 = vmul.f32 %v1871_v56, %v750_v4 }
 0x137   : > { %v674_v9 = vpop.f32.mrf.mxu0  ;;  %v754_v10 = vpop.f32.mrf.mxu1  ;;  %v889_v13 = vadd.f32 %v1874_v60, %v813_v1  ;;  %v921_v14 = vadd.f32 %v1874_v60, %v845_v2 }
 0x138   : > { %1135 = vst [vmem:[%s1891_s15 + $0x40] sm:$0xff] %v1521_v5  ;;  %1151 = vst [vmem:[%s1891_s15 + $0xc0] sm:$0xff] %v1537_v6  ;;  %v815_v11 = vmul.f32 %v1869_v54, %v674_v9  ;;  %v847_v12 = vmul.f32 %v1869_v54, %v754_v10  ;;  %v890_v15 = vadd.f32 %v1877_v62, %v814_v7 }
 0x139   : > { %v922_v16 = vadd.f32 %v1877_v62, %v846_v8  ;;  %v676_v17 = vpop.f32.mrf.mxu0  ;;  %v756_v18 = vpop.f32.mrf.mxu1 }
 0x13a   : > { %v816_v19 = vmul.f32 %v1871_v56, %v676_v17  ;;  %v848_v20 = vmul.f32 %v1871_v56, %v756_v18  ;;  %v1522_v21 = vpack.c.bf16 %v890_v15, %v889_v13  ;;  %v891_v25 = vadd.f32 %v1874_v60, %v815_v11 }
 0x13b   : > { %v1538_v22 = vpack.c.bf16 %v922_v16, %v921_v14  ;;  %v678_v23 = vpop.f32.mrf.mxu0  ;;  %v758_v24 = vpop.f32.mrf.mxu1  ;;  %v923_v26 = vadd.f32 %v1874_v60, %v847_v12 }
 0x13c   : > { %v892_v27 = vadd.f32 %v1877_v62, %v816_v19  ;;  %v924_v28 = vadd.f32 %v1877_v62, %v848_v20  ;;  %1136 = vst [vmem:[%s1891_s15 + $0x48] sm:$0xff] %v1522_v21  ;;  %v817_v29 = vmul.f32 %v1869_v54, %v678_v23  ;;  %v849_v30 = vmul.f32 %v1869_v54, %v758_v24 }
 0x13d   : > { %1152 = vst [vmem:[%s1891_s15 + $0xc8] sm:$0xff] %v1538_v22  ;;  %v680_v31 = vpop.f32.mrf.mxu0  ;;  %v760_v32 = vpop.f32.mrf.mxu1 }
 0x13e   : > { %v1523_v33 = vpack.c.bf16 %v892_v27, %v891_v25  ;;  %v1539_v34 = vpack.c.bf16 %v924_v28, %v923_v26  ;;  %v818_v35 = vmul.f32 %v1871_v56, %v680_v31  ;;  %v850_v36 = vmul.f32 %v1871_v56, %v760_v32 }
 0x13f   : > { %v684_v37 = vpop.f32.mrf.mxu0  ;;  %v764_v38 = vpop.f32.mrf.mxu1  ;;  %v893_v41 = vadd.f32 %v1874_v60, %v817_v29  ;;  %v925_v42 = vadd.f32 %v1874_v60, %v849_v30 }
 0x140   : > { %1137 = vst [vmem:[%s1891_s15 + $0x50] sm:$0xff] %v1523_v33  ;;  %1153 = vst [vmem:[%s1891_s15 + $0xd0] sm:$0xff] %v1539_v34  ;;  %v819_v39 = vmul.f32 %v1869_v54, %v684_v37  ;;  %v851_v40 = vmul.f32 %v1869_v54, %v764_v38  ;;  %v894_v43 = vadd.f32 %v1877_v62, %v818_v35  ;;  %v1268_v38 = vld [vmem:[%s1891_s15 + $0x18] sm:$0xff] (%p1744_p6) }
 0x141   : > { %v926_v44 = vadd.f32 %v1877_v62, %v850_v36  ;;  %v686_v45 = vpop.f32.mrf.mxu0  ;;  %v766_v46 = vpop.f32.mrf.mxu1  ;;  %1269 = vst [vmem:[%s2050_s26 + $0x60] sm:$0xff] (%p1744_p6), %v1268_v38 }
 0x142   : > { %v820_v47 = vmul.f32 %v1871_v56, %v686_v45  ;;  %v852_v48 = vmul.f32 %v1871_v56, %v766_v46  ;;  %v1524_v49 = vpack.c.bf16 %v894_v43, %v893_v41  ;;  %v895_v53 = vadd.f32 %v1874_v60, %v819_v39  ;;  %v1270_v39 = vld [vmem:[%s1891_s15 + $0x20] sm:$0xff] (%p1744_p6)  ;;  %v1274_v41 = vld [vmem:[%s1891_s15 + $0x30] sm:$0xff] (%p1744_p6) }
 0x143   : > { %v1540_v50 = vpack.c.bf16 %v926_v44, %v925_v42  ;;  %v688_v51 = vpop.f32.mrf.mxu0  ;;  %v768_v52 = vpop.f32.mrf.mxu1  ;;  %v927_v55 = vadd.f32 %v1874_v60, %v851_v40  ;;  %v1272_v40 = vld [vmem:[%s1891_s15 + $0x28] sm:$0xff] (%p1744_p6)  ;;  %1271 = vst [vmem:[%s2050_s26 + $0x80] sm:$0xff] (%p1744_p6), %v1270_v39  ;;  %v1276_v42 = vld [vmem:[%s1891_s15 + $0x38] sm:$0xff] (%p1744_p6)  ;;  %v1278_v43 = vld [vmem:[%s1891_s15 + $0x40] sm:$0xff] (%p1744_p6) }
 0x144   : > { %v896_v57 = vadd.f32 %v1877_v62, %v820_v47  ;;  %v928_v58 = vadd.f32 %v1877_v62, %v852_v48  ;;  %1138 = vst [vmem:[%s1891_s15 + $0x58] sm:$0xff] %v1524_v49  ;;  %v821_v59 = vmul.f32 %v1869_v54, %v688_v51  ;;  %v853_v61 = vmul.f32 %v1869_v54, %v768_v52  ;;  %v1280_v44 = vld [vmem:[%s1891_s15 + $0x48] sm:$0xff] (%p1744_p6)  ;;  %v1294_v51 = vld [vmem:[%s1891_s15 + $0x80] sm:$0xff] (%p1744_p6) }
 0x145   : > { %1154 = vst [vmem:[%s1891_s15 + $0xd8] sm:$0xff] %v1540_v50  ;;  %v690_v63 = vpop.f32.mrf.mxu0  ;;  %v770_v0 = vpop.f32.mrf.mxu1  ;;  %1273 = vst [vmem:[%s2050_s26 + $0xa0] sm:$0xff] (%p1744_p6), %v1272_v40  ;;  %v1296_v52 = vld [vmem:[%s1891_s15 + $0x88] sm:$0xff] (%p1744_p6) }
 0x146   : > { %v1525_v1 = vpack.c.bf16 %v896_v57, %v895_v53  ;;  %v1541_v2 = vpack.c.bf16 %v928_v58, %v927_v55  ;;  %v822_v3 = vmul.f32 %v1871_v56, %v690_v63  ;;  %v854_v4 = vmul.f32 %v1871_v56, %v770_v0  ;;  %1275 = vst [vmem:[%s2050_s26 + $0xc0] sm:$0xff] (%p1744_p6), %v1274_v41  ;;  %v1298_v53 = vld [vmem:[%s1891_s15 + $0x90] sm:$0xff] (%p1744_p6)  ;;  %v1300_v55 = vld [vmem:[%s1891_s15 + $0x98] sm:$0xff] (%p1744_p6)  ;;  %v1302_v57 = vld [vmem:[%s1891_s15 + $0xa0] sm:$0xff] (%p1744_p6) }
 0x147   : > { %v694_v5 = vpop.f32.mrf.mxu0  ;;  %v774_v6 = vpop.f32.mrf.mxu1  ;;  %v897_v9 = vadd.f32 %v1874_v60, %v821_v59  ;;  %v929_v10 = vadd.f32 %v1874_v60, %v853_v61  ;;  %1277 = vst [vmem:[%s2050_s26 + $0xe0] sm:$0xff] (%p1744_p6), %v1276_v42  ;;  %1279 = vst [vmem:[%s2050_s26 + $0x100] sm:$0xff] (%p1744_p6), %v1278_v43  ;;  %v1282_v45 = vld [vmem:[%s1891_s15 + $0x50] sm:$0xff] (%p1744_p6)  ;;  %v1304_v58 = vld [vmem:[%s1891_s15 + $0xa8] sm:$0xff] (%p1744_p6) }
 0x148   : > { %1139 = vst [vmem:[%s1891_s15 + $0x60] sm:$0xff] %v1525_v1  ;;  %1155 = vst [vmem:[%s1891_s15 + $0xe0] sm:$0xff] %v1541_v2  ;;  %v823_v7 = vmul.f32 %v1869_v54, %v694_v5  ;;  %v855_v8 = vmul.f32 %v1869_v54, %v774_v6  ;;  %v898_v11 = vadd.f32 %v1877_v62, %v822_v3  ;;  %v1306_v59 = vld [vmem:[%s1891_s15 + $0xb0] sm:$0xff] (%p1744_p6)  ;;  %v1308_v61 = vld [vmem:[%s1891_s15 + $0xb8] sm:$0xff] (%p1744_p6) }
 0x149   : > { %v930_v12 = vadd.f32 %v1877_v62, %v854_v4  ;;  %v696_v13 = vpop.f32.mrf.mxu0  ;;  %v776_v14 = vpop.f32.mrf.mxu1  ;;  %1281 = vst [vmem:[%s2050_s26 + $0x120] sm:$0xff] (%p1744_p6), %v1280_v44  ;;  %1283 = vst [vmem:[%s2050_s26 + $0x140] sm:$0xff] (%p1744_p6), %v1282_v45  ;;  %v1310_v63 = vld [vmem:[%s1891_s15 + $0xc0] sm:$0xff] (%p1744_p6)  ;;  %v1312_v0 = vld [vmem:[%s1891_s15 + $0xc8] sm:$0xff] (%p1744_p6) }
 0x14a   : > { %v824_v15 = vmul.f32 %v1871_v56, %v696_v13  ;;  %v856_v16 = vmul.f32 %v1871_v56, %v776_v14  ;;  %v1526_v17 = vpack.c.bf16 %v898_v11, %v897_v9  ;;  %v899_v21 = vadd.f32 %v1874_v60, %v823_v7  ;;  %1295 = vst [vmem:[%s2050_s26 + $0x200] sm:$0xff] (%p1744_p6), %v1294_v51  ;;  %v1314_v1 = vld [vmem:[%s1891_s15 + $0xd0] sm:$0xff] (%p1744_p6) }
 0x14b   : > { %v1542_v18 = vpack.c.bf16 %v930_v12, %v929_v10  ;;  %v698_v19 = vpop.f32.mrf.mxu0  ;;  %v778_v20 = vpop.f32.mrf.mxu1  ;;  %v931_v22 = vadd.f32 %v1874_v60, %v855_v8  ;;  %v1284_v46 = vld [vmem:[%s1891_s15 + $0x58] sm:$0xff] (%p1744_p6)  ;;  %1297 = vst [vmem:[%s2050_s26 + $0x220] sm:$0xff] (%p1744_p6), %v1296_v52  ;;  %1299 = vst [vmem:[%s2050_s26 + $0x240] sm:$0xff] (%p1744_p6), %v1298_v53 }
 0x14c   : > { %v900_v23 = vadd.f32 %v1877_v62, %v824_v15  ;;  %v932_v24 = vadd.f32 %v1877_v62, %v856_v16  ;;  %1140 = vst [vmem:[%s1891_s15 + $0x68] sm:$0xff] %v1526_v17  ;;  %v825_v25 = vmul.f32 %v1869_v54, %v698_v19  ;;  %v857_v26 = vmul.f32 %v1869_v54, %v778_v20  ;;  %v1316_v2 = vld [vmem:[%s1891_s15 + $0xd8] sm:$0xff] (%p1744_p6) }
 0x14d   : > { %1156 = vst [vmem:[%s1891_s15 + $0xe8] sm:$0xff] %v1542_v18  ;;  %v700_v27 = vpop.f32.mrf.mxu0  ;;  %v780_v28 = vpop.f32.mrf.mxu1  ;;  %1285 = vst [vmem:[%s2050_s26 + $0x160] sm:$0xff] (%p1744_p6), %v1284_v46 }
 0x14e   : > { %v1527_v29 = vpack.c.bf16 %v900_v23, %v899_v21  ;;  %v1543_v30 = vpack.c.bf16 %v932_v24, %v931_v22  ;;  %v826_v31 = vmul.f32 %v1871_v56, %v700_v27  ;;  %v858_v32 = vmul.f32 %v1871_v56, %v780_v28  ;;  %v1262_v56 = vld [vmem:[%s1891_s15] sm:$0xff] (%p1744_p6)  ;;  %1301 = vst [vmem:[%s2050_s26 + $0x260] sm:$0xff] (%p1744_p6), %v1300_v55 }
 0x14f   : > { %v901_v33 = vadd.f32 %v1874_v60, %v825_v25  ;;  %v933_v34 = vadd.f32 %v1874_v60, %v857_v26  ;;  %v1264_v60 = vld [vmem:[%s1891_s15 + $0x8] sm:$0xff] (%p1744_p6)  ;;  %1263 = vst [vmem:[%s2050_s26] sm:$0xff] (%p1744_p6), %v1262_v56  ;;  %v1286_v47 = vld [vmem:[%s1891_s15 + $0x60] sm:$0xff] (%p1744_p6)  ;;  %1303 = vst [vmem:[%s2050_s26 + $0x280] sm:$0xff] (%p1744_p6), %v1302_v57 }
 0x150   : > { %1141 = vst [vmem:[%s1891_s15 + $0x70] sm:$0xff] %v1527_v29  ;;  %1157 = vst [vmem:[%s1891_s15 + $0xf0] sm:$0xff] %v1543_v30  ;;  %v902_v35 = vadd.f32 %v1877_v62, %v826_v31  ;;  %v934_v36 = vadd.f32 %v1877_v62, %v858_v32  ;;  %1165 = sbr.rel (!%p1744_p6) target bundleno = 350 (0x15e), region = 78  ;;  %v1266_v62 = vld [vmem:[%s1891_s15 + $0x10] sm:$0xff] (%p1744_p6)  ;;  %v1318_v3 = vld [vmem:[%s1891_s15 + $0xe0] sm:$0xff] (%p1744_p6) }
 0x151   : > { %1265 = vst [vmem:[%s2050_s26 + $0x20] sm:$0xff] (%p1744_p6), %v1264_v60  ;;  %1267 = vst [vmem:[%s2050_s26 + $0x40] sm:$0xff] (%p1744_p6), %v1266_v62 }
 0x152   : > { %v1528_v54 = vpack.c.bf16 %v902_v35, %v901_v33  ;;  %v1544_v37 = vpack.c.bf16 %v934_v36, %v933_v34  ;;  %1287 = vst [vmem:[%s2050_s26 + $0x180] sm:$0xff] (%p1744_p6), %v1286_v47  ;;  %1305 = vst [vmem:[%s2050_s26 + $0x2a0] sm:$0xff] (%p1744_p6), %v1304_v58 }
 0x153   : > { %v1288_v48 = vld [vmem:[%s1891_s15 + $0x68] sm:$0xff] (%p1744_p6)  ;;  %1307 = vst [vmem:[%s2050_s26 + $0x2c0] sm:$0xff] (%p1744_p6), %v1306_v59  ;;  %1309 = vst [vmem:[%s2050_s26 + $0x2e0] sm:$0xff] (%p1744_p6), %v1308_v61 }
 0x154   : > { %1142 = vst [vmem:[%s1891_s15 + $0x78] sm:$0xff] %v1528_v54  ;;  %1158 = vst [vmem:[%s1891_s15 + $0xf8] sm:$0xff] %v1544_v37  ;;  %v1320_v4 = vld [vmem:[%s1891_s15 + $0xe8] sm:$0xff] (%p1744_p6) }
 0x155   : > { %1289 = vst [vmem:[%s2050_s26 + $0x1a0] sm:$0xff] %v1288_v48  ;;  %1311 = vst [vmem:[%s2050_s26 + $0x300] sm:$0xff] %v1310_v63 }
 0x156   : > { %1313 = vst [vmem:[%s2050_s26 + $0x320] sm:$0xff] %v1312_v0  ;;  %1315 = vst [vmem:[%s2050_s26 + $0x340] sm:$0xff] %v1314_v1 }
 0x157   : > { %v1290_v49 = vld [vmem:[%s1891_s15 + $0x70] sm:$0xff]  ;;  %1317 = vst [vmem:[%s2050_s26 + $0x360] sm:$0xff] %v1316_v2  ;;  %1319 = vst [vmem:[%s2050_s26 + $0x380] sm:$0xff] %v1318_v3 }
 0x158   : > { %1291 = vst [vmem:[%s2050_s26 + $0x1c0] sm:$0xff] %v1290_v49  ;;  %1321 = vst [vmem:[%s2050_s26 + $0x3a0] sm:$0xff] %v1320_v4  ;;  %v1322_v5 = vld [vmem:[%s1891_s15 + $0xf0] sm:$0xff] }
 0x159   : > { %1323 = vst [vmem:[%s2050_s26 + $0x3c0] sm:$0xff] %v1322_v5 }
 0x15b   : > { %v1292_v50 = vld [vmem:[%s1891_s15 + $0x78] sm:$0xff] }
 0x15c   : > { %1293 = vst [vmem:[%s2050_s26 + $0x1e0] sm:$0xff] %v1292_v50  ;;  %v1324_v6 = vld [vmem:[%s1891_s15 + $0xf8] sm:$0xff] }
 0x15d   : > { %1325 = vst [vmem:[%s2050_s26 + $0x3e0] sm:$0xff] %v1324_v6 }
 0x15e PF: > { %s14_s19 = sadd.s32 1, %s1681_s19   ;;  %s2134_s15 = smov %s1669_s16 }
 0x15f   : > { %p11_p12 = scmp.ge.s32.totalorder %s14_s19, 6   ;;  %s2135_s16 = smov %s1749_s25 }
 0x160   : > { %s2136_s17 = smov %s1677_s18  ;;  %s2137_s18 = smov %s2139_s20 }
 0x161   :  { %13 = sbr.rel (!%p11_p12) target bundleno = 3 (0x3), region = 156 }

// kernel: psp_forward.7
= control target key start
LH: loop header
LB: loop body
LE: loop exit
PB: predicated region body
PF: predicated region fallthrough
CT: control target
= control target key end

     0   :  { %11 = vsyncpa [#allocation3], 0  ;;  %s13038_s0 = inlined_call_operand.vmem [shape: bf16[2,18,18,1024], index: 0, kind: input, shape index: {}, may-alias: {0,1,2}]   ;;  %s13039_s1 = inlined_call_operand.vmem [shape: bf16[2,18,18,1024], index: 1, kind: input, shape index: {}, may-alias: {0,1,2}]   ;;  %s13040_s2 = inlined_call_operand.vmem [shape: bf16[2,18,18,1024], index: 2, kind: input, shape index: {}, may-alias: {0,1,2}]   ;;  %s13041_s3 = inlined_call_operand.vmem [shape: bf16[9,1024,128], index: 3, kind: input, shape index: {}]   ;;  %s13042_s4 = inlined_call_operand.vmem [shape: f32[1,128], index: 4, kind: input, shape index: {}]   ;;  %s13043_s5 = inlined_call_operand.vmem [shape: f32[1,128], index: 5, kind: input, shape index: {}]   ;;  %s13044_s6 = inlined_call_operand.hbm [shape: f32[2,16,16,128], index: 6, kind: output, shape index: {}]  }
   0x1   :  { %13 = vsyncpa [#allocation3 + $0x1], 0  ;;  %s10761_s21 = smov 0   ;;  %s10763_s22 = smov 0  }
   0x2   :  { %s10765_s23 = smov 0   ;;  %s10767_s24 = smov 0  }
   0x3   :  { %s10769_s25 = smov 0   ;;  %s10771_s26 = smov 0  }
   0x4   :  { %s10773_s27 = smov 0   ;;  %s10775_s28 = smov 0  }
   0x5 LB: > { %s7276_s29 = sadd.s32 4294967295, %s10721_s28   ;;  %s7277_s30 = sadd.s32 4294967294, %s10721_s28   ;;  %s10721_s28 = sphi %s10775_s28, %s19_s28   ;;  %s10717_s27 = sphi %s10773_s27, %s13060_s27   ;;  %s10713_s26 = sphi %s10771_s26, %s13059_s26   ;;  %s10709_s25 = sphi %s10769_s25, %s13058_s25   ;;  %s10705_s24 = sphi %s10767_s24, %s13057_s24   ;;  %s10701_s23 = sphi %s10765_s23, %s13056_s23   ;;  %s10697_s22 = sphi %s10763_s22, %s13055_s22   ;;  %s10693_s21 = sphi %s10761_s21, %s13054_s21  }
   0x6   : > { %s31_s7 = sadd.s32 1, %s10713_s26  ;;  %s34_s8 = sadd.s32 1, %s10717_s27 }
   0x7   : > { %p32_p0 = scmp.ge.s32.totalorder %s31_s7, 16  ;;  %p225_p1 = scmp.ne.s32.totalorder %s10701_s23, %s10697_s22 }
   0x8   : > { %p226_p2 = scmp.eq.s32.totalorder %s7276_s29, 31  ;;  %p231_p5 = scmp.ne.s32.totalorder %s10697_s22, %s10693_s21 }
   0x9   : > { %s13062_s7 = smov (%p32_p0, %s31_s7), 0  ;;  %s13064_s8 = smov (!%p32_p0, %s34_s8), %s10717_s27 }
   0xa   : > { %13047 = sst [smem:[#allocation5_spill]] %s13062_s7  ;;  %s209_s9 = ssub.s32 %s10713_s26, %s13062_s7 }
   0xb   : > { %p10812_p3 = por %p226_p2, %p225_p1  ;;  %p36_p4 = scmp.ge.s32.totalorder %s13064_s8, 2 }
   0xc   : > { %p232_p6 = scmp.eq.s32.totalorder %s7277_s30, 31  ;;  %p7283_p7 = scmp.ge.s32.totalorder %s10721_s28, 1 }
   0xd   : > { %s13066_s8 = smov (%p36_p4, %s13064_s8), 0  ;;  %p309_p9 = scmp.lt.s32.totalorder %s10721_s28, 33 }
   0xe   : > { %13049 = sst [smem:[#allocation6_spill]] %s13066_s8  ;;  %p10821_p8 = por %p232_p6, %p231_p5 }
   0xf   : > { %s208_s12 = ssub.s32 %s10717_s27, %s13066_s8  ;;  %s215_s13 = sadd.s32 1, %s10701_s23 }
  0x10   : > { %s210_s14 = sor.u32 %s209_s9, %s208_s12  ;;  %p310_p10 = pnand %p7283_p7, %p309_p9 }
  0x11   : > { %p213_p11 = scmp.eq.s32.totalorder %s210_s14, 0  ;;  %p373_p12 = scmp.lt.s32.totalorder (!%p310_p10), %s10709_s25, 1 }
  0x12   : > { %313 = sbr.rel (%p310_p10) target bundleno = 836 (0x344), region = 44  ;;  %p375_p13 = scmp.lt.s32.totalorder (!%p310_p10), %s10705_s24, 17 }
  0x13   : > { %s10830_s15 = scalar_select %p213_p11, %s10701_s23, %s215_s13  }
  0x14   : > { %s382_s13 = sadd.s32 (!%p310_p10), 1, %s10705_s24 }
  0x15   : > { %p385_p0 = scmp.lt.s32.totalorder (!%p310_p10), %s382_s13, 17 }
  0x17   : > { %v10029_v0 = vld [vmem:[%s13041_s3 + $0x78] sm:$0xff]   ;;  %v10033_v4 = vld [vmem:[%s13041_s3 + $0x70] sm:$0xff]   ;;  %v10037_v8 = vld [vmem:[%s13041_s3 + $0x68] sm:$0xff]   ;;  %s374_s12 = scalar_select %p373_p12, %s10709_s25, 1  ;;  %vm1905_vm0 = vcmask 1046528   ;;  %vm2623_vm1 = vcmask 1045504  }
  0x18   : > { %v10030_v1 = vld [vmem:[%s13041_s3 + $0xf8] sm:$0xff]   ;;  %8944 = vmatprep.subr.bf16.mxu0 %v10029_v0  ;;  %v10034_v5 = vld [vmem:[%s13041_s3 + $0xf0] sm:$0xff]   ;;  %v10038_v9 = vld [vmem:[%s13041_s3 + $0xe8] sm:$0xff]   ;;  %s376_s16 = scalar_select %p375_p13, %s10705_s24, 17 }
  0x19   : > { %v10031_v2 = vld [vmem:[%s13041_s3 + $0x38] sm:$0xff]   ;;  %8972 = vmatprep.subr.bf16.mxu1 %v10030_v1  ;;  %v10035_v6 = vld [vmem:[%s13041_s3 + $0x30] sm:$0xff]   ;;  %v10039_v10 = vld [vmem:[%s13041_s3 + $0x28] sm:$0xff]   ;;  %s10893_s9 = smul.u32 432, %s374_s12  ;;  %s13068_s13 = smov (!%p385_p0, %s382_s13), 17 }
  0x1a   : > { %v10032_v3 = vld [vmem:[%s13041_s3 + $0xb8] sm:$0xff]   ;;  %8945 = vmatpush3.bf16.msra.mxu0 %v10031_v2  ;;  %v10036_v7 = vld [vmem:[%s13041_s3 + $0xb0] sm:$0xff]   ;;  %v10040_v11 = vld [vmem:[%s13041_s3 + $0xa8] sm:$0xff]   ;;  %s9952_s17 = smul.u32 24, %s376_s16  ;;  %s8940_s12 = sshll.u32 %s10709_s25, 5 }
  0x1b   : > { %8973 = vmatpush3.bf16.msra.mxu1 %v10032_v3  ;;  %8946 = vmatprep.subr.bf16.mxu0 %v10033_v4  ;;  %v10041_v12 = vld [vmem:[%s13041_s3 + $0x60] sm:$0xff]   ;;  %v10045_v16 = vld [vmem:[%s13041_s3 + $0x58] sm:$0xff]   ;;  %v10049_v20 = vld [vmem:[%s13041_s3 + $0x50] sm:$0xff]   ;;  %s9954_s7 = smul.u32 24, %s13068_s13 }
  0x1c   : > { %8974 = vmatprep.subr.bf16.mxu1 %v10034_v5  ;;  %v10042_v13 = vld [vmem:[%s13041_s3 + $0xe0] sm:$0xff]   ;;  %v10046_v17 = vld [vmem:[%s13041_s3 + $0xd8] sm:$0xff]   ;;  %v10050_v21 = vld [vmem:[%s13041_s3 + $0xd0] sm:$0xff]   ;;  %s379_s16 = sadd.s32 %s10893_s9, %s9952_s17 }
  0x1d   : > { %v10043_v14 = vld [vmem:[%s13041_s3 + $0x20] sm:$0xff]   ;;  %v10047_v18 = vld [vmem:[%s13041_s3 + $0x18] sm:$0xff]   ;;  %v10051_v22 = vld [vmem:[%s13041_s3 + $0x10] sm:$0xff]   ;;  %s7285_s29 = sshll.u32 %s379_s16, 2  ;;  %s389_s13 = sadd.s32 %s9954_s7, %s10893_s9 }
  0x1e   : > { %8947 = vmatpush3.bf16.msra.mxu0 %v10035_v6  ;;  %v10044_v15 = vld [vmem:[%s13041_s3 + $0xa0] sm:$0xff]   ;;  %v10048_v19 = vld [vmem:[%s13041_s3 + $0x98] sm:$0xff]   ;;  %v10052_v23 = vld [vmem:[%s13041_s3 + $0x90] sm:$0xff]   ;;  %s10932_s20 = scalar_lea.vmem %s13038_s0, %s7285_s29  ;;  %s7286_s18 = sshll.u32 %s389_s13, 2 }
  0x1f   : > { %8975 = vmatpush3.bf16.msra.mxu1 %v10036_v7  ;;  %8948 = vmatprep.subr.bf16.mxu0 %v10037_v8  ;;  %v10053_v24 = vld [vmem:[%s13041_s3 + $0x48] sm:$0xff]   ;;  %v10057_v28 = vld [vmem:[%s13041_s3 + $0x40] sm:$0xff]   ;;  %v10061_v40 = vld [vmem:[%s13041_s3 + $0x178] sm:$0xff]   ;;  %s11607_s14 = scalar_lea.vmem %s13039_s1, %s7286_s18  ;;  %s370_s16 = sand.u32 1, %s10697_s22  }
  0x20   : > { %8976 = vmatprep.subr.bf16.mxu1 %v10038_v9  ;;  %v10054_v25 = vld [vmem:[%s13041_s3 + $0xc8] sm:$0xff]   ;;  %v10058_v29 = vld [vmem:[%s13041_s3 + $0xc0] sm:$0xff]   ;;  %v10062_v41 = vld [vmem:[%s13041_s3 + $0x1f8] sm:$0xff]   ;;  %s8939_s18 = sshll.u32 %s10705_s24, 1  ;;  %s7284_s17 = sshll.u32 %s370_s16, 4 }
  0x21   : > { %v10055_v26 = vld [vmem:[%s13041_s3 + $0x8] sm:$0xff]   ;;  %v10059_v30 = vld [vmem:[%s13041_s3] sm:$0xff]   ;;  %v10063_v42 = vld [vmem:[%s13041_s3 + $0x138] sm:$0xff]   ;;  %s7103_s8 = sadd.s32 %s8940_s12, %s8939_s18  ;;  %s10723_s18 = smov [#allocation2]  }
  0x22   : > { %8949 = vmatpush3.bf16.msra.mxu0 %v10039_v10  ;;  %v10056_v27 = vld [vmem:[%s13041_s3 + $0x88] sm:$0xff]   ;;  %v10060_v31 = vld [vmem:[%s13041_s3 + $0x80] sm:$0xff]   ;;  %v10064_v43 = vld [vmem:[%s13041_s3 + $0x1b8] sm:$0xff]   ;;  %s10633_s12 = sshll.u32 %s10723_s18, 4  ;;  %s10634_s12 = int_to_ptr.vmem [resolvable:$false] %s10633_s12 }
  0x23   : > { %8977 = vmatpush3.bf16.msra.mxu1 %v10040_v11  ;;  %8950 = vmatprep.subr.bf16.mxu0 %v10041_v12  ;;  %v415_v32 = vld [vmem:[%s10932_s20] sm:$0xff]  ;;  %v416_v34 = vld [vmem:[%s10932_s20 + $0x8] sm:$0xff]  ;;  %v10065_v44 = vld [vmem:[%s13041_s3 + $0x170] sm:$0xff]  }
  0x24   : > { %8978 = vmatprep.subr.bf16.mxu1 %v10042_v13  ;;  %v419_v33 = vld [vmem:[%s10932_s20 + $0x20] sm:$0xff]  ;;  %v420_v36 = vld [vmem:[%s10932_s20 + $0x28] sm:$0xff]  ;;  %v10066_v45 = vld [vmem:[%s13041_s3 + $0x1f0] sm:$0xff]  }
  0x25   : > { %v10943_v35 = vcombine.high %v415_v32, %v419_v33  ;;  %v10946_v37 = vcombine.low %v415_v32, %v419_v33  ;;  %v10948_v38 = vcombine.high %v416_v34, %v420_v36  ;;  %v10950_v39 = vcombine.low %v416_v34, %v420_v36  ;;  %v10067_v46 = vld [vmem:[%s13041_s3 + $0x130] sm:$0xff]   ;;  %v10069_v48 = vld [vmem:[%s13041_s3 + $0x168] sm:$0xff]   ;;  %v10073_v52 = vld [vmem:[%s13041_s3 + $0x160] sm:$0xff]  }
  0x26   : > { %8951 = vmatpush3.bf16.msra.mxu0 %v10043_v14  ;;  %v10068_v47 = vld [vmem:[%s13041_s3 + $0x1b0] sm:$0xff]   ;;  %v10070_v49 = vld [vmem:[%s13041_s3 + $0x1e8] sm:$0xff]   ;;  %v10074_v53 = vld [vmem:[%s13041_s3 + $0x1e0] sm:$0xff]  }
  0x27   : > { %8979 = vmatpush3.bf16.msra.mxu1 %v10044_v15  ;;  %8952 = vmatprep.subr.bf16.mxu0 %v10045_v16  ;;  %v10071_v50 = vld [vmem:[%s13041_s3 + $0x128] sm:$0xff]   ;;  %v10075_v54 = vld [vmem:[%s13041_s3 + $0x120] sm:$0xff]   ;;  %v10077_v56 = vld [vmem:[%s13041_s3 + $0x158] sm:$0xff]  }
  0x28   : > { %8980 = vmatprep.subr.bf16.mxu1 %v10046_v17  ;;  %1039 = vmatprep.mubr.bf16.mxu0 %v10943_v35  ;;  %v10072_v51 = vld [vmem:[%s13041_s3 + $0x1a8] sm:$0xff]   ;;  %v10076_v55 = vld [vmem:[%s13041_s3 + $0x1a0] sm:$0xff]   ;;  %v10078_v57 = vld [vmem:[%s13041_s3 + $0x1d8] sm:$0xff]  }
  0x29   : > { %1086 = vmatprep.mubr.bf16.mxu1 %v10948_v38  ;;  %v10079_v58 = vld [vmem:[%s13041_s3 + $0x118] sm:$0xff]   ;;  %v423_v60 = vld [vmem:[%s10932_s20 + $0x40] sm:$0x11]  ;;  %v424_v61 = vld [vmem:[%s10932_s20 + $0x48] sm:$0x11] }
  0x2a   : > { %8953 = vmatpush3.bf16.msra.mxu0 %v10047_v18  ;;  %v10080_v59 = vld [vmem:[%s13041_s3 + $0x198] sm:$0xff]   ;;  %v11018_v62 = vcombine.high %v423_v60, %v423_v60  ;;  %v11020_v63 = vcombine.low %v423_v60, %v423_v60  ;;  %v11022_v0 = vcombine.high %v424_v61, %v424_v61  ;;  %v10084_v1 = vld [vmem:[%s13041_s3 + $0x150] sm:$0xff]   ;;  %v11027_v2 = vcombine.low %v424_v61, %v424_v61  ;;  %v10089_v6 = vld [vmem:[%s13041_s3 + $0x148] sm:$0xff]  }
  0x2b   : > { %8981 = vmatpush3.bf16.msra.mxu1 %v10048_v19  ;;  %8954 = vmatprep.subr.bf16.mxu0 %v10049_v20  ;;  %v10085_v3 = vld [vmem:[%s13041_s3 + $0x1d0] sm:$0xff]   ;;  %v10090_v7 = vld [vmem:[%s13041_s3 + $0x1c8] sm:$0xff]   ;;  %v10093_v10 = vld [vmem:[%s13041_s3 + $0x140] sm:$0xff]  }
  0x2c   : > { %8982 = vmatprep.subr.bf16.mxu1 %v10050_v21  ;;  %v10087_v4 = vld [vmem:[%s13041_s3 + $0x110] sm:$0xff]   ;;  %v10091_v8 = vld [vmem:[%s13041_s3 + $0x108] sm:$0xff]   ;;  %v10094_v11 = vld [vmem:[%s13041_s3 + $0x1c0] sm:$0xff]  }
  0x2d   : > { %v10088_v5 = vld [vmem:[%s13041_s3 + $0x190] sm:$0xff]   ;;  %v10092_v9 = vld [vmem:[%s13041_s3 + $0x188] sm:$0xff]   ;;  %v10095_v12 = vld [vmem:[%s13041_s3 + $0x100] sm:$0xff]  }
  0x2e   : > { %8955 = vmatpush3.bf16.msra.mxu0 %v10051_v22  ;;  %v10096_v13 = vld [vmem:[%s13041_s3 + $0x180] sm:$0xff]   ;;  %v417_v14 = vld [vmem:[%s10932_s20 + $0x10] sm:$0xff]  ;;  %v418_v16 = vld [vmem:[%s10932_s20 + $0x18] sm:$0xff] }
  0x2f   : > { %8983 = vmatpush3.bf16.msra.mxu1 %v10052_v23  ;;  %8956 = vmatprep.subr.bf16.mxu0 %v10053_v24  ;;  %v421_v15 = vld [vmem:[%s10932_s20 + $0x30] sm:$0xff]  ;;  %v422_v19 = vld [vmem:[%s10932_s20 + $0x38] sm:$0xff]  ;;  %v10107_v32 = vld [vmem:[%s13041_s3 + $0x228] sm:$0xff]  }
  0x30   : > { %8984 = vmatprep.subr.bf16.mxu1 %v10054_v25  ;;  %v11069_v17 = vcombine.low %v417_v14, %v421_v15  ;;  %v11071_v18 = vcombine.high %v417_v14, %v421_v15  ;;  %v11074_v20 = vcombine.low %v418_v16, %v422_v19  ;;  %v11076_v21 = vcombine.high %v418_v16, %v422_v19  ;;  %v10097_v22 = vld [vmem:[%s13041_s3 + $0x278] sm:$0xff]   ;;  %v10108_v33 = vld [vmem:[%s13041_s3 + $0x2a8] sm:$0xff]   ;;  %v10109_v34 = vld [vmem:[%s13041_s3 + $0x260] sm:$0xff]  }
  0x31   : > { %v10098_v23 = vld [vmem:[%s13041_s3 + $0x2f8] sm:$0xff]   ;;  %v10110_v36 = vld [vmem:[%s13041_s3 + $0x2e0] sm:$0xff]   ;;  %v10143_v14 = vld [vmem:[%s13041_s3 + $0x328] sm:$0xff]  }
  0x32   : > { %8957 = vmatpush3.bf16.msra.mxu0 %v10055_v26  ;;  %v10099_v24 = vld [vmem:[%s13041_s3 + $0x238] sm:$0xff]   ;;  %v10101_v26 = vld [vmem:[%s13041_s3 + $0x270] sm:$0xff]   ;;  %v10129_v60 = vld [vmem:[%s13041_s3 + $0x240] sm:$0xff]  }
  0x33   : > { %8985 = vmatpush3.bf16.msra.mxu1 %v10056_v27  ;;  %8958 = vmatprep.subr.bf16.mxu0 %v10057_v28  ;;  %v10100_v25 = vld [vmem:[%s13041_s3 + $0x2b8] sm:$0xff]   ;;  %v10102_v27 = vld [vmem:[%s13041_s3 + $0x2f0] sm:$0xff]   ;;  %v10130_v61 = vld [vmem:[%s13041_s3 + $0x2c0] sm:$0xff]  }
  0x34   : > { %8986 = vmatprep.subr.bf16.mxu1 %v10058_v29  ;;  %v10103_v28 = vld [vmem:[%s13041_s3 + $0x230] sm:$0xff]   ;;  %v10144_v15 = vld [vmem:[%s13041_s3 + $0x3a8] sm:$0xff]   ;;  %v10145_v16 = vld [vmem:[%s13041_s3 + $0x360] sm:$0xff]  }
  0x35   : > { %v10104_v29 = vld [vmem:[%s13041_s3 + $0x2b0] sm:$0xff]   ;;  %v10146_v19 = vld [vmem:[%s13041_s3 + $0x3e0] sm:$0xff]  }
  0x36   : > { %8959 = vmatpush3.bf16.msra.mxu0 %v10059_v30  ;;  %v10105_v30 = vld [vmem:[%s13041_s3 + $0x268] sm:$0xff]  }
  0x37   : > { %8987 = vmatpush3.bf16.msra.mxu1 %v10060_v31  ;;  %9000 = vmatprep.subr.bf16.mxu0 %v10061_v40  ;;  %v10106_v31 = vld [vmem:[%s13041_s3 + $0x2e8] sm:$0xff]   ;;  %v10111_v40 = vld [vmem:[%s13041_s3 + $0x220] sm:$0xff]  }
  0x38   : > { %9028 = vmatprep.subr.bf16.mxu1 %v10062_v41  ;;  %v10112_v41 = vld [vmem:[%s13041_s3 + $0x2a0] sm:$0xff]  }
  0x39   : > { %1040 = vmatmul.mubr.bf16.vlgmr.msra.gmra.mxu0 %v10946_v37 }
  0x3a   : > { %1087 = vmatmul.mubr.bf16.vlgmr.msra.gmra.mxu1 %v10950_v39  ;;  %9001 = vmatpush3.bf16.msra.mxu0 %v10063_v42  ;;  %v10113_v42 = vld [vmem:[%s13041_s3 + $0x258] sm:$0xff]  }
  0x3b   : > { %9029 = vmatpush3.bf16.msra.mxu1 %v10064_v43  ;;  %9002 = vmatprep.subr.bf16.mxu0 %v10065_v44  ;;  %v10114_v43 = vld [vmem:[%s13041_s3 + $0x2d8] sm:$0xff]  }
  0x3c   : > { %9030 = vmatprep.subr.bf16.mxu1 %v10066_v45  ;;  %1047 = vmatprep.mubr.bf16.mxu0 %v11018_v62  ;;  %v10115_v44 = vld [vmem:[%s13041_s3 + $0x218] sm:$0xff]  }
  0x3d   : > { %1094 = vmatprep.mubr.bf16.mxu1 %v11022_v0  ;;  %v10116_v45 = vld [vmem:[%s13041_s3 + $0x298] sm:$0xff]  }
  0x3e   : > { %9003 = vmatpush3.bf16.msra.mxu0 %v10067_v46  ;;  %v425_v46 = vld [vmem:[%s10932_s20 + $0x50] sm:$0x11] }
  0x3f   : > { %9031 = vmatpush3.bf16.msra.mxu1 %v10068_v47  ;;  %9004 = vmatprep.subr.bf16.mxu0 %v10069_v48  ;;  %v426_v47 = vld [vmem:[%s10932_s20 + $0x58] sm:$0x11]  ;;  %v11144_v48 = vcombine.high %v425_v46, %v425_v46 }
  0x40   : > { %9032 = vmatprep.subr.bf16.mxu1 %v10070_v49  ;;  %v11146_v49 = vcombine.low %v425_v46, %v425_v46  ;;  %v10167_v46 = vld [vmem:[%s13041_s3 + $0x438] sm:$0xff]  }
  0x41   : > { %1048 = vmatmul.mubr.bf16.gmra.mxu0 %v11020_v63 }
  0x42   : > { %9005 = vmatpush3.bf16.msra.mxu0 %v10071_v50  ;;  %1095 = vmatmul.mubr.bf16.gmra.mxu1 %v11027_v2  ;;  %v11148_v50 = vcombine.high %v426_v47, %v426_v47 }
  0x43   : > { %9033 = vmatpush3.bf16.msra.mxu1 %v10072_v51  ;;  %9006 = vmatprep.subr.bf16.mxu0 %v10073_v52  ;;  %v10120_v51 = vld [vmem:[%s13041_s3 + $0x250] sm:$0xff]   ;;  %v11153_v52 = vcombine.low %v426_v47, %v426_v47  ;;  %v10168_v47 = vld [vmem:[%s13041_s3 + $0x4b8] sm:$0xff]  }
  0x44   : > { %9034 = vmatprep.subr.bf16.mxu1 %v10074_v53  ;;  %1133 = vmatprep.mubr.bf16.mxu0 %v11071_v18  ;;  %v10121_v53 = vld [vmem:[%s13041_s3 + $0x2d0] sm:$0xff]  }
  0x45   : > { %1180 = vmatprep.mubr.bf16.mxu1 %v11076_v21 }
  0x46   : > { %9007 = vmatpush3.bf16.msra.mxu0 %v10075_v54  ;;  %v10123_v54 = vld [vmem:[%s13041_s3 + $0x210] sm:$0xff]  }
  0x47   : > { %9035 = vmatpush3.bf16.msra.mxu1 %v10076_v55  ;;  %9008 = vmatprep.subr.bf16.mxu0 %v10077_v56  ;;  %v10124_v55 = vld [vmem:[%s13041_s3 + $0x290] sm:$0xff]   ;;  %v10125_v56 = vld [vmem:[%s13041_s3 + $0x248] sm:$0xff]  }
  0x48   : > { %9036 = vmatprep.subr.bf16.mxu1 %v10078_v57  ;;  %v10126_v57 = vld [vmem:[%s13041_s3 + $0x2c8] sm:$0xff]  }
  0x4a   : > { %9009 = vmatpush3.bf16.msra.mxu0 %v10079_v58  ;;  %v10127_v58 = vld [vmem:[%s13041_s3 + $0x208] sm:$0xff]  }
  0x4b   : > { %9037 = vmatpush3.bf16.msra.mxu1 %v10080_v59  ;;  %9010 = vmatprep.subr.bf16.mxu0 %v10084_v1  ;;  %v10128_v59 = vld [vmem:[%s13041_s3 + $0x288] sm:$0xff]   ;;  %v10131_v1 = vld [vmem:[%s13041_s3 + $0x200] sm:$0xff]  }
  0x4c   : > { %9038 = vmatprep.subr.bf16.mxu1 %v10085_v3  ;;  %v10132_v3 = vld [vmem:[%s13041_s3 + $0x280] sm:$0xff]  }
  0x4e   : > { %9011 = vmatpush3.bf16.msra.mxu0 %v10087_v4  ;;  %v10133_v4 = vld [vmem:[%s13041_s3 + $0x378] sm:$0xff]  }
  0x4f   : > { %9039 = vmatpush3.bf16.msra.mxu1 %v10088_v5  ;;  %9012 = vmatprep.subr.bf16.mxu0 %v10089_v6  ;;  %v10134_v5 = vld [vmem:[%s13041_s3 + $0x3f8] sm:$0xff]  }
  0x50   : > { %9040 = vmatprep.subr.bf16.mxu1 %v10090_v7  ;;  %v10135_v6 = vld [vmem:[%s13041_s3 + $0x338] sm:$0xff]  }
  0x51   : > { %v10136_v7 = vld [vmem:[%s13041_s3 + $0x3b8] sm:$0xff]  }
  0x52   : > { %9013 = vmatpush3.bf16.msra.mxu0 %v10091_v8  ;;  %v10137_v8 = vld [vmem:[%s13041_s3 + $0x370] sm:$0xff]  }
  0x53   : > { %9041 = vmatpush3.bf16.msra.mxu1 %v10092_v9  ;;  %9014 = vmatprep.subr.bf16.mxu0 %v10093_v10  ;;  %v10138_v9 = vld [vmem:[%s13041_s3 + $0x3f0] sm:$0xff]  }
  0x54   : > { %9042 = vmatprep.subr.bf16.mxu1 %v10094_v11  ;;  %v10139_v10 = vld [vmem:[%s13041_s3 + $0x330] sm:$0xff]  }
  0x55   : > { %v10140_v11 = vld [vmem:[%s13041_s3 + $0x3b0] sm:$0xff]  }
  0x56   : > { %9015 = vmatpush3.bf16.msra.mxu0 %v10095_v12  ;;  %v10141_v12 = vld [vmem:[%s13041_s3 + $0x368] sm:$0xff]  }
  0x57   : > { %9043 = vmatpush3.bf16.msra.mxu1 %v10096_v13  ;;  %9056 = vmatprep.subr.bf16.mxu0 %v10097_v22  ;;  %v10142_v13 = vld [vmem:[%s13041_s3 + $0x3e8] sm:$0xff]   ;;  %v10147_v22 = vld [vmem:[%s13041_s3 + $0x320] sm:$0xff]  }
  0x58   : > { %9084 = vmatprep.subr.bf16.mxu1 %v10098_v23  ;;  %v10148_v23 = vld [vmem:[%s13041_s3 + $0x3a0] sm:$0xff]  }
  0x59   : > { %1134 = vmatmul.mubr.bf16.vlgmr.msra.gmra.mxu0 %v11069_v17 }
  0x5a   : > { %1181 = vmatmul.mubr.bf16.vlgmr.msra.gmra.mxu1 %v11074_v20  ;;  %9057 = vmatpush3.bf16.msra.mxu0 %v10099_v24  ;;  %v10149_v24 = vld [vmem:[%s13041_s3 + $0x358] sm:$0xff]  }
  0x5b   : > { %9085 = vmatpush3.bf16.msra.mxu1 %v10100_v25  ;;  %9058 = vmatprep.subr.bf16.mxu0 %v10101_v26  ;;  %v10150_v25 = vld [vmem:[%s13041_s3 + $0x3d8] sm:$0xff]  }
  0x5c   : > { %9086 = vmatprep.subr.bf16.mxu1 %v10102_v27  ;;  %1141 = vmatprep.mubr.bf16.mxu0 %v11144_v48  ;;  %v10151_v26 = vld [vmem:[%s13041_s3 + $0x318] sm:$0xff]  }
  0x5d   : > { %1188 = vmatprep.mubr.bf16.mxu1 %v11148_v50  ;;  %v10152_v27 = vld [vmem:[%s13041_s3 + $0x398] sm:$0xff]  }
  0x5e   : > { %9059 = vmatpush3.bf16.msra.mxu0 %v10103_v28  ;;  %v10153_v28 = vld [vmem:[%s13041_s3 + $0x350] sm:$0xff]  }
  0x5f   : > { %9087 = vmatpush3.bf16.msra.mxu1 %v10104_v29  ;;  %9060 = vmatprep.subr.bf16.mxu0 %v10105_v30  ;;  %v10154_v29 = vld [vmem:[%s13041_s3 + $0x3d0] sm:$0xff]  }
  0x60   : > { %9088 = vmatprep.subr.bf16.mxu1 %v10106_v31  ;;  %v10155_v30 = vld [vmem:[%s13041_s3 + $0x310] sm:$0xff]  }
  0x61   : > { %1142 = vmatmul.mubr.bf16.gmra.mxu0 %v11146_v49  ;;  %v10156_v31 = vld [vmem:[%s13041_s3 + $0x390] sm:$0xff]  }
  0x62   : > { %9061 = vmatpush3.bf16.msra.mxu0 %v10107_v32  ;;  %1189 = vmatmul.mubr.bf16.gmra.mxu1 %v11153_v52  ;;  %v10157_v32 = vld [vmem:[%s13041_s3 + $0x348] sm:$0xff]  }
  0x63   : > { %9089 = vmatpush3.bf16.msra.mxu1 %v10108_v33  ;;  %9062 = vmatprep.subr.bf16.mxu0 %v10109_v34  ;;  %v10158_v33 = vld [vmem:[%s13041_s3 + $0x3c8] sm:$0xff]  }
  0x64   : > { %9090 = vmatprep.subr.bf16.mxu1 %v10110_v36  ;;  %1742 = vmatprep.mubr.bf16.mxu0 %v10943_v35  ;;  %v10159_v34 = vld [vmem:[%s13041_s3 + $0x308] sm:$0xff]  }
  0x65   : > { %1790 = vmatprep.mubr.bf16.mxu1 %v10948_v38  ;;  %v10160_v36 = vld [vmem:[%s13041_s3 + $0x388] sm:$0xff]  }
  0x66   : > { %9063 = vmatpush3.bf16.msra.mxu0 %v10111_v40  ;;  %v10161_v40 = vld [vmem:[%s13041_s3 + $0x340] sm:$0xff]  }
  0x67   : > { %9091 = vmatpush3.bf16.msra.mxu1 %v10112_v41  ;;  %9064 = vmatprep.subr.bf16.mxu0 %v10113_v42  ;;  %v10162_v41 = vld [vmem:[%s13041_s3 + $0x3c0] sm:$0xff]  }
  0x68   : > { %9092 = vmatprep.subr.bf16.mxu1 %v10114_v43  ;;  %v10163_v42 = vld [vmem:[%s13041_s3 + $0x300] sm:$0xff]  }
  0x69   : > { %v10164_v43 = vld [vmem:[%s13041_s3 + $0x380] sm:$0xff]  }
  0x6a   : > { %9065 = vmatpush3.bf16.msra.mxu0 %v10115_v44  ;;  %v10165_v44 = vld [vmem:[%s13041_s3 + $0x478] sm:$0xff]  }
  0x6b   : > { %9093 = vmatpush3.bf16.msra.mxu1 %v10116_v45  ;;  %9066 = vmatprep.subr.bf16.mxu0 %v10120_v51  ;;  %v10166_v45 = vld [vmem:[%s13041_s3 + $0x4f8] sm:$0xff]   ;;  %v10169_v51 = vld [vmem:[%s13041_s3 + $0x470] sm:$0xff]  }
  0x6c   : > { %9094 = vmatprep.subr.bf16.mxu1 %v10121_v53  ;;  %v10170_v53 = vld [vmem:[%s13041_s3 + $0x4f0] sm:$0xff]  }
  0x6e   : > { %9067 = vmatpush3.bf16.msra.mxu0 %v10123_v54  ;;  %v10171_v54 = vld [vmem:[%s13041_s3 + $0x430] sm:$0xff]  }
  0x6f   : > { %9095 = vmatpush3.bf16.msra.mxu1 %v10124_v55  ;;  %9068 = vmatprep.subr.bf16.mxu0 %v10125_v56  ;;  %v10172_v55 = vld [vmem:[%s13041_s3 + $0x4b0] sm:$0xff]   ;;  %v10173_v56 = vld [vmem:[%s13041_s3 + $0x468] sm:$0xff]  }
  0x70   : > { %9096 = vmatprep.subr.bf16.mxu1 %v10126_v57  ;;  %v10174_v57 = vld [vmem:[%s13041_s3 + $0x4e8] sm:$0xff]  }
  0x72   : > { %9069 = vmatpush3.bf16.msra.mxu0 %v10127_v58  ;;  %v10175_v58 = vld [vmem:[%s13041_s3 + $0x428] sm:$0xff]  }
  0x73   : > { %9097 = vmatpush3.bf16.msra.mxu1 %v10128_v59  ;;  %9070 = vmatprep.subr.bf16.mxu0 %v10129_v60  ;;  %v10176_v59 = vld [vmem:[%s13041_s3 + $0x4a8] sm:$0xff]   ;;  %v10177_v60 = vld [vmem:[%s13041_s3 + $0x460] sm:$0xff]  }
  0x74   : > { %9098 = vmatprep.subr.bf16.mxu1 %v10130_v61  ;;  %v10178_v61 = vld [vmem:[%s13041_s3 + $0x4e0] sm:$0xff]  }
  0x76   : > { %9071 = vmatpush3.bf16.msra.mxu0 %v10131_v1  ;;  %v10179_v1 = vld [vmem:[%s13041_s3 + $0x420] sm:$0xff]  }
  0x77   : > { %9099 = vmatpush3.bf16.msra.mxu1 %v10132_v3  ;;  %9112 = vmatprep.subr.bf16.mxu0 %v10133_v4  ;;  %v10180_v3 = vld [vmem:[%s13041_s3 + $0x4a0] sm:$0xff]   ;;  %v10181_v4 = vld [vmem:[%s13041_s3 + $0x458] sm:$0xff]  }
  0x78   : > { %9140 = vmatprep.subr.bf16.mxu1 %v10134_v5  ;;  %v10182_v5 = vld [vmem:[%s13041_s3 + $0x4d8] sm:$0xff]  }
  0x79   : > { %1743 = vmatmul.mubr.bf16.vlgmr.msra.gmra.mxu0 %v10946_v37 }
  0x7a   : > { %1791 = vmatmul.mubr.bf16.vlgmr.msra.gmra.mxu1 %v10950_v39  ;;  %9113 = vmatpush3.bf16.msra.mxu0 %v10135_v6  ;;  %v10185_v6 = vld [vmem:[%s13041_s3 + $0x450] sm:$0xff]  }
  0x7b   : > { %9141 = vmatpush3.bf16.msra.mxu1 %v10136_v7  ;;  %9114 = vmatprep.subr.bf16.mxu0 %v10137_v8  ;;  %v10186_v7 = vld [vmem:[%s13041_s3 + $0x4d0] sm:$0xff]  }
  0x7c   : > { %1750 = vmatprep.mubr.bf16.mxu0 %v11018_v62  ;;  %9142 = vmatprep.subr.bf16.mxu1 %v10138_v9  ;;  %v10187_v8 = vld [vmem:[%s13041_s3 + $0x410] sm:$0xff]  }
  0x7d   : > { %1798 = vmatprep.mubr.bf16.mxu1 %v11022_v0  ;;  %v10188_v9 = vld [vmem:[%s13041_s3 + $0x490] sm:$0xff]  }
  0x7e   : > { %9115 = vmatpush3.bf16.msra.mxu0 %v10139_v10  ;;  %v10189_v10 = vld [vmem:[%s13041_s3 + $0x448] sm:$0xff]  }
  0x7f   : > { %9143 = vmatpush3.bf16.msra.mxu1 %v10140_v11  ;;  %9116 = vmatprep.subr.bf16.mxu0 %v10141_v12  ;;  %v10190_v11 = vld [vmem:[%s13041_s3 + $0x4c8] sm:$0xff]  }
  0x80   : > { %9144 = vmatprep.subr.bf16.mxu1 %v10142_v13  ;;  %v10191_v12 = vld [vmem:[%s13041_s3 + $0x408] sm:$0xff]  }
  0x81   : > { %1751 = vmatmul.mubr.bf16.gmra.mxu0 %v11020_v63  ;;  %v10192_v13 = vld [vmem:[%s13041_s3 + $0x488] sm:$0xff]  }
  0x82   : > { %1799 = vmatmul.mubr.bf16.gmra.mxu1 %v11027_v2  ;;  %9117 = vmatpush3.bf16.msra.mxu0 %v10143_v14  ;;  %v10193_v14 = vld [vmem:[%s13041_s3 + $0x440] sm:$0xff]  }
  0x83   : > { %9145 = vmatpush3.bf16.msra.mxu1 %v10144_v15  ;;  %9118 = vmatprep.subr.bf16.mxu0 %v10145_v16  ;;  %v10194_v15 = vld [vmem:[%s13041_s3 + $0x4c0] sm:$0xff]  }
  0x84   : > { %1838 = vmatprep.mubr.bf16.mxu0 %v11071_v18  ;;  %9146 = vmatprep.subr.bf16.mxu1 %v10146_v19  ;;  %v10195_v16 = vld [vmem:[%s13041_s3 + $0x400] sm:$0xff]  }
  0x85   : > { %1886 = vmatprep.mubr.bf16.mxu1 %v11076_v21  ;;  %v10196_v19 = vld [vmem:[%s13041_s3 + $0x480] sm:$0xff]  }
  0x86   : > { %9119 = vmatpush3.bf16.msra.mxu0 %v10147_v22  ;;  %v10197_v22 = vld [vmem:[%s13041_s3 + $0x578] sm:$0xff]  }
  0x87   : > { %9147 = vmatpush3.bf16.msra.mxu1 %v10148_v23  ;;  %9120 = vmatprep.subr.bf16.mxu0 %v10149_v24  ;;  %v10198_v23 = vld [vmem:[%s13041_s3 + $0x5f8] sm:$0xff]  }
  0x88   : > { %9148 = vmatprep.subr.bf16.mxu1 %v10150_v25  ;;  %v10199_v24 = vld [vmem:[%s13041_s3 + $0x538] sm:$0xff]  }
  0x89   : > { %v10200_v25 = vld [vmem:[%s13041_s3 + $0x5b8] sm:$0xff]  }
  0x8a   : > { %9121 = vmatpush3.bf16.msra.mxu0 %v10151_v26  ;;  %v10201_v26 = vld [vmem:[%s13041_s3 + $0x570] sm:$0xff]  }
  0x8b   : > { %9149 = vmatpush3.bf16.msra.mxu1 %v10152_v27  ;;  %9122 = vmatprep.subr.bf16.mxu0 %v10153_v28  ;;  %v10202_v27 = vld [vmem:[%s13041_s3 + $0x5f0] sm:$0xff]  }
  0x8c   : > { %9150 = vmatprep.subr.bf16.mxu1 %v10154_v29  ;;  %v10203_v28 = vld [vmem:[%s13041_s3 + $0x530] sm:$0xff]   ;;  %v10206_v29 = vld [vmem:[%s13041_s3 + $0x5e8] sm:$0xff]  }
  0x8e   : > { %9123 = vmatpush3.bf16.msra.mxu0 %v10155_v30  ;;  %v10209_v30 = vld [vmem:[%s13041_s3 + $0x560] sm:$0xff]  }
  0x8f   : > { %9151 = vmatpush3.bf16.msra.mxu1 %v10156_v31  ;;  %9124 = vmatprep.subr.bf16.mxu0 %v10157_v32  ;;  %v10210_v31 = vld [vmem:[%s13041_s3 + $0x5e0] sm:$0xff]  }
  0x90   : > { %9152 = vmatprep.subr.bf16.mxu1 %v10158_v33  ;;  %v10211_v32 = vld [vmem:[%s13041_s3 + $0x520] sm:$0xff]   ;;  %v10214_v33 = vld [vmem:[%s13041_s3 + $0x5d8] sm:$0xff]  }
  0x92   : > { %9125 = vmatpush3.bf16.msra.mxu0 %v10159_v34  ;;  %v10217_v34 = vld [vmem:[%s13041_s3 + $0x550] sm:$0xff]  }
  0x93   : > { %9153 = vmatpush3.bf16.msra.mxu1 %v10160_v36  ;;  %9126 = vmatprep.subr.bf16.mxu0 %v10161_v40  ;;  %v10218_v36 = vld [vmem:[%s13041_s3 + $0x5d0] sm:$0xff]  }
  0x94   : > { %9154 = vmatprep.subr.bf16.mxu1 %v10162_v41  ;;  %v10219_v40 = vld [vmem:[%s13041_s3 + $0x510] sm:$0xff]  }
  0x95   : > { %v10220_v41 = vld [vmem:[%s13041_s3 + $0x590] sm:$0xff]  }
  0x96   : > { %9127 = vmatpush3.bf16.msra.mxu0 %v10163_v42  ;;  %v10221_v42 = vld [vmem:[%s13041_s3 + $0x548] sm:$0xff]  }
  0x97   : > { %9155 = vmatpush3.bf16.msra.mxu1 %v10164_v43  ;;  %9168 = vmatprep.subr.bf16.mxu0 %v10165_v44  ;;  %v10222_v43 = vld [vmem:[%s13041_s3 + $0x5c8] sm:$0xff]  }
  0x98   : > { %9196 = vmatprep.subr.bf16.mxu1 %v10166_v45  ;;  %v10223_v44 = vld [vmem:[%s13041_s3 + $0x508] sm:$0xff]  }
  0x99   : > { %1839 = vmatmul.mubr.bf16.vlgmr.msra.gmra.mxu0 %v11069_v17  ;;  %v10224_v45 = vld [vmem:[%s13041_s3 + $0x588] sm:$0xff]  }
  0x9a   : > { %1887 = vmatmul.mubr.bf16.vlgmr.msra.gmra.mxu1 %v11074_v20  ;;  %9169 = vmatpush3.bf16.msra.mxu0 %v10167_v46  ;;  %v10225_v46 = vld [vmem:[%s13041_s3 + $0x540] sm:$0xff]  }
  0x9b   : > { %9197 = vmatpush3.bf16.msra.mxu1 %v10168_v47  ;;  %9170 = vmatprep.subr.bf16.mxu0 %v10169_v51  ;;  %v10226_v47 = vld [vmem:[%s13041_s3 + $0x5c0] sm:$0xff]  }
  0x9c   : > { %1846 = vmatprep.mubr.bf16.mxu0 %v11144_v48  ;;  %9198 = vmatprep.subr.bf16.mxu1 %v10170_v53  ;;  %v10227_v51 = vld [vmem:[%s13041_s3 + $0x500] sm:$0xff]  }
  0x9d   : > { %1894 = vmatprep.mubr.bf16.mxu1 %v11148_v50  ;;  %v10228_v53 = vld [vmem:[%s13041_s3 + $0x580] sm:$0xff]  }
  0x9e   : > { %9171 = vmatpush3.bf16.msra.mxu0 %v10171_v54  ;;  %v10229_v54 = vld [vmem:[%s13041_s3 + $0x678] sm:$0xff]  }
  0x9f   : > { %9199 = vmatpush3.bf16.msra.mxu1 %v10172_v55  ;;  %9172 = vmatprep.subr.bf16.mxu0 %v10173_v56  ;;  %v10230_v55 = vld [vmem:[%s13041_s3 + $0x6f8] sm:$0xff]  }
  0xa0   : > { %9200 = vmatprep.subr.bf16.mxu1 %v10174_v57  ;;  %v10231_v56 = vld [vmem:[%s13041_s3 + $0x638] sm:$0xff]  }
  0xa1   : > { %1847 = vmatmul.mubr.bf16.gmra.mxu0 %v11146_v49  ;;  %v10232_v57 = vld [vmem:[%s13041_s3 + $0x6b8] sm:$0xff]  }
  0xa2   : > { %1895 = vmatmul.mubr.bf16.gmra.mxu1 %v11153_v52  ;;  %9173 = vmatpush3.bf16.msra.mxu0 %v10175_v58  ;;  %v10233_v58 = vld [vmem:[%s13041_s3 + $0x670] sm:$0xff]  }
  0xa3   : > { %9201 = vmatpush3.bf16.msra.mxu1 %v10176_v59  ;;  %9174 = vmatprep.subr.bf16.mxu0 %v10177_v60  ;;  %v10234_v59 = vld [vmem:[%s13041_s3 + $0x6f0] sm:$0xff]  }
  0xa4   : > { %2460 = vmatprep.mubr.bf16.mxu0 %v10943_v35  ;;  %9202 = vmatprep.subr.bf16.mxu1 %v10178_v61  ;;  %v10183_v35 = vld [vmem:[%s13041_s3 + $0x418] sm:$0xff]   ;;  %v10235_v60 = vld [vmem:[%s13041_s3 + $0x630] sm:$0xff]   ;;  %v10238_v61 = vld [vmem:[%s13041_s3 + $0x6e8] sm:$0xff]  }
  0xa5   : > { %2508 = vmatprep.mubr.bf16.mxu1 %v10948_v38  ;;  %v10184_v38 = vld [vmem:[%s13041_s3 + $0x498] sm:$0xff]  }
  0xa6   : > { %9175 = vmatpush3.bf16.msra.mxu0 %v10179_v1  ;;  %v10241_v1 = vld [vmem:[%s13041_s3 + $0x660] sm:$0xff]  }
  0xa7   : > { %9203 = vmatpush3.bf16.msra.mxu1 %v10180_v3  ;;  %9176 = vmatprep.subr.bf16.mxu0 %v10181_v4  ;;  %v10242_v3 = vld [vmem:[%s13041_s3 + $0x6e0] sm:$0xff]  }
  0xa8   : > { %9204 = vmatprep.subr.bf16.mxu1 %v10182_v5  ;;  %v10243_v4 = vld [vmem:[%s13041_s3 + $0x620] sm:$0xff]   ;;  %v10246_v5 = vld [vmem:[%s13041_s3 + $0x6d8] sm:$0xff]  }
  0xaa   : > { %9177 = vmatpush3.bf16.msra.mxu0 %v10183_v35  ;;  %v10247_v35 = vld [vmem:[%s13041_s3 + $0x618] sm:$0xff]  }
  0xab   : > { %9205 = vmatpush3.bf16.msra.mxu1 %v10184_v38  ;;  %9178 = vmatprep.subr.bf16.mxu0 %v10185_v6  ;;  %v10248_v38 = vld [vmem:[%s13041_s3 + $0x698] sm:$0xff]   ;;  %v10249_v6 = vld [vmem:[%s13041_s3 + $0x650] sm:$0xff]  }
  0xac   : > { %9206 = vmatprep.subr.bf16.mxu1 %v10186_v7  ;;  %v10250_v7 = vld [vmem:[%s13041_s3 + $0x6d0] sm:$0xff]  }
  0xae   : > { %9179 = vmatpush3.bf16.msra.mxu0 %v10187_v8  ;;  %v10251_v8 = vld [vmem:[%s13041_s3 + $0x610] sm:$0xff]  }
  0xaf   : > { %9207 = vmatpush3.bf16.msra.mxu1 %v10188_v9  ;;  %9180 = vmatprep.subr.bf16.mxu0 %v10189_v10  ;;  %v10252_v9 = vld [vmem:[%s13041_s3 + $0x690] sm:$0xff]   ;;  %v10253_v10 = vld [vmem:[%s13041_s3 + $0x648] sm:$0xff]  }
  0xb0   : > { %9208 = vmatprep.subr.bf16.mxu1 %v10190_v11  ;;  %v10254_v11 = vld [vmem:[%s13041_s3 + $0x6c8] sm:$0xff]  }
  0xb2   : > { %9181 = vmatpush3.bf16.msra.mxu0 %v10191_v12  ;;  %v10255_v12 = vld [vmem:[%s13041_s3 + $0x608] sm:$0xff]  }
  0xb3   : > { %9209 = vmatpush3.bf16.msra.mxu1 %v10192_v13  ;;  %9182 = vmatprep.subr.bf16.mxu0 %v10193_v14  ;;  %v10256_v13 = vld [vmem:[%s13041_s3 + $0x688] sm:$0xff]   ;;  %v10257_v14 = vld [vmem:[%s13041_s3 + $0x640] sm:$0xff]  }
  0xb4   : > { %9210 = vmatprep.subr.bf16.mxu1 %v10194_v15  ;;  %v10258_v15 = vld [vmem:[%s13041_s3 + $0x6c0] sm:$0xff]  }
  0xb6   : > { %9183 = vmatpush3.bf16.msra.mxu0 %v10195_v16  ;;  %v10259_v16 = vld [vmem:[%s13041_s3 + $0x600] sm:$0xff]  }
  0xb7   : > { %9211 = vmatpush3.bf16.msra.mxu1 %v10196_v19  ;;  %9224 = vmatprep.subr.bf16.mxu0 %v10197_v22  ;;  %v10260_v19 = vld [vmem:[%s13041_s3 + $0x680] sm:$0xff]  }
  0xb8   : > { %9252 = vmatprep.subr.bf16.mxu1 %v10198_v23  ;;  %v2633_v22 = vld [vmem:[%s11607_s14] sm:$0xff] }
  0xb9   : > { %2461 = vmatmul.mubr.bf16.vlgmr.msra.gmra.mxu0 %v10946_v37  ;;  %v10204_v37 = vld [vmem:[%s13041_s3 + $0x5b0] sm:$0xff]   ;;  %v2637_v23 = vld [vmem:[%s11607_s14 + $0x20] sm:$0xff] }
  0xba   : > { %2509 = vmatmul.mubr.bf16.vlgmr.msra.gmra.mxu1 %v10950_v39  ;;  %9225 = vmatpush3.bf16.msra.mxu0 %v10199_v24  ;;  %v10205_v39 = vld [vmem:[%s13041_s3 + $0x568] sm:$0xff]  }
  0xbb   : > { %9253 = vmatpush3.bf16.msra.mxu1 %v10200_v25  ;;  %9226 = vmatprep.subr.bf16.mxu0 %v10201_v26  ;;  %v2634_v24 = vld [vmem:[%s11607_s14 + $0x8] sm:$0xff]  ;;  %v11618_v26 = vcombine.low %v2633_v22, %v2637_v23 }
  0xbc   : > { %2468 = vmatprep.mubr.bf16.mxu0 %v11018_v62  ;;  %9254 = vmatprep.subr.bf16.mxu1 %v10202_v27  ;;  %v10207_v62 = vld [vmem:[%s13041_s3 + $0x528] sm:$0xff]   ;;  %v11620_v27 = vcombine.high %v2633_v22, %v2637_v23  ;;  %v10293_v22 = vld [vmem:[%s13041_s3 + $0x740] sm:$0xff]  }
  0xbd   : > { %2516 = vmatprep.mubr.bf16.mxu1 %v11022_v0  ;;  %v10208_v0 = vld [vmem:[%s13041_s3 + $0x5a8] sm:$0xff]   ;;  %v10294_v23 = vld [vmem:[%s13041_s3 + $0x7c0] sm:$0xff]  }
  0xbe   : > { %9227 = vmatpush3.bf16.msra.mxu0 %v10203_v28  ;;  %v2638_v28 = vld [vmem:[%s11607_s14 + $0x28] sm:$0xff] }
  0xbf   : > { %9255 = vmatpush3.bf16.msra.mxu1 %v10204_v37  ;;  %9228 = vmatprep.subr.bf16.mxu0 %v10205_v39  ;;  %v11623_v39 = vcombine.low %v2634_v24, %v2638_v28 }
  0xc0   : > { %9256 = vmatprep.subr.bf16.mxu1 %v10206_v29  ;;  %v11625_v29 = vcombine.high %v2634_v24, %v2638_v28  ;;  %v10295_v24 = vld [vmem:[%s13041_s3 + $0x700] sm:$0xff]   ;;  %v2635_v28 = vld [vmem:[%s11607_s14 + $0x10] sm:$0xff] }
  0xc1   : > { %2469 = vmatmul.mubr.bf16.gmra.mxu0 %v11020_v63  ;;  %v10212_v63 = vld [vmem:[%s13041_s3 + $0x5a0] sm:$0xff]  }
  0xc2   : > { %2517 = vmatmul.mubr.bf16.gmra.mxu1 %v11027_v2  ;;  %9229 = vmatpush3.bf16.msra.mxu0 %v10207_v62  ;;  %v10213_v2 = vld [vmem:[%s13041_s3 + $0x558] sm:$0xff]  }
  0xc3   : > { %9257 = vmatpush3.bf16.msra.mxu1 %v10208_v0  ;;  %9230 = vmatprep.subr.bf16.mxu0 %v10209_v30  ;;  %v10261_v62 = vld [vmem:[%s13041_s3 + $0x778] sm:$0xff]  }
  0xc4   : > { %2556 = vmatprep.mubr.bf16.mxu0 %v11071_v18  ;;  %9258 = vmatprep.subr.bf16.mxu1 %v10210_v31  ;;  %v10215_v18 = vld [vmem:[%s13041_s3 + $0x518] sm:$0xff]  }
  0xc5   : > { %2604 = vmatprep.mubr.bf16.mxu1 %v11076_v21  ;;  %v10216_v21 = vld [vmem:[%s13041_s3 + $0x598] sm:$0xff]  }
  0xc6   : > { %9231 = vmatpush3.bf16.msra.mxu0 %v10211_v32  ;;  %v10262_v30 = vld [vmem:[%s13041_s3 + $0x7f8] sm:$0xff]  }
  0xc7   : > { %9259 = vmatpush3.bf16.msra.mxu1 %v10212_v63  ;;  %9232 = vmatprep.subr.bf16.mxu0 %v10213_v2  ;;  %v10263_v63 = vld [vmem:[%s13041_s3 + $0x738] sm:$0xff]  }
  0xc8   : > { %9260 = vmatprep.subr.bf16.mxu1 %v10214_v33 }
  0xca   : > { %9233 = vmatpush3.bf16.msra.mxu0 %v10215_v18  ;;  %v10264_v18 = vld [vmem:[%s13041_s3 + $0x7b8] sm:$0xff]  }
  0xcb   : > { %9261 = vmatpush3.bf16.msra.mxu1 %v10216_v21  ;;  %9234 = vmatprep.subr.bf16.mxu0 %v10217_v34 }
  0xcc   : > { %9262 = vmatprep.subr.bf16.mxu1 %v10218_v36  ;;  %v10265_v36 = vld [vmem:[%s13041_s3 + $0x770] sm:$0xff]  }
  0xce   : > { %9235 = vmatpush3.bf16.msra.mxu0 %v10219_v40 }
  0xcf   : > { %9263 = vmatpush3.bf16.msra.mxu1 %v10220_v41  ;;  %9236 = vmatprep.subr.bf16.mxu0 %v10221_v42  ;;  %v10266_v41 = vld [vmem:[%s13041_s3 + $0x7f0] sm:$0xff]  }
  0xd0   : > { %9264 = vmatprep.subr.bf16.mxu1 %v10222_v43 }
  0xd2   : > { %9237 = vmatpush3.bf16.msra.mxu0 %v10223_v44  ;;  %v10267_v44 = vld [vmem:[%s13041_s3 + $0x730] sm:$0xff]  }
  0xd3   : > { %9265 = vmatpush3.bf16.msra.mxu1 %v10224_v45  ;;  %9238 = vmatprep.subr.bf16.mxu0 %v10225_v46  ;;  %v10268_v46 = vld [vmem:[%s13041_s3 + $0x7b0] sm:$0xff]  }
  0xd4   : > { %9266 = vmatprep.subr.bf16.mxu1 %v10226_v47 }
  0xd6   : > { %9239 = vmatpush3.bf16.msra.mxu0 %v10227_v51  ;;  %v10269_v51 = vld [vmem:[%s13041_s3 + $0x768] sm:$0xff]  }
  0xd7   : > { %9267 = vmatpush3.bf16.msra.mxu1 %v10228_v53  ;;  %9280 = vmatprep.subr.bf16.mxu0 %v10229_v54  ;;  %v10270_v53 = vld [vmem:[%s13041_s3 + $0x7e8] sm:$0xff]  }
  0xd8   : > { %9308 = vmatprep.subr.bf16.mxu1 %v10230_v55  ;;  %v10271_v54 = vld [vmem:[%s13041_s3 + $0x728] sm:$0xff]  }
  0xd9   : > { %2557 = vmatmul.mubr.bf16.vlgmr.msra.gmra.mxu0 %v11069_v17  ;;  %v10236_v17 = vld [vmem:[%s13041_s3 + $0x6b0] sm:$0xff]   ;;  %v10272_v55 = vld [vmem:[%s13041_s3 + $0x7a8] sm:$0xff]  }
  0xda   : > { %2605 = vmatmul.mubr.bf16.vlgmr.msra.gmra.mxu1 %v11074_v20  ;;  %9281 = vmatpush3.bf16.msra.mxu0 %v10231_v56  ;;  %v10237_v20 = vld [vmem:[%s13041_s3 + $0x668] sm:$0xff]   ;;  %v10273_v56 = vld [vmem:[%s13041_s3 + $0x760] sm:$0xff]  }
  0xdb   : > { %9309 = vmatpush3.bf16.msra.mxu1 %v10232_v57  ;;  %9282 = vmatprep.subr.bf16.mxu0 %v10233_v58  ;;  %v10274_v57 = vld [vmem:[%s13041_s3 + $0x7e0] sm:$0xff]  }
  0xdc   : > { %2564 = vmatprep.mubr.bf16.mxu0 %v11144_v48  ;;  %9310 = vmatprep.subr.bf16.mxu1 %v10234_v59  ;;  %v10239_v48 = vld [vmem:[%s13041_s3 + $0x628] sm:$0xff]   ;;  %v10275_v58 = vld [vmem:[%s13041_s3 + $0x720] sm:$0xff]  }
  0xdd   : > { %2612 = vmatprep.mubr.bf16.mxu1 %v11148_v50  ;;  %v10240_v50 = vld [vmem:[%s13041_s3 + $0x6a8] sm:$0xff]   ;;  %v10276_v59 = vld [vmem:[%s13041_s3 + $0x7a0] sm:$0xff]  }
  0xde   : > { %9283 = vmatpush3.bf16.msra.mxu0 %v10235_v60  ;;  %v10277_v60 = vld [vmem:[%s13041_s3 + $0x758] sm:$0xff]  }
  0xdf   : > { %9311 = vmatpush3.bf16.msra.mxu1 %v10236_v17  ;;  %9284 = vmatprep.subr.bf16.mxu0 %v10237_v20  ;;  %v10278_v17 = vld [vmem:[%s13041_s3 + $0x7d8] sm:$0xff]  }
  0xe0   : > { %9312 = vmatprep.subr.bf16.mxu1 %v10238_v61  ;;  %v10279_v20 = vld [vmem:[%s13041_s3 + $0x718] sm:$0xff]  }
  0xe1   : > { %2565 = vmatmul.mubr.bf16.gmra.mxu0 %v11146_v49  ;;  %v10244_v49 = vld [vmem:[%s13041_s3 + $0x6a0] sm:$0xff]   ;;  %v10280_v61 = vld [vmem:[%s13041_s3 + $0x798] sm:$0xff]  }
  0xe2   : > { %2613 = vmatmul.mubr.bf16.gmra.mxu1 %v11153_v52  ;;  %9285 = vmatpush3.bf16.msra.mxu0 %v10239_v48  ;;  %v10245_v52 = vld [vmem:[%s13041_s3 + $0x658] sm:$0xff]   ;;  %v2641_v48 = vld [vmem:[%s11607_s14 + $0x40] sm:$0x11] }
  0xe3   : > { %9313 = vmatpush3.bf16.msra.mxu1 %v10240_v50  ;;  %9286 = vmatprep.subr.bf16.mxu0 %v10241_v1  ;;  %v2642_v1 = vld [vmem:[%s11607_s14 + $0x48] sm:$0x11] }
  0xe4   : > { %9314 = vmatprep.subr.bf16.mxu1 %v10242_v3  ;;  %3258 = vmatprep.mubr.bf16.mxu0 %v11620_v27  ;;  %v11697_v3 = vcombine.high %v2641_v48, %v2641_v48 }
  0xe5   : > { %3305 = vmatprep.mubr.bf16.mxu1 %v11625_v29 }
  0xe6   : > { %9287 = vmatpush3.bf16.msra.mxu0 %v10243_v4  ;;  %v11699_v4 = vcombine.low %v2641_v48, %v2641_v48  ;;  %v10306_v48 = vld [vmem:[%s13041_s3 + $0x8e8] sm:$0xff]  }
  0xe7   : > { %9315 = vmatpush3.bf16.msra.mxu1 %v10244_v49  ;;  %9288 = vmatprep.subr.bf16.mxu0 %v10245_v52  ;;  %v11701_v49 = vcombine.high %v2642_v1, %v2642_v1  ;;  %v10284_v52 = vld [vmem:[%s13041_s3 + $0x750] sm:$0xff]  }
  0xe8   : > { %9316 = vmatprep.subr.bf16.mxu1 %v10246_v5 }
  0xea   : > { %9289 = vmatpush3.bf16.msra.mxu0 %v10247_v35  ;;  %v11706_v35 = vcombine.low %v2642_v1, %v2642_v1  ;;  %v10309_v1 = vld [vmem:[%s13041_s3 + $0x860] sm:$0xff]  }
  0xeb   : > { %9317 = vmatpush3.bf16.msra.mxu1 %v10248_v38  ;;  %9290 = vmatprep.subr.bf16.mxu0 %v10249_v6  ;;  %v10285_v38 = vld [vmem:[%s13041_s3 + $0x7d0] sm:$0xff]  }
  0xec   : > { %9318 = vmatprep.subr.bf16.mxu1 %v10250_v7  ;;  %v10287_v7 = vld [vmem:[%s13041_s3 + $0x710] sm:$0xff]  }
  0xee   : > { %9291 = vmatpush3.bf16.msra.mxu0 %v10251_v8 }
  0xef   : > { %9319 = vmatpush3.bf16.msra.mxu1 %v10252_v9  ;;  %9292 = vmatprep.subr.bf16.mxu0 %v10253_v10  ;;  %v10288_v9 = vld [vmem:[%s13041_s3 + $0x790] sm:$0xff]  }
  0xf0   : > { %9320 = vmatprep.subr.bf16.mxu1 %v10254_v11  ;;  %v10289_v11 = vld [vmem:[%s13041_s3 + $0x748] sm:$0xff]  }
  0xf2   : > { %9293 = vmatpush3.bf16.msra.mxu0 %v10255_v12 }
  0xf3   : > { %9321 = vmatpush3.bf16.msra.mxu1 %v10256_v13  ;;  %9294 = vmatprep.subr.bf16.mxu0 %v10257_v14  ;;  %v10290_v13 = vld [vmem:[%s13041_s3 + $0x7c8] sm:$0xff]  }
  0xf4   : > { %9322 = vmatprep.subr.bf16.mxu1 %v10258_v15  ;;  %v10291_v15 = vld [vmem:[%s13041_s3 + $0x708] sm:$0xff]  }
  0xf6   : > { %9295 = vmatpush3.bf16.msra.mxu0 %v10259_v16 }
  0xf7   : > { %9323 = vmatpush3.bf16.msra.mxu1 %v10260_v19  ;;  %9336 = vmatprep.subr.bf16.mxu0 %v10261_v62  ;;  %v10292_v19 = vld [vmem:[%s13041_s3 + $0x788] sm:$0xff]   ;;  %v2636_v62 = vld [vmem:[%s11607_s14 + $0x18] sm:$0xff] }
  0xf8   : > { %9364 = vmatprep.subr.bf16.mxu1 %v10262_v30 }
  0xf9   : > { %v8960_v25 = vpop.f32.mrf.mxu0  ;;  %3259 = vmatmul.mubr.bf16.vlgmr.msra.gmra.mxu0 %v11618_v26 }
  0xfa   : > { %v8988_v37 = vpop.f32.mrf.mxu1  ;;  %3306 = vmatmul.mubr.bf16.vlgmr.msra.gmra.mxu1 %v11623_v39  ;;  %9337 = vmatpush3.bf16.msra.mxu0 %v10263_v63 }
  0xfb   : > { %v8961_v0 = vpop.f32.mrf.mxu0  ;;  %9365 = vmatpush3.bf16.msra.mxu1 %v10264_v18  ;;  %9338 = vmatprep.subr.bf16.mxu0 %v10265_v36  ;;  %v10297_v18 = vld [vmem:[%s13041_s3 + $0x878] sm:$0xff]  }
  0xfc   : > { %v8962_v31 = vadd.f32 %v8961_v0, %v8960_v25  ;;  %v8989_v32 = vpop.f32.mrf.mxu1  ;;  %9366 = vmatprep.subr.bf16.mxu1 %v10266_v41  ;;  %3266 = vmatprep.mubr.bf16.mxu0 %v11697_v3  ;;  %v10296_v25 = vld [vmem:[%s13041_s3 + $0x780] sm:$0xff]   ;;  %v10298_v36 = vld [vmem:[%s13041_s3 + $0x8f8] sm:$0xff]  }
  0xfd   : > { %v8990_v2 = vadd.f32 %v8989_v32, %v8988_v37  ;;  %v8963_v33 = vpop.f32.mrf.mxu0  ;;  %3313 = vmatprep.mubr.bf16.mxu1 %v11701_v49  ;;  %v2639_v37 = vld [vmem:[%s11607_s14 + $0x30] sm:$0xff]  ;;  %v2640_v32 = vld [vmem:[%s11607_s14 + $0x38] sm:$0xff] }
  0xfe   : > { %v8991_v21 = vpop.f32.mrf.mxu1  ;;  %9339 = vmatpush3.bf16.msra.mxu0 %v10267_v44  ;;  %v11748_v30 = vcombine.low %v2635_v28, %v2639_v37 }
  0xff   : > { %v11643_v34 = vadd.f32 %v8990_v2, %v8962_v31  ;;  %v8964_v40 = vpop.f32.mrf.mxu0  ;;  %9367 = vmatpush3.bf16.msra.mxu1 %v10268_v46  ;;  %9340 = vmatprep.subr.bf16.mxu0 %v10269_v51  ;;  %v11750_v31 = vcombine.high %v2635_v28, %v2639_v37  ;;  %v11753_v2 = vcombine.low %v2636_v62, %v2640_v32  ;;  %v10324_v37 = vld [vmem:[%s13041_s3 + $0x890] sm:$0xff]  }
 0x100   : > { %v8965_v42 = vadd.f32 %v8964_v40, %v8963_v33  ;;  %v8992_v43 = vpop.f32.mrf.mxu1  ;;  %9368 = vmatprep.subr.bf16.mxu1 %v10270_v53  ;;  %v11755_v33 = vcombine.high %v2636_v62, %v2640_v32  ;;  %v10301_v53 = vld [vmem:[%s13041_s3 + $0x870] sm:$0xff]  }
 0x101   : > { %v8993_v45 = vadd.f32 %v8992_v43, %v8991_v21  ;;  %v8966_v50 = vpop.f32.mrf.mxu0  ;;  %3267 = vmatmul.mubr.bf16.gmra.mxu0 %v11699_v4 }
 0x102   : > { %9341 = vmatpush3.bf16.msra.mxu0 %v10271_v54  ;;  %v8994_v5 = vpop.f32.mrf.mxu1  ;;  %3314 = vmatmul.mubr.bf16.gmra.mxu1 %v11706_v35  ;;  %v10307_v50 = vld [vmem:[%s13041_s3 + $0x828] sm:$0xff]  }
 0x103   : > { %v11657_v47 = vadd.f32 %v8993_v45, %v8965_v42  ;;  %9369 = vmatpush3.bf16.msra.mxu1 %v10272_v55  ;;  %9342 = vmatprep.subr.bf16.mxu0 %v10273_v56  ;;  %v8967_v6 = vpop.f32.mrf.mxu0  ;;  %v10299_v42 = vld [vmem:[%s13041_s3 + $0x838] sm:$0xff]   ;;  %v10302_v56 = vld [vmem:[%s13041_s3 + $0x8f0] sm:$0xff]   ;;  %v10311_v5 = vld [vmem:[%s13041_s3 + $0x820] sm:$0xff]  }
 0x104   : > { %9370 = vmatprep.subr.bf16.mxu1 %v10274_v57  ;;  %v8995_v8 = vpop.f32.mrf.mxu1  ;;  %3352 = vmatprep.mubr.bf16.mxu0 %v11750_v31  ;;  %v10300_v45 = vld [vmem:[%s13041_s3 + $0x8b8] sm:$0xff]  }
 0x105   : > { %v8969_v10 = vpop.f32.mrf.mxu0  ;;  %3399 = vmatprep.mubr.bf16.mxu1 %v11755_v33  ;;  %v10313_v6 = vld [vmem:[%s13041_s3 + $0x858] sm:$0xff]  }
 0x106   : > { %9343 = vmatpush3.bf16.msra.mxu0 %v10275_v58  ;;  %v8997_v12 = vpop.f32.mrf.mxu1  ;;  %v10315_v8 = vld [vmem:[%s13041_s3 + $0x818] sm:$0xff]   ;;  %v2643_v10 = vld [vmem:[%s11607_s14 + $0x50] sm:$0x11] }
 0x107   : > { %9371 = vmatpush3.bf16.msra.mxu1 %v10276_v59  ;;  %9344 = vmatprep.subr.bf16.mxu0 %v10277_v60  ;;  %v8970_v14 = vpop.f32.mrf.mxu0  ;;  %v10304_v59 = vld [vmem:[%s13041_s3 + $0x8b0] sm:$0xff]   ;;  %v2644_v12 = vld [vmem:[%s11607_s14 + $0x58] sm:$0x11]  ;;  %s393_s14 = sadd.s32 2, %s10705_s24 }
 0x108   : > { %9372 = vmatprep.subr.bf16.mxu1 %v10278_v17  ;;  %v8998_v16 = vpop.f32.mrf.mxu1  ;;  %v11831_v14 = vcombine.low %v2643_v10, %v2643_v10  ;;  %p12256_p1 = scmp.lt.s32.totalorder %s393_s14, 17 }
 0x109   : > { %v10320_v16 = vld [vmem:[%s13041_s3 + $0x850] sm:$0xff]  }
 0x10a   : > { %9345 = vmatpush3.bf16.msra.mxu0 %v10279_v20  ;;  %v10305_v20 = vld [vmem:[%s13041_s3 + $0x868] sm:$0xff]   ;;  %s13070_s14 = smov (!%p12256_p1, %s393_s14), 17 }
 0x10b   : > { %9373 = vmatpush3.bf16.msra.mxu1 %v10280_v61  ;;  %9346 = vmatprep.subr.bf16.mxu0 %v10284_v52  ;;  %v10310_v52 = vld [vmem:[%s13041_s3 + $0x8e0] sm:$0xff]   ;;  %s9955_s7 = smul.u32 24, %s13070_s14 }
 0x10c   : > { %9374 = vmatprep.subr.bf16.mxu1 %v10285_v38  ;;  %v10312_v38 = vld [vmem:[%s13041_s3 + $0x8a0] sm:$0xff]  }
 0x10d   : > { %s400_s19 = sadd.s32 %s9955_s7, %s10893_s9  ;;  %s12987_s7 = scalar_lea.sflag [#allocation3], %s370_s16 }
 0x10e   : > { %9347 = vmatpush3.bf16.msra.mxu0 %v10287_v7  ;;  %v10314_v7 = vld [vmem:[%s13041_s3 + $0x8d8] sm:$0xff]   ;;  %s7287_s13 = sshll.u32 %s400_s19, 2  ;;  %s10635_s19 = scalar_lea.vmem %s10634_s12, 512 }
 0x10f   : > { %9375 = vmatpush3.bf16.msra.mxu1 %v10288_v9  ;;  %9348 = vmatprep.subr.bf16.mxu0 %v10289_v11  ;;  %v10316_v9 = vld [vmem:[%s13041_s3 + $0x898] sm:$0xff]   ;;  %s12336_s20 = scalar_lea.vmem %s13040_s2, %s7287_s13  ;;  %s372_s13 = scalar_lea.vmem [#allocation2], %s7284_s17 }
 0x110   : > { %9376 = vmatprep.subr.bf16.mxu1 %v10290_v13  ;;  %v11829_v13 = vcombine.high %v2643_v10, %v2643_v10  ;;  %s7106_s24 = sshll.u32 %s372_s13, 4  ;;  %s12985_s24 = int_to_ptr.vmem [resolvable:$true] %s7106_s24 }
 0x111   : > { %s10629_s30 = scalar_lea.vmem %s12985_s24, 256  ;;  %p10636_p6 = scmp.lt.s32.totalorder %s12985_s24, %s10634_s12 }
 0x112   : > { %9349 = vmatpush3.bf16.msra.mxu0 %v10291_v15  ;;  %v11833_v15 = vcombine.high %v2644_v12, %v2644_v12  ;;  %p10630_p2 = scmp.ne.s32.totalorder %s12985_s24, %s10629_s30  ;;  %p10637_p7 = scmp.lt.s32.totalorder %s10635_s19, %s10629_s30 }
 0x113   : > { %9377 = vmatpush3.bf16.msra.mxu1 %v10292_v19  ;;  %9350 = vmatprep.subr.bf16.mxu0 %v10293_v22  ;;  %v11838_v22 = vcombine.low %v2644_v12, %v2644_v12  ;;  %v10343_v12 = vld [vmem:[%s13041_s3 + $0x928] sm:$0xff]  }
 0x114   : > { %9378 = vmatprep.subr.bf16.mxu1 %v10294_v23  ;;  %v10321_v23 = vld [vmem:[%s13041_s3 + $0x8d0] sm:$0xff]   ;;  %p10631_p4 = pnand %p10630_p2, %p10812_p3  ;;  %p10638_p9 = por %p10637_p7, %p10636_p6 }
 0x116   : > { %9351 = vmatpush3.bf16.msra.mxu0 %v10295_v24  ;;  %p10632_p5 = pneg %p10631_p4 }
 0x117   : > { %9379 = vmatpush3.bf16.msra.mxu1 %v10296_v25  ;;  %9392 = vmatprep.subr.bf16.mxu0 %v10297_v18  ;;  %v10323_v25 = vld [vmem:[%s13041_s3 + $0x810] sm:$0xff]  }
 0x118   : > { %9420 = vmatprep.subr.bf16.mxu1 %v10298_v36  ;;  %p10639_p10 = pnand %p10638_p9, %p10632_p5 }
 0x119   : > { %v9016_v0 = vpop.f32.mrf.mxu0  ;;  %3353 = vmatmul.mubr.bf16.vlgmr.msra.gmra.mxu0 %v11748_v30 }
 0x11a   : > { %v9044_v63 = vpop.f32.mrf.mxu1  ;;  %3400 = vmatmul.mubr.bf16.vlgmr.msra.gmra.mxu1 %v11753_v2  ;;  %9393 = vmatpush3.bf16.msra.mxu0 %v10299_v42  ;;  %v10330_v42 = vld [vmem:[%s13041_s3 + $0x8c0] sm:$0xff]  }
 0x11b   : > { %v9017_v21 = vpop.f32.mrf.mxu0  ;;  %9421 = vmatpush3.bf16.msra.mxu1 %v10300_v45  ;;  %9394 = vmatprep.subr.bf16.mxu0 %v10301_v53  ;;  %v10334_v53 = vld [vmem:[%s13041_s3 + $0x9f8] sm:$0xff]  }
 0x11c   : > { %v9018_v40 = vadd.f32 %v9017_v21, %v9016_v0  ;;  %v9045_v41 = vpop.f32.mrf.mxu1  ;;  %9422 = vmatprep.subr.bf16.mxu1 %v10302_v56  ;;  %3360 = vmatprep.mubr.bf16.mxu0 %v11829_v13  ;;  %v10325_v0 = vld [vmem:[%s13041_s3 + $0x848] sm:$0xff]  }
 0x11d   : > { %v9046_v43 = vadd.f32 %v9045_v41, %v9044_v63  ;;  %v9019_v44 = vpop.f32.mrf.mxu0  ;;  %3407 = vmatprep.mubr.bf16.mxu1 %v11833_v15  ;;  %v10326_v63 = vld [vmem:[%s13041_s3 + $0x8c8] sm:$0xff]   ;;  %v10329_v41 = vld [vmem:[%s13041_s3 + $0x840] sm:$0xff]  }
 0x11e   : > { %v1136_v46 = vadd.f32 %v9018_v40, %v11643_v34  ;;  %v9047_v51 = vpop.f32.mrf.mxu1  ;;  %v10303_v34 = vld [vmem:[%s13041_s3 + $0x830] sm:$0xff]   ;;  %v10327_v21 = vld [vmem:[%s13041_s3 + $0x808] sm:$0xff]  }
 0x11f   : > { %v9020_v54 = vpop.f32.mrf.mxu0  ;;  %9395 = vmatpush3.bf16.msra.mxu0 %v10303_v34  ;;  %9423 = vmatpush3.bf16.msra.mxu1 %v10304_v59  ;;  %v10328_v40 = vld [vmem:[%s13041_s3 + $0x888] sm:$0xff]  }
 0x120   : > { %v11777_v55 = vadd.f32 %v9046_v43, %v1136_v46  ;;  %v9021_v57 = vadd.f32 %v9020_v54, %v9019_v44  ;;  %v9048_v58 = vpop.f32.mrf.mxu1  ;;  %9396 = vmatprep.subr.bf16.mxu0 %v10305_v20  ;;  %9424 = vmatprep.subr.bf16.mxu1 %v10306_v48  ;;  %v10331_v43 = vld [vmem:[%s13041_s3 + $0x800] sm:$0xff]   ;;  %v10335_v54 = vld [vmem:[%s13041_s3 + $0x938] sm:$0xff]   ;;  %v10337_v20 = vld [vmem:[%s13041_s3 + $0x970] sm:$0xff]  }
 0x121   : > { %v9049_v17 = vadd.f32 %v9048_v58, %v9047_v51  ;;  %v9022_v11 = vpop.f32.mrf.mxu0  ;;  %3361 = vmatmul.mubr.bf16.gmra.mxu0 %v11831_v14  ;;  %v10332_v44 = vld [vmem:[%s13041_s3 + $0x880] sm:$0xff]   ;;  %v10333_v51 = vld [vmem:[%s13041_s3 + $0x978] sm:$0xff]  }
 0x122   : > { %v1139_v60 = vadd.f32 %v9021_v57, %v11657_v47  ;;  %v10308_v47 = vld [vmem:[%s13041_s3 + $0x8a8] sm:$0xff]   ;;  %v9050_v19 = vpop.f32.mrf.mxu1  ;;  %3408 = vmatmul.mubr.bf16.gmra.mxu1 %v11838_v22  ;;  %3961 = vmatprep.mubr.bf16.mxu0 %v11620_v27  ;;  %v10336_v58 = vld [vmem:[%s13041_s3 + $0x9b8] sm:$0xff]  }
 0x123   : > { %9397 = vmatpush3.bf16.msra.mxu0 %v10307_v50  ;;  %9425 = vmatpush3.bf16.msra.mxu1 %v10308_v47  ;;  %v9023_v24 = vpop.f32.mrf.mxu0  ;;  %v10338_v50 = vld [vmem:[%s13041_s3 + $0x9f0] sm:$0xff]   ;;  %v10342_v11 = vld [vmem:[%s13041_s3 + $0x9e8] sm:$0xff]  }
 0x124   : > { %v11792_v61 = vadd.f32 %v9049_v17, %v1139_v60  ;;  %9398 = vmatprep.subr.bf16.mxu0 %v10309_v1  ;;  %9426 = vmatprep.subr.bf16.mxu1 %v10310_v52  ;;  %v9051_v28 = vpop.f32.mrf.mxu1  ;;  %v10339_v47 = vld [vmem:[%s13041_s3 + $0x930] sm:$0xff]  }
 0x125   : > { %v9025_v62 = vpop.f32.mrf.mxu0  ;;  %4009 = vmatprep.mubr.bf16.mxu1 %v11625_v29  ;;  %v10345_v28 = vld [vmem:[%s13041_s3 + $0x960] sm:$0xff]  }
 0x126   : > { %v9053_v32 = vpop.f32.mrf.mxu1 }
 0x127   : > { %9399 = vmatpush3.bf16.msra.mxu0 %v10311_v5  ;;  %9427 = vmatpush3.bf16.msra.mxu1 %v10312_v38  ;;  %v9026_v18 = vpop.f32.mrf.mxu0  ;;  %v10340_v5 = vld [vmem:[%s13041_s3 + $0x9b0] sm:$0xff]  }
 0x128   : > { %9400 = vmatprep.subr.bf16.mxu0 %v10313_v6  ;;  %9428 = vmatprep.subr.bf16.mxu1 %v10314_v7  ;;  %v9054_v36 = vpop.f32.mrf.mxu1  ;;  %v10341_v7 = vld [vmem:[%s13041_s3 + $0x968] sm:$0xff]  }
 0x129   : > { %v10348_v36 = vld [vmem:[%s13041_s3 + $0x9a0] sm:$0xff]  }
 0x12b   : > { %9401 = vmatpush3.bf16.msra.mxu0 %v10315_v8  ;;  %9429 = vmatpush3.bf16.msra.mxu1 %v10316_v9 }
 0x12c   : > { %9402 = vmatprep.subr.bf16.mxu0 %v10320_v16  ;;  %9430 = vmatprep.subr.bf16.mxu1 %v10321_v23  ;;  %v10344_v23 = vld [vmem:[%s13041_s3 + $0x9a8] sm:$0xff]  }
 0x12f   : > { %9403 = vmatpush3.bf16.msra.mxu0 %v10323_v25  ;;  %9431 = vmatpush3.bf16.msra.mxu1 %v10324_v37 }
 0x130   : > { %9404 = vmatprep.subr.bf16.mxu0 %v10325_v0  ;;  %9432 = vmatprep.subr.bf16.mxu1 %v10326_v63  ;;  %v10346_v0 = vld [vmem:[%s13041_s3 + $0x9e0] sm:$0xff]  }
 0x131   : > { %v10347_v63 = vld [vmem:[%s13041_s3 + $0x920] sm:$0xff]  }
 0x133   : > { %9405 = vmatpush3.bf16.msra.mxu0 %v10327_v21  ;;  %9433 = vmatpush3.bf16.msra.mxu1 %v10328_v40  ;;  %v10349_v40 = vld [vmem:[%s13041_s3 + $0x958] sm:$0xff]  }
 0x134   : > { %9406 = vmatprep.subr.bf16.mxu0 %v10329_v41  ;;  %9434 = vmatprep.subr.bf16.mxu1 %v10330_v42  ;;  %v10350_v41 = vld [vmem:[%s13041_s3 + $0x9d8] sm:$0xff]  }
 0x135   : > { %v10351_v42 = vld [vmem:[%s13041_s3 + $0x918] sm:$0xff]  }
 0x137   : > { %9407 = vmatpush3.bf16.msra.mxu0 %v10331_v43  ;;  %9435 = vmatpush3.bf16.msra.mxu1 %v10332_v44  ;;  %v10352_v43 = vld [vmem:[%s13041_s3 + $0x998] sm:$0xff]   ;;  %v10353_v44 = vld [vmem:[%s13041_s3 + $0x950] sm:$0xff]  }
 0x138   : > { %9448 = vmatprep.subr.bf16.mxu0 %v10333_v51  ;;  %9476 = vmatprep.subr.bf16.mxu1 %v10334_v53  ;;  %v10356_v51 = vld [vmem:[%s13041_s3 + $0x990] sm:$0xff]   ;;  %v10357_v53 = vld [vmem:[%s13041_s3 + $0x948] sm:$0xff]  }
 0x139   : > { %v9072_v45 = vpop.f32.mrf.mxu0 }
 0x13a   : > { %v9100_v46 = vpop.f32.mrf.mxu1  ;;  %3962 = vmatmul.mubr.bf16.vlgmr.msra.gmra.mxu0 %v11618_v26  ;;  %4010 = vmatmul.mubr.bf16.vlgmr.msra.gmra.mxu1 %v11623_v39 }
 0x13b   : > { %v9073_v56 = vpop.f32.mrf.mxu0  ;;  %9449 = vmatpush3.bf16.msra.mxu0 %v10335_v54  ;;  %9477 = vmatpush3.bf16.msra.mxu1 %v10336_v58  ;;  %v10358_v54 = vld [vmem:[%s13041_s3 + $0x9c8] sm:$0xff]   ;;  %v10361_v58 = vld [vmem:[%s13041_s3 + $0x940] sm:$0xff]  }
 0x13c   : > { %v9101_v57 = vpop.f32.mrf.mxu1  ;;  %v9074_v34 = vadd.f32 %v9073_v56, %v9072_v45  ;;  %9450 = vmatprep.subr.bf16.mxu0 %v10337_v20  ;;  %3969 = vmatprep.mubr.bf16.mxu0 %v11697_v3  ;;  %v10354_v45 = vld [vmem:[%s13041_s3 + $0x9d0] sm:$0xff]   ;;  %v10359_v56 = vld [vmem:[%s13041_s3 + $0x908] sm:$0xff]  }
 0x13d   : > { %v9102_v59 = vadd.f32 %v9101_v57, %v9100_v46  ;;  %v9075_v60 = vpop.f32.mrf.mxu0  ;;  %9478 = vmatprep.subr.bf16.mxu1 %v10338_v50  ;;  %4017 = vmatprep.mubr.bf16.mxu1 %v11701_v49  ;;  %v10355_v46 = vld [vmem:[%s13041_s3 + $0x910] sm:$0xff]   ;;  %v10360_v57 = vld [vmem:[%s13041_s3 + $0x988] sm:$0xff]   ;;  %v10365_v50 = vld [vmem:[%s13041_s3 + $0xa78] sm:$0xff]  }
 0x13e   : > { %v9103_v17 = vpop.f32.mrf.mxu1 }
 0x13f   : > { %v11896_v48 = vadd.f32 %v9102_v59, %v9074_v34  ;;  %v9076_v1 = vpop.f32.mrf.mxu0  ;;  %9451 = vmatpush3.bf16.msra.mxu0 %v10339_v47  ;;  %9479 = vmatpush3.bf16.msra.mxu1 %v10340_v5  ;;  %v10362_v34 = vld [vmem:[%s13041_s3 + $0x9c0] sm:$0xff]   ;;  %v10366_v47 = vld [vmem:[%s13041_s3 + $0xaf8] sm:$0xff]  }
 0x140   : > { %v9104_v52 = vpop.f32.mrf.mxu1  ;;  %v9077_v38 = vadd.f32 %v9076_v1, %v9075_v60  ;;  %9452 = vmatprep.subr.bf16.mxu0 %v10341_v7  ;;  %9480 = vmatprep.subr.bf16.mxu1 %v10342_v11  ;;  %v10363_v59 = vld [vmem:[%s13041_s3 + $0x900] sm:$0xff]   ;;  %v10367_v1 = vld [vmem:[%s13041_s3 + $0xa38] sm:$0xff]   ;;  %v10369_v11 = vld [vmem:[%s13041_s3 + $0xa70] sm:$0xff]  }
 0x141   : > { %v9105_v6 = vadd.f32 %v9104_v52, %v9103_v17  ;;  %v9078_v8 = vpop.f32.mrf.mxu0  ;;  %v10364_v60 = vld [vmem:[%s13041_s3 + $0x980] sm:$0xff]  }
 0x142   : > { %v9106_v9 = vpop.f32.mrf.mxu1  ;;  %3970 = vmatmul.mubr.bf16.gmra.mxu0 %v11699_v4  ;;  %4018 = vmatmul.mubr.bf16.gmra.mxu1 %v11706_v35 }
 0x143   : > { %v11912_v10 = vadd.f32 %v9105_v6, %v9077_v38  ;;  %v9079_v16 = vpop.f32.mrf.mxu0  ;;  %9453 = vmatpush3.bf16.msra.mxu0 %v10343_v12  ;;  %9481 = vmatpush3.bf16.msra.mxu1 %v10344_v23  ;;  %v10368_v38 = vld [vmem:[%s13041_s3 + $0xab8] sm:$0xff]  }
 0x144   : > { %v9107_v19 = vpop.f32.mrf.mxu1  ;;  %v9080_v24 = vadd.f32 %v9079_v16, %v9078_v8  ;;  %9454 = vmatprep.subr.bf16.mxu0 %v10345_v28  ;;  %4057 = vmatprep.mubr.bf16.mxu0 %v11750_v31  ;;  %v10370_v16 = vld [vmem:[%s13041_s3 + $0xaf0] sm:$0xff]  }
 0x145   : > { %v9108_v25 = vadd.f32 %v9107_v19, %v9106_v9  ;;  %v9081_v37 = vpop.f32.mrf.mxu0  ;;  %9482 = vmatprep.subr.bf16.mxu1 %v10346_v0  ;;  %4105 = vmatprep.mubr.bf16.mxu1 %v11755_v33  ;;  %v10371_v19 = vld [vmem:[%s13041_s3 + $0xa30] sm:$0xff]  }
 0x146   : > { %v9109_v62 = vpop.f32.mrf.mxu1  ;;  %v10372_v28 = vld [vmem:[%s13041_s3 + $0xab0] sm:$0xff]  }
 0x147   : > { %v11931_v32 = vadd.f32 %v9108_v25, %v9080_v24  ;;  %v9082_v18 = vpop.f32.mrf.mxu0  ;;  %9455 = vmatpush3.bf16.msra.mxu0 %v10347_v63  ;;  %9483 = vmatpush3.bf16.msra.mxu1 %v10348_v36  ;;  %v10373_v62 = vld [vmem:[%s13041_s3 + $0xa68] sm:$0xff]  }
 0x148   : > { %v9110_v21 = vpop.f32.mrf.mxu1  ;;  %9456 = vmatprep.subr.bf16.mxu0 %v10349_v40  ;;  %9484 = vmatprep.subr.bf16.mxu1 %v10350_v41  ;;  %v10375_v36 = vld [vmem:[%s13041_s3 + $0xa28] sm:$0xff]  }
 0x149   : > { %v10374_v21 = vld [vmem:[%s13041_s3 + $0xae8] sm:$0xff]  }
 0x14b   : > { %9457 = vmatpush3.bf16.msra.mxu0 %v10351_v42  ;;  %9485 = vmatpush3.bf16.msra.mxu1 %v10352_v43  ;;  %v10376_v43 = vld [vmem:[%s13041_s3 + $0xaa8] sm:$0xff]  }
 0x14c   : > { %9458 = vmatprep.subr.bf16.mxu0 %v10353_v44  ;;  %9486 = vmatprep.subr.bf16.mxu1 %v10354_v45 }
 0x14f   : > { %9459 = vmatpush3.bf16.msra.mxu0 %v10355_v46  ;;  %9487 = vmatpush3.bf16.msra.mxu1 %v10356_v51  ;;  %v10377_v46 = vld [vmem:[%s13041_s3 + $0xa60] sm:$0xff]  }
 0x150   : > { %9460 = vmatprep.subr.bf16.mxu0 %v10357_v53  ;;  %9488 = vmatprep.subr.bf16.mxu1 %v10358_v54 }
 0x153   : > { %9461 = vmatpush3.bf16.msra.mxu0 %v10359_v56  ;;  %9489 = vmatpush3.bf16.msra.mxu1 %v10360_v57  ;;  %v10378_v57 = vld [vmem:[%s13041_s3 + $0xae0] sm:$0xff]  }
 0x154   : > { %9462 = vmatprep.subr.bf16.mxu0 %v10361_v58  ;;  %9490 = vmatprep.subr.bf16.mxu1 %v10362_v34  ;;  %v10379_v58 = vld [vmem:[%s13041_s3 + $0xa20] sm:$0xff]  }
 0x157   : > { %9463 = vmatpush3.bf16.msra.mxu0 %v10363_v59  ;;  %9491 = vmatpush3.bf16.msra.mxu1 %v10364_v60 }
 0x158   : > { %9504 = vmatprep.subr.bf16.mxu0 %v10365_v50  ;;  %9532 = vmatprep.subr.bf16.mxu1 %v10366_v47 }
 0x159   : > { %v9128_v17 = vpop.f32.mrf.mxu0 }
 0x15a   : > { %v9156_v20 = vpop.f32.mrf.mxu1  ;;  %4058 = vmatmul.mubr.bf16.vlgmr.msra.gmra.mxu0 %v11748_v30  ;;  %4106 = vmatmul.mubr.bf16.vlgmr.msra.gmra.mxu1 %v11753_v2 }
 0x15b   : > { %v9129_v52 = vpop.f32.mrf.mxu0  ;;  %9505 = vmatpush3.bf16.msra.mxu0 %v10367_v1  ;;  %9533 = vmatpush3.bf16.msra.mxu1 %v10368_v38  ;;  %v10383_v1 = vld [vmem:[%s13041_s3 + $0xa18] sm:$0xff]   ;;  %v10386_v38 = vld [vmem:[%s13041_s3 + $0xad0] sm:$0xff]  }
 0x15c   : > { %v9157_v5 = vpop.f32.mrf.mxu1  ;;  %v9130_v6 = vadd.f32 %v9129_v52, %v9128_v17  ;;  %9506 = vmatprep.subr.bf16.mxu0 %v10369_v11  ;;  %4065 = vmatprep.mubr.bf16.mxu0 %v11829_v13  ;;  %v10385_v52 = vld [vmem:[%s13041_s3 + $0xa50] sm:$0xff]   ;;  %v10392_v11 = vld [vmem:[%s13041_s3 + $0xa88] sm:$0xff]  }
 0x15d   : > { %v9158_v7 = vadd.f32 %v9157_v5, %v9156_v20  ;;  %v9131_v8 = vpop.f32.mrf.mxu0  ;;  %9534 = vmatprep.subr.bf16.mxu1 %v10370_v16  ;;  %4113 = vmatprep.mubr.bf16.mxu1 %v11833_v15  ;;  %v10381_v20 = vld [vmem:[%s13041_s3 + $0xa58] sm:$0xff]   ;;  %v10394_v16 = vld [vmem:[%s13041_s3 + $0xac0] sm:$0xff]  }
 0x15e   : > { %v9159_v9 = vpop.f32.mrf.mxu1  ;;  %v1841_v12 = vadd.f32 %v9130_v6, %v11896_v48  ;;  %v10387_v6 = vld [vmem:[%s13041_s3 + $0xa10] sm:$0xff]  }
 0x15f   : > { %v9132_v23 = vpop.f32.mrf.mxu0  ;;  %9507 = vmatpush3.bf16.msra.mxu0 %v10371_v19  ;;  %9535 = vmatpush3.bf16.msra.mxu1 %v10372_v28  ;;  %v10395_v19 = vld [vmem:[%s13041_s3 + $0xa00] sm:$0xff]   ;;  %v10397_v28 = vld [vmem:[%s13041_s3 + $0xb78] sm:$0xff]  }
 0x160   : > { %v9160_v24 = vpop.f32.mrf.mxu1  ;;  %v1889_v25 = vadd.f32 %v9158_v7, %v1841_v12  ;;  %v9133_v48 = vadd.f32 %v9132_v23, %v9131_v8  ;;  %9508 = vmatprep.subr.bf16.mxu0 %v10373_v62  ;;  %9536 = vmatprep.subr.bf16.mxu1 %v10374_v21  ;;  %v10388_v7 = vld [vmem:[%s13041_s3 + $0xa90] sm:$0xff]   ;;  %v10390_v8 = vld [vmem:[%s13041_s3 + $0xac8] sm:$0xff]   ;;  %v10393_v12 = vld [vmem:[%s13041_s3 + $0xa40] sm:$0xff]  }
 0x161   : > { %v9134_v37 = vpop.f32.mrf.mxu0  ;;  %v9161_v18 = vadd.f32 %v9160_v24, %v9159_v9  ;;  %v10391_v9 = vld [vmem:[%s13041_s3 + $0xa08] sm:$0xff]   ;;  %v10396_v23 = vld [vmem:[%s13041_s3 + $0xa80] sm:$0xff]  }
 0x162   : > { %v9162_v0 = vpop.f32.mrf.mxu1  ;;  %v1844_v63 = vadd.f32 %v9133_v48, %v11912_v10  ;;  %v1906_v45 = vrot.slane %v1889_v25, 1  ;;  %4066 = vmatmul.mubr.bf16.gmra.mxu0 %v11831_v14  ;;  %4114 = vmatmul.mubr.bf16.gmra.mxu1 %v11838_v22  ;;  %v10398_v48 = vld [vmem:[%s13041_s3 + $0xbf8] sm:$0xff]  }
 0x163   : > { %v9135_v40 = vpop.f32.mrf.mxu0  ;;  %9509 = vmatpush3.bf16.msra.mxu0 %v10375_v36  ;;  %9537 = vmatpush3.bf16.msra.mxu1 %v10376_v43  ;;  %v10402_v43 = vld [vmem:[%s13041_s3 + $0xbf0] sm:$0xff]  }
 0x164   : > { %v9163_v41 = vpop.f32.mrf.mxu1  ;;  %v1892_v42 = vadd.f32 %v9161_v18, %v1844_v63  ;;  %v9136_v10 = vadd.f32 %v9135_v40, %v9134_v37  ;;  %9510 = vmatprep.subr.bf16.mxu0 %v10377_v46  ;;  %4678 = vmatprep.mubr.bf16.mxu0 %v11620_v27  ;;  %v10382_v27 = vld [vmem:[%s13041_s3 + $0xad8] sm:$0xff]  }
 0x165   : > { %v9164_v44 = vadd.f32 %v9163_v41, %v9162_v0  ;;  %v9137_v51 = vpop.f32.mrf.mxu0  ;;  %9538 = vmatprep.subr.bf16.mxu1 %v10378_v57  ;;  %4726 = vmatprep.mubr.bf16.mxu1 %v11625_v29  ;;  %v10399_v37 = vld [vmem:[%s13041_s3 + $0xb38] sm:$0xff]   ;;  %v10401_v41 = vld [vmem:[%s13041_s3 + $0xb70] sm:$0xff]   ;;  %v10407_v57 = vld [vmem:[%s13041_s3 + $0xb28] sm:$0xff]  }
 0x166   : > { %v9165_v53 = vpop.f32.mrf.mxu1  ;;  %v1907_v54 = vrot.slane %v1892_v42, 1  ;;  %v1849_v56 = vadd.f32 %v9136_v10, %v11931_v32  ;;  %v10380_v32 = vld [vmem:[%s13041_s3 + $0xaa0] sm:$0xff]   ;;  %v10400_v63 = vld [vmem:[%s13041_s3 + $0xbb8] sm:$0xff]   ;;  %v10405_v51 = vld [vmem:[%s13041_s3 + $0xb68] sm:$0xff]  }
 0x167   : > { %v9138_v34 = vpop.f32.mrf.mxu0  ;;  %9511 = vmatpush3.bf16.msra.mxu0 %v10379_v58  ;;  %9539 = vmatpush3.bf16.msra.mxu1 %v10380_v32 }
 0x168   : > { %v9166_v59 = vpop.f32.mrf.mxu1  ;;  %v1908_v60 = vsel %vm1905_vm0, %v1906_v45, %v1907_v54  ;;  %v1897_v17 = vadd.f32 %v9164_v44, %v1849_v56  ;;  %9512 = vmatprep.subr.bf16.mxu0 %v10381_v20  ;;  %9540 = vmatprep.subr.bf16.mxu1 %v10382_v27  ;;  %v10404_v44 = vld [vmem:[%s13041_s3 + $0xbb0] sm:$0xff]   ;;  %v10408_v34 = vld [vmem:[%s13041_s3 + $0xba8] sm:$0xff]  }
 0x169   : > { %v12053_v50 = vadd.f32 %v1908_v60, %v11777_v55  ;;  %v10384_v55 = vld [vmem:[%s13041_s3 + $0xa98] sm:$0xff]  }
 0x16a   : > { %v1909_v47 = vrot.slane %v1897_v17, 1  ;;  %v10409_v17 = vld [vmem:[%s13041_s3 + $0xb60] sm:$0xff]  }
 0x16b   : > { %9513 = vmatpush3.bf16.msra.mxu0 %v10383_v1  ;;  %9541 = vmatpush3.bf16.msra.mxu1 %v10384_v55  ;;  %v10411_v1 = vld [vmem:[%s13041_s3 + $0xb20] sm:$0xff]  }
 0x16c   : > { %v1910_v29 = vsel %vm1905_vm0, %v1907_v54, %v1909_v47  ;;  %9514 = vmatprep.subr.bf16.mxu0 %v10385_v52  ;;  %9542 = vmatprep.subr.bf16.mxu1 %v10386_v38  ;;  %v10410_v47 = vld [vmem:[%s13041_s3 + $0xbe0] sm:$0xff]   ;;  %v10414_v52 = vld [vmem:[%s13041_s3 + $0xbd8] sm:$0xff]   ;;  %v10417_v38 = vld [vmem:[%s13041_s3 + $0xb50] sm:$0xff]  }
 0x16d   : > { %v12069_v5 = vadd.f32 %v1910_v29, %v11792_v61  ;;  %v10389_v61 = vld [vmem:[%s13041_s3 + $0xa48] sm:$0xff]  }
 0x16f   : > { %9515 = vmatpush3.bf16.msra.mxu0 %v10387_v6  ;;  %9543 = vmatpush3.bf16.msra.mxu1 %v10388_v7  ;;  %v10418_v6 = vld [vmem:[%s13041_s3 + $0xbd0] sm:$0xff]  }
 0x170   : > { %9516 = vmatprep.subr.bf16.mxu0 %v10389_v61  ;;  %9544 = vmatprep.subr.bf16.mxu1 %v10390_v8  ;;  %v10419_v7 = vld [vmem:[%s13041_s3 + $0xb10] sm:$0xff]   ;;  %v10421_v8 = vld [vmem:[%s13041_s3 + $0xb48] sm:$0xff]  }
 0x171   : > { %v10420_v61 = vld [vmem:[%s13041_s3 + $0xb90] sm:$0xff]  }
 0x173   : > { %9517 = vmatpush3.bf16.msra.mxu0 %v10391_v9  ;;  %9545 = vmatpush3.bf16.msra.mxu1 %v10392_v11  ;;  %v10422_v9 = vld [vmem:[%s13041_s3 + $0xbc8] sm:$0xff]  }
 0x174   : > { %9518 = vmatprep.subr.bf16.mxu0 %v10393_v12  ;;  %9546 = vmatprep.subr.bf16.mxu1 %v10394_v16  ;;  %v10423_v11 = vld [vmem:[%s13041_s3 + $0xb08] sm:$0xff]   ;;  %v10425_v16 = vld [vmem:[%s13041_s3 + $0xb40] sm:$0xff]  }
 0x175   : > { %v10424_v12 = vld [vmem:[%s13041_s3 + $0xb88] sm:$0xff]  }
 0x177   : > { %9519 = vmatpush3.bf16.msra.mxu0 %v10395_v19  ;;  %9547 = vmatpush3.bf16.msra.mxu1 %v10396_v23  ;;  %v10426_v19 = vld [vmem:[%s13041_s3 + $0xbc0] sm:$0xff]  }
 0x178   : > { %9560 = vmatprep.subr.bf16.mxu0 %v10397_v28  ;;  %9588 = vmatprep.subr.bf16.mxu1 %v10398_v48  ;;  %v10427_v23 = vld [vmem:[%s13041_s3 + $0xb00] sm:$0xff]   ;;  %v10429_v48 = vld [vmem:[%s13041_s3 + $0xc78] sm:$0xff]  }
 0x179   : > { %v9184_v24 = vpop.f32.mrf.mxu0 }
 0x17a   : > { %v9212_v25 = vpop.f32.mrf.mxu1  ;;  %4679 = vmatmul.mubr.bf16.vlgmr.msra.gmra.mxu0 %v11618_v26  ;;  %4727 = vmatmul.mubr.bf16.vlgmr.msra.gmra.mxu1 %v11623_v39  ;;  %v10403_v26 = vld [vmem:[%s13041_s3 + $0xb30] sm:$0xff]  }
 0x17b   : > { %v9185_v62 = vpop.f32.mrf.mxu0  ;;  %9561 = vmatpush3.bf16.msra.mxu0 %v10399_v37  ;;  %9589 = vmatpush3.bf16.msra.mxu1 %v10400_v63  ;;  %v10430_v37 = vld [vmem:[%s13041_s3 + $0xcf8] sm:$0xff]  }
 0x17c   : > { %v9213_v0 = vpop.f32.mrf.mxu1  ;;  %v9186_v18 = vadd.f32 %v9185_v62, %v9184_v24  ;;  %9562 = vmatprep.subr.bf16.mxu0 %v10401_v41  ;;  %4686 = vmatprep.mubr.bf16.mxu0 %v11697_v3  ;;  %v10406_v3 = vld [vmem:[%s13041_s3 + $0xbe8] sm:$0xff]   ;;  %v10428_v24 = vld [vmem:[%s13041_s3 + $0xb80] sm:$0xff]   ;;  %v10431_v62 = vld [vmem:[%s13041_s3 + $0xc38] sm:$0xff]  }
 0x17d   : > { %v9214_v21 = vadd.f32 %v9213_v0, %v9212_v25  ;;  %v9187_v36 = vpop.f32.mrf.mxu0  ;;  %9590 = vmatprep.subr.bf16.mxu1 %v10402_v43  ;;  %4734 = vmatprep.mubr.bf16.mxu1 %v11701_v49  ;;  %v10433_v43 = vld [vmem:[%s13041_s3 + $0xc70] sm:$0xff]  }
 0x17e   : > { %v9215_v40 = vpop.f32.mrf.mxu1 }
 0x17f   : > { %v12121_v42 = vadd.f32 %v9214_v21, %v9186_v18  ;;  %v9188_v39 = vpop.f32.mrf.mxu0  ;;  %9563 = vmatpush3.bf16.msra.mxu0 %v10403_v26  ;;  %9591 = vmatpush3.bf16.msra.mxu1 %v10404_v44  ;;  %v10432_v18 = vld [vmem:[%s13041_s3 + $0xcb8] sm:$0xff]  }
 0x180   : > { %v9216_v10 = vpop.f32.mrf.mxu1  ;;  %v9189_v45 = vadd.f32 %v9188_v39, %v9187_v36  ;;  %9564 = vmatprep.subr.bf16.mxu0 %v10405_v51  ;;  %9592 = vmatprep.subr.bf16.mxu1 %v10406_v3  ;;  %v10434_v39 = vld [vmem:[%s13041_s3 + $0xcf0] sm:$0xff]   ;;  %v10438_v3 = vld [vmem:[%s13041_s3 + $0xce8] sm:$0xff]  }
 0x181   : > { %v9217_v46 = vadd.f32 %v9216_v10, %v9215_v40  ;;  %v9190_v53 = vpop.f32.mrf.mxu0 }
 0x182   : > { %v9218_v54 = vpop.f32.mrf.mxu1  ;;  %4687 = vmatmul.mubr.bf16.gmra.mxu0 %v11699_v4  ;;  %4735 = vmatmul.mubr.bf16.gmra.mxu1 %v11706_v35  ;;  %v10412_v4 = vld [vmem:[%s13041_s3 + $0xba0] sm:$0xff]   ;;  %v10413_v35 = vld [vmem:[%s13041_s3 + $0xb58] sm:$0xff]  }
 0x183   : > { %v12137_v56 = vadd.f32 %v9217_v46, %v9189_v45  ;;  %v9191_v49 = vpop.f32.mrf.mxu0  ;;  %9565 = vmatpush3.bf16.msra.mxu0 %v10407_v57  ;;  %9593 = vmatpush3.bf16.msra.mxu1 %v10408_v34  ;;  %v10436_v45 = vld [vmem:[%s13041_s3 + $0xcb0] sm:$0xff]  }
 0x184   : > { %v9219_v58 = vpop.f32.mrf.mxu1  ;;  %v9192_v59 = vadd.f32 %v9191_v49, %v9190_v53  ;;  %9566 = vmatprep.subr.bf16.mxu0 %v10409_v17  ;;  %4774 = vmatprep.mubr.bf16.mxu0 %v11750_v31  ;;  %v10415_v31 = vld [vmem:[%s13041_s3 + $0xb18] sm:$0xff]   ;;  %v10437_v53 = vld [vmem:[%s13041_s3 + $0xc68] sm:$0xff]   ;;  %v10441_v17 = vld [vmem:[%s13041_s3 + $0xc60] sm:$0xff]  }
 0x185   : > { %v9220_v60 = vadd.f32 %v9219_v58, %v9218_v54  ;;  %v9193_v32 = vpop.f32.mrf.mxu0  ;;  %9594 = vmatprep.subr.bf16.mxu1 %v10410_v47  ;;  %4822 = vmatprep.mubr.bf16.mxu1 %v11755_v33  ;;  %v10416_v33 = vld [vmem:[%s13041_s3 + $0xb98] sm:$0xff]  }
 0x186   : > { %v9221_v20 = vpop.f32.mrf.mxu1 }
 0x187   : > { %v12156_v27 = vadd.f32 %v9220_v60, %v9192_v59  ;;  %v9194_v29 = vpop.f32.mrf.mxu0  ;;  %9567 = vmatpush3.bf16.msra.mxu0 %v10411_v1  ;;  %9595 = vmatpush3.bf16.msra.mxu1 %v10412_v4 }
 0x188   : > { %v9222_v55 = vpop.f32.mrf.mxu1  ;;  %9568 = vmatprep.subr.bf16.mxu0 %v10413_v35  ;;  %9596 = vmatprep.subr.bf16.mxu1 %v10414_v52  ;;  %v10442_v29 = vld [vmem:[%s13041_s3 + $0xce0] sm:$0xff]   ;;  %v10445_v52 = vld [vmem:[%s13041_s3 + $0xc58] sm:$0xff]  }
 0x189   : > { %v10444_v35 = vld [vmem:[%s13041_s3 + $0xca0] sm:$0xff]  }
 0x18b   : > { %9569 = vmatpush3.bf16.msra.mxu0 %v10415_v31  ;;  %9597 = vmatpush3.bf16.msra.mxu1 %v10416_v33 }
 0x18c   : > { %9570 = vmatprep.subr.bf16.mxu0 %v10417_v38  ;;  %9598 = vmatprep.subr.bf16.mxu1 %v10418_v6  ;;  %v10446_v38 = vld [vmem:[%s13041_s3 + $0xcd8] sm:$0xff]  }
 0x18d   : > { %v10447_v6 = vld [vmem:[%s13041_s3 + $0xc18] sm:$0xff]  }
 0x18f   : > { %9571 = vmatpush3.bf16.msra.mxu0 %v10419_v7  ;;  %9599 = vmatpush3.bf16.msra.mxu1 %v10420_v61  ;;  %v10448_v7 = vld [vmem:[%s13041_s3 + $0xc98] sm:$0xff]   ;;  %v10449_v61 = vld [vmem:[%s13041_s3 + $0xc50] sm:$0xff]  }
 0x190   : > { %9572 = vmatprep.subr.bf16.mxu0 %v10421_v8  ;;  %9600 = vmatprep.subr.bf16.mxu1 %v10422_v9  ;;  %v10450_v9 = vld [vmem:[%s13041_s3 + $0xcd0] sm:$0xff]  }
 0x193   : > { %9573 = vmatpush3.bf16.msra.mxu0 %v10423_v11  ;;  %9601 = vmatpush3.bf16.msra.mxu1 %v10424_v12  ;;  %v10451_v11 = vld [vmem:[%s13041_s3 + $0xc10] sm:$0xff]  }
 0x194   : > { %9574 = vmatprep.subr.bf16.mxu0 %v10425_v16  ;;  %9602 = vmatprep.subr.bf16.mxu1 %v10426_v19  ;;  %v10452_v12 = vld [vmem:[%s13041_s3 + $0xc90] sm:$0xff]   ;;  %v10454_v16 = vld [vmem:[%s13041_s3 + $0xcc8] sm:$0xff]  }
 0x195   : > { %v10455_v19 = vld [vmem:[%s13041_s3 + $0xc08] sm:$0xff]  }
 0x197   : > { %9575 = vmatpush3.bf16.msra.mxu0 %v10427_v23  ;;  %9603 = vmatpush3.bf16.msra.mxu1 %v10428_v24  ;;  %v10456_v23 = vld [vmem:[%s13041_s3 + $0xc88] sm:$0xff]   ;;  %v10457_v24 = vld [vmem:[%s13041_s3 + $0xc40] sm:$0xff]  }
 0x198   : > { %9616 = vmatprep.subr.bf16.mxu0 %v10429_v48  ;;  %9644 = vmatprep.subr.bf16.mxu1 %v10430_v37  ;;  %v10460_v48 = vld [vmem:[%s13041_s3 + $0xc80] sm:$0xff]  }
 0x199   : > { %v9240_v25 = vpop.f32.mrf.mxu0  ;;  %v4850_v37 = vld [vmem:[%s12336_s20] sm:$0xff] }
 0x19a   : > { %v9268_v28 = vpop.f32.mrf.mxu1  ;;  %4775 = vmatmul.mubr.bf16.vlgmr.msra.gmra.mxu0 %v11748_v30  ;;  %4823 = vmatmul.mubr.bf16.vlgmr.msra.gmra.mxu1 %v11753_v2  ;;  %v10435_v30 = vld [vmem:[%s13041_s3 + $0xc30] sm:$0xff]  }
 0x19b   : > { %v9241_v0 = vpop.f32.mrf.mxu0  ;;  %9617 = vmatpush3.bf16.msra.mxu0 %v10431_v62  ;;  %9645 = vmatpush3.bf16.msra.mxu1 %v10432_v18  ;;  %v4854_v62 = vld [vmem:[%s12336_s20 + $0x20] sm:$0xff] }
 0x19c   : > { %v9269_v63 = vpop.f32.mrf.mxu1  ;;  %v9242_v21 = vadd.f32 %v9241_v0, %v9240_v25  ;;  %9618 = vmatprep.subr.bf16.mxu0 %v10433_v43  ;;  %4782 = vmatprep.mubr.bf16.mxu0 %v11829_v13  ;;  %v10458_v25 = vld [vmem:[%s13041_s3 + $0xcc0] sm:$0xff]   ;;  %v4851_v0 = vld [vmem:[%s12336_s20 + $0x8] sm:$0xff]  ;;  %v12347_v18 = vcombine.low %v4850_v37, %v4854_v62 }
 0x19d   : > { %v9270_v36 = vadd.f32 %v9269_v63, %v9268_v28  ;;  %v9243_v40 = vpop.f32.mrf.mxu0  ;;  %9646 = vmatprep.subr.bf16.mxu1 %v10434_v39  ;;  %4830 = vmatprep.mubr.bf16.mxu1 %v11833_v15  ;;  %v10439_v15 = vld [vmem:[%s13041_s3 + $0xc28] sm:$0xff]   ;;  %v10459_v28 = vld [vmem:[%s13041_s3 + $0xc00] sm:$0xff]  }
 0x19e   : > { %v9271_v41 = vpop.f32.mrf.mxu1  ;;  %v2559_v26 = vadd.f32 %v9242_v21, %v12121_v42  ;;  %v12349_v21 = vcombine.high %v4850_v37, %v4854_v62  ;;  %v10492_v62 = vld [vmem:[%s13041_s3 + $0xd88] sm:$0xff]  }
 0x19f   : > { %v9244_v2 = vpop.f32.mrf.mxu0  ;;  %9619 = vmatpush3.bf16.msra.mxu0 %v10435_v30  ;;  %9647 = vmatpush3.bf16.msra.mxu1 %v10436_v45  ;;  %v10462_v30 = vld [vmem:[%s13041_s3 + $0xdf8] sm:$0xff]  }
 0x1a0   : > { %v9272_v10 = vpop.f32.mrf.mxu1  ;;  %v2607_v44 = vadd.f32 %v9270_v36, %v2559_v26  ;;  %v9245_v42 = vadd.f32 %v9244_v2, %v9243_v40  ;;  %9620 = vmatprep.subr.bf16.mxu0 %v10437_v53  ;;  %9648 = vmatprep.subr.bf16.mxu1 %v10438_v3  ;;  %v4855_v36 = vld [vmem:[%s12336_s20 + $0x28] sm:$0xff]  ;;  %v10461_v26 = vld [vmem:[%s13041_s3 + $0xd78] sm:$0xff]   ;;  %v10466_v3 = vld [vmem:[%s13041_s3 + $0xdf0] sm:$0xff]  }
 0x1a1   : > { %v9273_v46 = vadd.f32 %v9272_v10, %v9271_v41  ;;  %v9246_v51 = vpop.f32.mrf.mxu0  ;;  %v12352_v41 = vcombine.low %v4851_v0, %v4855_v36  ;;  %v12354_v43 = vcombine.high %v4851_v0, %v4855_v36  ;;  %v10493_v0 = vld [vmem:[%s13041_s3 + $0xd40] sm:$0xff]  }
 0x1a2   : > { %v9274_v54 = vpop.f32.mrf.mxu1  ;;  %v2562_v13 = vadd.f32 %v9245_v42, %v12137_v56  ;;  %v10440_v56 = vld [vmem:[%s13041_s3 + $0xca8] sm:$0xff]   ;;  %v2624_v60 = vrot.slane %v2607_v44, 2  ;;  %4783 = vmatmul.mubr.bf16.gmra.mxu0 %v11831_v14  ;;  %4831 = vmatmul.mubr.bf16.gmra.mxu1 %v11838_v22  ;;  %v10443_v14 = vld [vmem:[%s13041_s3 + $0xc20] sm:$0xff]   ;;  %v10463_v44 = vld [vmem:[%s13041_s3 + $0xd38] sm:$0xff]  }
 0x1a3   : > { %v9247_v57 = vpop.f32.mrf.mxu0  ;;  %9621 = vmatpush3.bf16.msra.mxu0 %v10439_v15  ;;  %9649 = vmatpush3.bf16.msra.mxu1 %v10440_v56  ;;  %v10468_v56 = vld [vmem:[%s13041_s3 + $0xdb0] sm:$0xff]   ;;  %v10495_v36 = vld [vmem:[%s13041_s3 + $0xd00] sm:$0xff]  }
 0x1a4   : > { %v9275_v49 = vpop.f32.mrf.mxu1  ;;  %v2610_v58 = vadd.f32 %v9273_v46, %v2562_v13  ;;  %v9248_v34 = vadd.f32 %v9247_v57, %v9246_v51  ;;  %9622 = vmatprep.subr.bf16.mxu0 %v10441_v17  ;;  %9650 = vmatprep.subr.bf16.mxu1 %v10442_v29  ;;  %v10464_v46 = vld [vmem:[%s13041_s3 + $0xdb8] sm:$0xff]   ;;  %v10471_v17 = vld [vmem:[%s13041_s3 + $0xd28] sm:$0xff]   ;;  %v10476_v29 = vld [vmem:[%s13041_s3 + $0xda0] sm:$0xff]  }
 0x1a5   : > { %v9276_v59 = vadd.f32 %v9275_v49, %v9274_v54  ;;  %v9249_v32 = vpop.f32.mrf.mxu0  ;;  %5475 = vmatprep.mubr.bf16.mxu0 %v12349_v21  ;;  %5522 = vmatprep.mubr.bf16.mxu1 %v12354_v43  ;;  %v10465_v54 = vld [vmem:[%s13041_s3 + $0xd70] sm:$0xff]  }
 0x1a6   : > { %v9277_v20 = vpop.f32.mrf.mxu1  ;;  %v2625_v47 = vrot.slane %v2610_v58, 2  ;;  %v2567_v1 = vadd.f32 %v9248_v34, %v12156_v27  ;;  %v10467_v49 = vld [vmem:[%s13041_s3 + $0xd30] sm:$0xff]   ;;  %v10472_v32 = vld [vmem:[%s13041_s3 + $0xda8] sm:$0xff]  }
 0x1a7   : > { %v9250_v22 = vpop.f32.mrf.mxu0  ;;  %9623 = vmatpush3.bf16.msra.mxu0 %v10443_v14  ;;  %9651 = vmatpush3.bf16.msra.mxu1 %v10444_v35  ;;  %v10473_v20 = vld [vmem:[%s13041_s3 + $0xd60] sm:$0xff]   ;;  %v10477_v14 = vld [vmem:[%s13041_s3 + $0xd58] sm:$0xff]  }
 0x1a8   : > { %v9278_v55 = vpop.f32.mrf.mxu1  ;;  %v2615_v4 = vadd.f32 %v9276_v59, %v2567_v1  ;;  %v2626_v27 = vsel %vm2623_vm1, %v2624_v60, %v2625_v47  ;;  %9624 = vmatprep.subr.bf16.mxu0 %v10445_v52  ;;  %9652 = vmatprep.subr.bf16.mxu1 %v10446_v38  ;;  %v10469_v59 = vld [vmem:[%s13041_s3 + $0xd68] sm:$0xff]   ;;  %v10475_v1 = vld [vmem:[%s13041_s3 + $0xd20] sm:$0xff]   ;;  %v10478_v22 = vld [vmem:[%s13041_s3 + $0xdd8] sm:$0xff]  }
 0x1a9   : > { %v12287_v31 = vadd.f32 %v2626_v27, %v12053_v50  ;;  %v10470_v60 = vld [vmem:[%s13041_s3 + $0xde8] sm:$0xff]   ;;  %v10479_v55 = vld [vmem:[%s13041_s3 + $0xd18] sm:$0xff]   ;;  %v4858_v35 = vld [vmem:[%s12336_s20 + $0x40] sm:$0x11] }
 0x1aa   : > { %v2627_v33 = vrot.slane %v2615_v4, 2  ;;  %v10480_v4 = vld [vmem:[%s13041_s3 + $0xd98] sm:$0xff]   ;;  %v4859_v52 = vld [vmem:[%s12336_s20 + $0x48] sm:$0x11]  ;;  %v12428_v38 = vcombine.low %v4858_v35, %v4858_v35 }
 0x1ab   : > { %9625 = vmatpush3.bf16.msra.mxu0 %v10447_v6  ;;  %9653 = vmatpush3.bf16.msra.mxu1 %v10448_v7  ;;  %v12430_v6 = vcombine.high %v4859_v52, %v4859_v52  ;;  %v10484_v7 = vld [vmem:[%s13041_s3 + $0xd50] sm:$0xff]  }
 0x1ac   : > { %v2628_v50 = vsel %vm2623_vm1, %v2625_v47, %v2627_v33  ;;  %9626 = vmatprep.subr.bf16.mxu0 %v10449_v61  ;;  %9654 = vmatprep.subr.bf16.mxu1 %v10450_v9  ;;  %v10474_v47 = vld [vmem:[%s13041_s3 + $0xde0] sm:$0xff]   ;;  %v12426_v33 = vcombine.high %v4858_v35, %v4858_v35  ;;  %v12435_v61 = vcombine.low %v4859_v52, %v4859_v52  ;;  %v10485_v9 = vld [vmem:[%s13041_s3 + $0xdd0] sm:$0xff]  }
 0x1ad   : > { %v12303_v8 = vadd.f32 %v2628_v50, %v12069_v5  ;;  %v10453_v5 = vld [vmem:[%s13041_s3 + $0xc48] sm:$0xff]  }
 0x1af   : > { %9627 = vmatpush3.bf16.msra.mxu0 %v10451_v11  ;;  %9655 = vmatpush3.bf16.msra.mxu1 %v10452_v12  ;;  %v10487_v12 = vld [vmem:[%s13041_s3 + $0xd10] sm:$0xff]  }
 0x1b0   : > { %9628 = vmatprep.subr.bf16.mxu0 %v10453_v5  ;;  %9656 = vmatprep.subr.bf16.mxu1 %v10454_v16  ;;  %v10488_v16 = vld [vmem:[%s13041_s3 + $0xd90] sm:$0xff]  }
 0x1b3   : > { %9629 = vmatpush3.bf16.msra.mxu0 %v10455_v19  ;;  %9657 = vmatpush3.bf16.msra.mxu1 %v10456_v23  ;;  %v10489_v23 = vld [vmem:[%s13041_s3 + $0xd48] sm:$0xff]  }
 0x1b4   : > { %9630 = vmatprep.subr.bf16.mxu0 %v10457_v24  ;;  %9658 = vmatprep.subr.bf16.mxu1 %v10458_v25  ;;  %v10490_v25 = vld [vmem:[%s13041_s3 + $0xdc8] sm:$0xff]  }
 0x1b7   : > { %9631 = vmatpush3.bf16.msra.mxu0 %v10459_v28  ;;  %9659 = vmatpush3.bf16.msra.mxu1 %v10460_v48  ;;  %v10491_v48 = vld [vmem:[%s13041_s3 + $0xd08] sm:$0xff]  }
 0x1b8   : > { %9672 = vmatprep.subr.bf16.mxu0 %v10461_v26  ;;  %9700 = vmatprep.subr.bf16.mxu1 %v10462_v30  ;;  %v4852_v26 = vld [vmem:[%s12336_s20 + $0x10] sm:$0xff]  ;;  %v4853_v30 = vld [vmem:[%s12336_s20 + $0x18] sm:$0xff] }
 0x1b9   : > { %v9296_v63 = vpop.f32.mrf.mxu0 }
 0x1ba   : > { %v9324_v40 = vpop.f32.mrf.mxu1  ;;  %5476 = vmatmul.mubr.bf16.vlgmr.msra.gmra.mxu0 %v12347_v18  ;;  %5523 = vmatmul.mubr.bf16.vlgmr.msra.gmra.mxu1 %v12352_v41 }
 0x1bb   : > { %v9297_v39 = vpop.f32.mrf.mxu0  ;;  %9673 = vmatpush3.bf16.msra.mxu0 %v10463_v44  ;;  %9701 = vmatpush3.bf16.msra.mxu1 %v10464_v46 }
 0x1bc   : > { %v9298_v2 = vadd.f32 %v9297_v39, %v9296_v63  ;;  %v9325_v10 = vpop.f32.mrf.mxu1  ;;  %9674 = vmatprep.subr.bf16.mxu0 %v10465_v54  ;;  %9702 = vmatprep.subr.bf16.mxu1 %v10466_v3  ;;  %v10494_v63 = vld [vmem:[%s13041_s3 + $0xdc0] sm:$0xff]   ;;  %v4856_v39 = vld [vmem:[%s12336_s20 + $0x30] sm:$0xff]  ;;  %v10497_v54 = vld [vmem:[%s13041_s3 + $0xe78] sm:$0xff]  }
 0x1bd   : > { %v9326_v45 = vadd.f32 %v9325_v10, %v9324_v40  ;;  %v9299_v42 = vpop.f32.mrf.mxu0  ;;  %5483 = vmatprep.mubr.bf16.mxu0 %v12426_v33  ;;  %5530 = vmatprep.mubr.bf16.mxu1 %v12430_v6  ;;  %v10496_v40 = vld [vmem:[%s13041_s3 + $0xd80] sm:$0xff]   ;;  %v12477_v10 = vcombine.low %v4852_v26, %v4856_v39  ;;  %v12479_v44 = vcombine.high %v4852_v26, %v4856_v39  ;;  %v10498_v3 = vld [vmem:[%s13041_s3 + $0xef8] sm:$0xff]   ;;  %v10523_v39 = vld [vmem:[%s13041_s3 + $0xe10] sm:$0xff]  }
 0x1be   : > { %v9327_v51 = vpop.f32.mrf.mxu1 }
 0x1bf   : > { %v12372_v53 = vadd.f32 %v9326_v45, %v9298_v2  ;;  %v9300_v13 = vpop.f32.mrf.mxu0  ;;  %9675 = vmatpush3.bf16.msra.mxu0 %v10467_v49  ;;  %9703 = vmatpush3.bf16.msra.mxu1 %v10468_v56  ;;  %v4857_v45 = vld [vmem:[%s12336_s20 + $0x38] sm:$0xff] }
 0x1c0   : > { %v9301_v15 = vadd.f32 %v9300_v13, %v9299_v42  ;;  %v9328_v57 = vpop.f32.mrf.mxu1  ;;  %9676 = vmatprep.subr.bf16.mxu0 %v10469_v59  ;;  %9704 = vmatprep.subr.bf16.mxu1 %v10470_v60  ;;  %v12482_v46 = vcombine.low %v4853_v30, %v4857_v45  ;;  %v10499_v49 = vld [vmem:[%s13041_s3 + $0xe38] sm:$0xff]  }
 0x1c1   : > { %v9329_v58 = vadd.f32 %v9328_v57, %v9327_v51  ;;  %v9302_v27 = vpop.f32.mrf.mxu0  ;;  %v12484_v51 = vcombine.high %v4853_v30, %v4857_v45  ;;  %v10500_v59 = vld [vmem:[%s13041_s3 + $0xeb8] sm:$0xff]  }
 0x1c2   : > { %v9330_v50 = vpop.f32.mrf.mxu1  ;;  %5484 = vmatmul.mubr.bf16.gmra.mxu0 %v12428_v38  ;;  %5531 = vmatmul.mubr.bf16.gmra.mxu1 %v12435_v61  ;;  %v10505_v27 = vld [vmem:[%s13041_s3 + $0xe68] sm:$0xff]  }
 0x1c3   : > { %v12386_v34 = vadd.f32 %v9329_v58, %v9301_v15  ;;  %9677 = vmatpush3.bf16.msra.mxu0 %v10471_v17  ;;  %9705 = vmatpush3.bf16.msra.mxu1 %v10472_v32  ;;  %v9303_v11 = vpop.f32.mrf.mxu0  ;;  %v10501_v32 = vld [vmem:[%s13041_s3 + $0xe70] sm:$0xff]  }
 0x1c4   : > { %9678 = vmatprep.subr.bf16.mxu0 %v10473_v20  ;;  %9706 = vmatprep.subr.bf16.mxu1 %v10474_v47  ;;  %v9331_v5 = vpop.f32.mrf.mxu1  ;;  %v10510_v11 = vld [vmem:[%s13041_s3 + $0xee0] sm:$0xff]  }
 0x1c5   : > { %v9305_v19 = vpop.f32.mrf.mxu0  ;;  %5569 = vmatprep.mubr.bf16.mxu0 %v12479_v44  ;;  %5616 = vmatprep.mubr.bf16.mxu1 %v12484_v51  ;;  %v10513_v5 = vld [vmem:[%s13041_s3 + $0xe58] sm:$0xff]  }
 0x1c6   : > { %v9333_v24 = vpop.f32.mrf.mxu1  ;;  %v10515_v19 = vld [vmem:[%s13041_s3 + $0xe18] sm:$0xff]  }
 0x1c7   : > { %9679 = vmatpush3.bf16.msra.mxu0 %v10475_v1  ;;  %9707 = vmatpush3.bf16.msra.mxu1 %v10476_v29  ;;  %v9306_v28 = vpop.f32.mrf.mxu0  ;;  %v10502_v1 = vld [vmem:[%s13041_s3 + $0xef0] sm:$0xff]  }
 0x1c8   : > { %9680 = vmatprep.subr.bf16.mxu0 %v10477_v14  ;;  %9708 = vmatprep.subr.bf16.mxu1 %v10478_v22  ;;  %v9334_v37 = vpop.f32.mrf.mxu1  ;;  %v4860_v24 = vld [vmem:[%s12336_s20 + $0x50] sm:$0x11]  ;;  %v4861_v28 = vld [vmem:[%s12336_s20 + $0x58] sm:$0x11]  ;;  %s8941_s20 = sshll.u32 %s7103_s8, 7 }
 0x1c9   : > { %v12562_v37 = vcombine.low %v4860_v24, %v4860_v24  ;;  %s12983_s9 = scalar_lea.hbm %s13044_s6, %s8941_s20 }
 0x1cb   : > { %9681 = vmatpush3.bf16.msra.mxu0 %v10479_v55  ;;  %9709 = vmatpush3.bf16.msra.mxu1 %v10480_v4  ;;  %v10504_v4 = vld [vmem:[%s13041_s3 + $0xeb0] sm:$0xff]  }
 0x1cc   : > { %9682 = vmatprep.subr.bf16.mxu0 %v10484_v7  ;;  %9710 = vmatprep.subr.bf16.mxu1 %v10485_v9  ;;  %v10506_v7 = vld [vmem:[%s13041_s3 + $0xee8] sm:$0xff]   ;;  %v10509_v9 = vld [vmem:[%s13041_s3 + $0xe60] sm:$0xff]  }
 0x1cf   : > { %9683 = vmatpush3.bf16.msra.mxu0 %v10487_v12  ;;  %9711 = vmatpush3.bf16.msra.mxu1 %v10488_v16  ;;  %v10512_v12 = vld [vmem:[%s13041_s3 + $0xea0] sm:$0xff]   ;;  %v10514_v16 = vld [vmem:[%s13041_s3 + $0xed8] sm:$0xff]  }
 0x1d0   : > { %9684 = vmatprep.subr.bf16.mxu0 %v10489_v23  ;;  %9712 = vmatprep.subr.bf16.mxu1 %v10490_v25  ;;  %v10516_v23 = vld [vmem:[%s13041_s3 + $0xe98] sm:$0xff]  }
 0x1d3   : > { %9685 = vmatpush3.bf16.msra.mxu0 %v10491_v48  ;;  %9713 = vmatpush3.bf16.msra.mxu1 %v10492_v62  ;;  %v12560_v48 = vcombine.high %v4860_v24, %v4860_v24  ;;  %v12564_v62 = vcombine.high %v4861_v28, %v4861_v28 }
 0x1d4   : > { %9686 = vmatprep.subr.bf16.mxu0 %v10493_v0  ;;  %9714 = vmatprep.subr.bf16.mxu1 %v10494_v63  ;;  %v10520_v0 = vld [vmem:[%s13041_s3 + $0xe50] sm:$0xff]  }
 0x1d7   : > { %9687 = vmatpush3.bf16.msra.mxu0 %v10495_v36  ;;  %9715 = vmatpush3.bf16.msra.mxu1 %v10496_v40  ;;  %v12569_v36 = vcombine.low %v4861_v28, %v4861_v28  ;;  %v10521_v40 = vld [vmem:[%s13041_s3 + $0xed0] sm:$0xff]   ;;  %v10543_v28 = vld [vmem:[%s13041_s3 + $0xf28] sm:$0xff]  }
 0x1d8   : > { %9728 = vmatprep.subr.bf16.mxu0 %v10497_v54  ;;  %9756 = vmatprep.subr.bf16.mxu1 %v10498_v3 }
 0x1d9   : > { %v9352_v2 = vpop.f32.mrf.mxu0 }
 0x1da   : > { %v9380_v42 = vpop.f32.mrf.mxu1  ;;  %5570 = vmatmul.mubr.bf16.vlgmr.msra.gmra.mxu0 %v12477_v10  ;;  %5617 = vmatmul.mubr.bf16.vlgmr.msra.gmra.mxu1 %v12482_v46 }
 0x1db   : > { %v9353_v13 = vpop.f32.mrf.mxu0  ;;  %9729 = vmatpush3.bf16.msra.mxu0 %v10499_v49  ;;  %9757 = vmatpush3.bf16.msra.mxu1 %v10500_v59  ;;  %v10528_v49 = vld [vmem:[%s13041_s3 + $0xe88] sm:$0xff]   ;;  %v10531_v59 = vld [vmem:[%s13041_s3 + $0xe00] sm:$0xff]  }
 0x1dc   : > { %v9354_v15 = vadd.f32 %v9353_v13, %v9352_v2  ;;  %v9381_v57 = vpop.f32.mrf.mxu1  ;;  %9730 = vmatprep.subr.bf16.mxu0 %v10501_v32  ;;  %9758 = vmatprep.subr.bf16.mxu1 %v10502_v1  ;;  %v10524_v2 = vld [vmem:[%s13041_s3 + $0xe90] sm:$0xff]   ;;  %v10526_v13 = vld [vmem:[%s13041_s3 + $0xec8] sm:$0xff]   ;;  %v10535_v1 = vld [vmem:[%s13041_s3 + $0xf38] sm:$0xff]  }
 0x1dd   : > { %v9382_v58 = vadd.f32 %v9381_v57, %v9380_v42  ;;  %v9355_v56 = vpop.f32.mrf.mxu0  ;;  %5577 = vmatprep.mubr.bf16.mxu0 %v12560_v48  ;;  %5624 = vmatprep.mubr.bf16.mxu1 %v12564_v62  ;;  %v10525_v42 = vld [vmem:[%s13041_s3 + $0xe48] sm:$0xff]  }
 0x1de   : > { %v3355_v60 = vadd.f32 %v9354_v15, %v12372_v53  ;;  %v9383_v17 = vpop.f32.mrf.mxu1  ;;  %v10503_v53 = vld [vmem:[%s13041_s3 + $0xe30] sm:$0xff]   ;;  %v10527_v15 = vld [vmem:[%s13041_s3 + $0xe08] sm:$0xff]  }
 0x1df   : > { %v9356_v20 = vpop.f32.mrf.mxu0  ;;  %9731 = vmatpush3.bf16.msra.mxu0 %v10503_v53  ;;  %9759 = vmatpush3.bf16.msra.mxu1 %v10504_v4  ;;  %v10536_v53 = vld [vmem:[%s13041_s3 + $0xfb8] sm:$0xff]  }
 0x1e0   : > { %v3402_v47 = vadd.f32 %v9382_v58, %v3355_v60  ;;  %v9357_v29 = vadd.f32 %v9356_v20, %v9355_v56  ;;  %v9384_v14 = vpop.f32.mrf.mxu1  ;;  %9732 = vmatprep.subr.bf16.mxu0 %v10505_v27  ;;  %9760 = vmatprep.subr.bf16.mxu1 %v10506_v7  ;;  %v10529_v58 = vld [vmem:[%s13041_s3 + $0xe40] sm:$0xff]   ;;  %v10533_v20 = vld [vmem:[%s13041_s3 + $0xf78] sm:$0xff]  }
 0x1e1   : > { %v9385_v22 = vadd.f32 %v9384_v14, %v9383_v17  ;;  %v9358_v25 = vpop.f32.mrf.mxu0  ;;  %v10530_v56 = vld [vmem:[%s13041_s3 + $0xec0] sm:$0xff]  }
 0x1e2   : > { %v12513_v55 = vadd.f32 %v3402_v47, %v12287_v31  ;;  %v3358_v35 = vadd.f32 %v9357_v29, %v12386_v34  ;;  %v10507_v31 = vld [vmem:[%s13041_s3 + $0xe28] sm:$0xff]   ;;  %v9386_v63 = vpop.f32.mrf.mxu1  ;;  %5578 = vmatmul.mubr.bf16.gmra.mxu0 %v12562_v37  ;;  %5625 = vmatmul.mubr.bf16.gmra.mxu1 %v12569_v36  ;;  %v10532_v60 = vld [vmem:[%s13041_s3 + $0xe80] sm:$0xff]   ;;  %v10534_v47 = vld [vmem:[%s13041_s3 + $0xff8] sm:$0xff]  }
 0x1e3   : > { %v10508_v34 = vld [vmem:[%s13041_s3 + $0xea8] sm:$0xff]   ;;  %9733 = vmatpush3.bf16.msra.mxu0 %v10507_v31  ;;  %v9359_v26 = vpop.f32.mrf.mxu0  ;;  %6178 = vmatprep.mubr.bf16.mxu0 %v12349_v21  ;;  %v10538_v31 = vld [vmem:[%s13041_s3 + $0xff0] sm:$0xff]  }
 0x1e4   : > { %v3405_v52 = vadd.f32 %v9385_v22, %v3358_v35  ;;  %9761 = vmatpush3.bf16.msra.mxu1 %v10508_v34  ;;  %9734 = vmatprep.subr.bf16.mxu0 %v10509_v9  ;;  %v9387_v30 = vpop.f32.mrf.mxu1  ;;  %v10539_v34 = vld [vmem:[%s13041_s3 + $0xf30] sm:$0xff]   ;;  %v10542_v25 = vld [vmem:[%s13041_s3 + $0xfe8] sm:$0xff]  }
 0x1e5   : > { %9762 = vmatprep.subr.bf16.mxu1 %v10510_v11  ;;  %v9361_v45 = vpop.f32.mrf.mxu0  ;;  %6226 = vmatprep.mubr.bf16.mxu1 %v12354_v43  ;;  %v10545_v30 = vld [vmem:[%s13041_s3 + $0xf60] sm:$0xff]  }
 0x1e6   : > { %v12529_v50 = vadd.f32 %v3405_v52, %v12303_v8  ;;  %v10511_v8 = vld [vmem:[%s13041_s3 + $0xe20] sm:$0xff]   ;;  %v9389_v54 = vpop.f32.mrf.mxu1  ;;  %v10537_v52 = vld [vmem:[%s13041_s3 + $0xf70] sm:$0xff]  }
 0x1e7   : > { %9735 = vmatpush3.bf16.msra.mxu0 %v10511_v8  ;;  %v9362_v3 = vpop.f32.mrf.mxu0  ;;  %v10540_v8 = vld [vmem:[%s13041_s3 + $0xfb0] sm:$0xff]  }
 0x1e8   : > { %9763 = vmatpush3.bf16.msra.mxu1 %v10512_v12  ;;  %9736 = vmatprep.subr.bf16.mxu0 %v10513_v5  ;;  %v9390_v57 = vpop.f32.mrf.mxu1 }
 0x1e9   : > { %9764 = vmatprep.subr.bf16.mxu1 %v10514_v16  ;;  %v10541_v16 = vld [vmem:[%s13041_s3 + $0xf68] sm:$0xff]   ;;  %v10548_v57 = vld [vmem:[%s13041_s3 + $0xfa0] sm:$0xff]  }
 0x1eb   : > { %9737 = vmatpush3.bf16.msra.mxu0 %v10515_v19 }
 0x1ec   : > { %9765 = vmatpush3.bf16.msra.mxu1 %v10516_v23  ;;  %9738 = vmatprep.subr.bf16.mxu0 %v10520_v0 }
 0x1ed   : > { %9766 = vmatprep.subr.bf16.mxu1 %v10521_v40  ;;  %v10544_v40 = vld [vmem:[%s13041_s3 + $0xfa8] sm:$0xff]  }
 0x1ef   : > { %9739 = vmatpush3.bf16.msra.mxu0 %v10523_v39 }
 0x1f0   : > { %9767 = vmatpush3.bf16.msra.mxu1 %v10524_v2  ;;  %9740 = vmatprep.subr.bf16.mxu0 %v10525_v42  ;;  %v10546_v42 = vld [vmem:[%s13041_s3 + $0xfe0] sm:$0xff]  }
 0x1f1   : > { %9768 = vmatprep.subr.bf16.mxu1 %v10526_v13  ;;  %v10547_v13 = vld [vmem:[%s13041_s3 + $0xf20] sm:$0xff]  }
 0x1f3   : > { %9741 = vmatpush3.bf16.msra.mxu0 %v10527_v15 }
 0x1f4   : > { %9769 = vmatpush3.bf16.msra.mxu1 %v10528_v49  ;;  %9742 = vmatprep.subr.bf16.mxu0 %v10529_v58  ;;  %v10549_v49 = vld [vmem:[%s13041_s3 + $0xf58] sm:$0xff]  }
 0x1f5   : > { %9770 = vmatprep.subr.bf16.mxu1 %v10530_v56  ;;  %v10550_v58 = vld [vmem:[%s13041_s3 + $0xfd8] sm:$0xff]  }
 0x1f6   : > { %v10551_v56 = vld [vmem:[%s13041_s3 + $0xf18] sm:$0xff]  }
 0x1f7   : > { %9743 = vmatpush3.bf16.msra.mxu0 %v10531_v59  ;;  %v10552_v59 = vld [vmem:[%s13041_s3 + $0xf98] sm:$0xff]  }
 0x1f8   : > { %9771 = vmatpush3.bf16.msra.mxu1 %v10532_v60  ;;  %9784 = vmatprep.subr.bf16.mxu0 %v10533_v20  ;;  %v10553_v60 = vld [vmem:[%s13041_s3 + $0xf50] sm:$0xff]  }
 0x1f9   : > { %9812 = vmatprep.subr.bf16.mxu1 %v10534_v47  ;;  %v10556_v20 = vld [vmem:[%s13041_s3 + $0xf90] sm:$0xff]   ;;  %v10557_v47 = vld [vmem:[%s13041_s3 + $0xf48] sm:$0xff]  }
 0x1fa   : > { %v9408_v17 = vpop.f32.mrf.mxu0  ;;  %v9436_v32 = vpop.f32.mrf.mxu1  ;;  %6179 = vmatmul.mubr.bf16.vlgmr.msra.gmra.mxu0 %v12347_v18 }
 0x1fb   : > { %6227 = vmatmul.mubr.bf16.vlgmr.msra.gmra.mxu1 %v12352_v41  ;;  %9785 = vmatpush3.bf16.msra.mxu0 %v10535_v1  ;;  %v10558_v1 = vld [vmem:[%s13041_s3 + $0xfc8] sm:$0xff]  }
 0x1fc   : > { %v9409_v29 = vpop.f32.mrf.mxu0  ;;  %v9437_v14 = vpop.f32.mrf.mxu1  ;;  %9813 = vmatpush3.bf16.msra.mxu1 %v10536_v53  ;;  %9786 = vmatprep.subr.bf16.mxu0 %v10537_v52  ;;  %v10561_v53 = vld [vmem:[%s13041_s3 + $0xf40] sm:$0xff]  }
 0x1fd   : > { %v9410_v22 = vadd.f32 %v9409_v29, %v9408_v17  ;;  %v9438_v4 = vadd.f32 %v9437_v14, %v9436_v32  ;;  %6186 = vmatprep.mubr.bf16.mxu0 %v12426_v33  ;;  %9814 = vmatprep.subr.bf16.mxu1 %v10538_v31  ;;  %v10554_v17 = vld [vmem:[%s13041_s3 + $0xfd0] sm:$0xff]   ;;  %v10559_v29 = vld [vmem:[%s13041_s3 + $0xf08] sm:$0xff]   ;;  %v10565_v31 = vld [vmem:[%s13041_s3 + $0x1078] sm:$0xff]  }
 0x1fe   : > { %v9411_v35 = vpop.f32.mrf.mxu0  ;;  %v9439_v27 = vpop.f32.mrf.mxu1  ;;  %6234 = vmatprep.mubr.bf16.mxu1 %v12430_v6  ;;  %v10555_v32 = vld [vmem:[%s13041_s3 + $0xf10] sm:$0xff]   ;;  %v10560_v14 = vld [vmem:[%s13041_s3 + $0xf88] sm:$0xff]  }
 0x1ff   : > { %v12627_v7 = vadd.f32 %v9438_v4, %v9410_v22  ;;  %9787 = vmatpush3.bf16.msra.mxu0 %v10539_v34  ;;  %v10562_v22 = vld [vmem:[%s13041_s3 + $0xfc0] sm:$0xff]   ;;  %v10566_v34 = vld [vmem:[%s13041_s3 + $0x10f8] sm:$0xff]  }
 0x200   : > { %v9412_v9 = vpop.f32.mrf.mxu0  ;;  %v9440_v11 = vpop.f32.mrf.mxu1  ;;  %9815 = vmatpush3.bf16.msra.mxu1 %v10540_v8  ;;  %9788 = vmatprep.subr.bf16.mxu0 %v10541_v16  ;;  %v10563_v4 = vld [vmem:[%s13041_s3 + $0xf00] sm:$0xff]  }
 0x201   : > { %v9413_v12 = vadd.f32 %v9412_v9, %v9411_v35  ;;  %v9441_v5 = vadd.f32 %v9440_v11, %v9439_v27  ;;  %9816 = vmatprep.subr.bf16.mxu1 %v10542_v25  ;;  %v10564_v35 = vld [vmem:[%s13041_s3 + $0xf80] sm:$0xff]   ;;  %v10567_v9 = vld [vmem:[%s13041_s3 + $0x1038] sm:$0xff]   ;;  %v10569_v25 = vld [vmem:[%s13041_s3 + $0x1070] sm:$0xff]  }
 0x202   : > { %v9414_v19 = vpop.f32.mrf.mxu0  ;;  %v9442_v23 = vpop.f32.mrf.mxu1  ;;  %6187 = vmatmul.mubr.bf16.gmra.mxu0 %v12428_v38 }
 0x203   : > { %v12643_v24 = vadd.f32 %v9441_v5, %v9413_v12  ;;  %6235 = vmatmul.mubr.bf16.gmra.mxu1 %v12435_v61  ;;  %9789 = vmatpush3.bf16.msra.mxu0 %v10543_v28  ;;  %v10568_v12 = vld [vmem:[%s13041_s3 + $0x10b8] sm:$0xff]  }
 0x204   : > { %v9415_v0 = vpop.f32.mrf.mxu0  ;;  %v9443_v63 = vpop.f32.mrf.mxu1  ;;  %9817 = vmatpush3.bf16.msra.mxu1 %v10544_v40  ;;  %9790 = vmatprep.subr.bf16.mxu0 %v10545_v30  ;;  %v10572_v30 = vld [vmem:[%s13041_s3 + $0x10b0] sm:$0xff]  }
 0x205   : > { %v9416_v26 = vadd.f32 %v9415_v0, %v9414_v19  ;;  %v9444_v39 = vadd.f32 %v9443_v63, %v9442_v23  ;;  %6274 = vmatprep.mubr.bf16.mxu0 %v12479_v44  ;;  %9818 = vmatprep.subr.bf16.mxu1 %v10546_v42  ;;  %v10570_v0 = vld [vmem:[%s13041_s3 + $0x10f0] sm:$0xff]   ;;  %v10573_v42 = vld [vmem:[%s13041_s3 + $0x1068] sm:$0xff]  }
 0x206   : > { %v9417_v2 = vpop.f32.mrf.mxu0  ;;  %v9445_v45 = vpop.f32.mrf.mxu1  ;;  %6322 = vmatprep.mubr.bf16.mxu1 %v12484_v51  ;;  %v10571_v63 = vld [vmem:[%s13041_s3 + $0x1030] sm:$0xff]  }
 0x207   : > { %v12662_v54 = vadd.f32 %v9444_v39, %v9416_v26  ;;  %9791 = vmatpush3.bf16.msra.mxu0 %v10547_v13 }
 0x208   : > { %v9418_v3 = vpop.f32.mrf.mxu0  ;;  %v9446_v15 = vpop.f32.mrf.mxu1  ;;  %9819 = vmatpush3.bf16.msra.mxu1 %v10548_v57  ;;  %9792 = vmatprep.subr.bf16.mxu0 %v10549_v49  ;;  %v10575_v57 = vld [vmem:[%s13041_s3 + $0x1028] sm:$0xff]  }
 0x209   : > { %9820 = vmatprep.subr.bf16.mxu1 %v10550_v58  ;;  %v10574_v15 = vld [vmem:[%s13041_s3 + $0x10e8] sm:$0xff]  }
 0x20b   : > { %9793 = vmatpush3.bf16.msra.mxu0 %v10551_v56 }
 0x20c   : > { %9821 = vmatpush3.bf16.msra.mxu1 %v10552_v59  ;;  %9794 = vmatprep.subr.bf16.mxu0 %v10553_v60  ;;  %v10576_v59 = vld [vmem:[%s13041_s3 + $0x10a8] sm:$0xff]  }
 0x20d   : > { %9822 = vmatprep.subr.bf16.mxu1 %v10554_v17 }
 0x20f   : > { %9795 = vmatpush3.bf16.msra.mxu0 %v10555_v32  ;;  %v10577_v32 = vld [vmem:[%s13041_s3 + $0x1060] sm:$0xff]  }
 0x210   : > { %9823 = vmatpush3.bf16.msra.mxu1 %v10556_v20  ;;  %9796 = vmatprep.subr.bf16.mxu0 %v10557_v47 }
 0x211   : > { %9824 = vmatprep.subr.bf16.mxu1 %v10558_v1 }
 0x213   : > { %9797 = vmatpush3.bf16.msra.mxu0 %v10559_v29 }
 0x214   : > { %9825 = vmatpush3.bf16.msra.mxu1 %v10560_v14  ;;  %9798 = vmatprep.subr.bf16.mxu0 %v10561_v53  ;;  %v10578_v14 = vld [vmem:[%s13041_s3 + $0x10e0] sm:$0xff]  }
 0x215   : > { %9826 = vmatprep.subr.bf16.mxu1 %v10562_v22  ;;  %v10579_v53 = vld [vmem:[%s13041_s3 + $0x1020] sm:$0xff]  }
 0x217   : > { %9799 = vmatpush3.bf16.msra.mxu0 %v10563_v4 }
 0x218   : > { %9827 = vmatpush3.bf16.msra.mxu1 %v10564_v35  ;;  %9840 = vmatprep.subr.bf16.mxu0 %v10565_v31 }
 0x219   : > { %9868 = vmatprep.subr.bf16.mxu1 %v10566_v34 }
 0x21a   : > { %v9464_v27 = vpop.f32.mrf.mxu0  ;;  %v9492_v52 = vpop.f32.mrf.mxu1  ;;  %6275 = vmatmul.mubr.bf16.vlgmr.msra.gmra.mxu0 %v12477_v10 }
 0x21b   : > { %6323 = vmatmul.mubr.bf16.vlgmr.msra.gmra.mxu1 %v12482_v46  ;;  %9841 = vmatpush3.bf16.msra.mxu0 %v10567_v9  ;;  %v10583_v9 = vld [vmem:[%s13041_s3 + $0x1018] sm:$0xff]  }
 0x21c   : > { %v9465_v11 = vpop.f32.mrf.mxu0  ;;  %v9493_v8 = vpop.f32.mrf.mxu1  ;;  %9869 = vmatpush3.bf16.msra.mxu1 %v10568_v12  ;;  %9842 = vmatprep.subr.bf16.mxu0 %v10569_v25  ;;  %v10586_v12 = vld [vmem:[%s13041_s3 + $0x10d0] sm:$0xff]   ;;  %v10592_v25 = vld [vmem:[%s13041_s3 + $0x1088] sm:$0xff]  }
 0x21d   : > { %v9466_v5 = vadd.f32 %v9465_v11, %v9464_v27  ;;  %v9494_v16 = vadd.f32 %v9493_v8, %v9492_v52  ;;  %6282 = vmatprep.mubr.bf16.mxu0 %v12560_v48  ;;  %9870 = vmatprep.subr.bf16.mxu1 %v10570_v0  ;;  %v10581_v52 = vld [vmem:[%s13041_s3 + $0x1058] sm:$0xff]   ;;  %v10585_v11 = vld [vmem:[%s13041_s3 + $0x1050] sm:$0xff]   ;;  %v10594_v0 = vld [vmem:[%s13041_s3 + $0x10c0] sm:$0xff]  }
 0x21e   : > { %v9467_v19 = vpop.f32.mrf.mxu0  ;;  %v9495_v23 = vpop.f32.mrf.mxu1  ;;  %6330 = vmatprep.mubr.bf16.mxu1 %v12564_v62 }
 0x21f   : > { %v4060_v28 = vadd.f32 %v9466_v5, %v12627_v7  ;;  %9843 = vmatpush3.bf16.msra.mxu0 %v10571_v63  ;;  %v10587_v5 = vld [vmem:[%s13041_s3 + $0x1010] sm:$0xff]   ;;  %v10595_v63 = vld [vmem:[%s13041_s3 + $0x1000] sm:$0xff]  }
 0x220   : > { %v9468_v40 = vpop.f32.mrf.mxu0  ;;  %v9496_v26 = vpop.f32.mrf.mxu1  ;;  %9871 = vmatpush3.bf16.msra.mxu1 %v10572_v30  ;;  %9844 = vmatprep.subr.bf16.mxu0 %v10573_v42  ;;  %v10597_v30 = vld [vmem:[%s13041_s3 + $0x1178] sm:$0xff]  }
 0x221   : > { %v4108_v39 = vadd.f32 %v9494_v16, %v4060_v28  ;;  %v9469_v7 = vadd.f32 %v9468_v40, %v9467_v19  ;;  %v9497_v2 = vadd.f32 %v9496_v26, %v9495_v23  ;;  %9872 = vmatprep.subr.bf16.mxu1 %v10574_v15  ;;  %v10588_v16 = vld [vmem:[%s13041_s3 + $0x1090] sm:$0xff]   ;;  %v10590_v19 = vld [vmem:[%s13041_s3 + $0x10c8] sm:$0xff]   ;;  %v10593_v28 = vld [vmem:[%s13041_s3 + $0x1040] sm:$0xff]  }
 0x222   : > { %v9470_v45 = vpop.f32.mrf.mxu0  ;;  %v9498_v13 = vpop.f32.mrf.mxu1  ;;  %6283 = vmatmul.mubr.bf16.gmra.mxu0 %v12562_v37  ;;  %v10591_v23 = vld [vmem:[%s13041_s3 + $0x1008] sm:$0xff]   ;;  %v10596_v40 = vld [vmem:[%s13041_s3 + $0x1080] sm:$0xff]  }
 0x223   : > { %v4063_v3 = vadd.f32 %v9469_v7, %v12643_v24  ;;  %v4124_v24 = vrot.slane %v4108_v39, 1  ;;  %6331 = vmatmul.mubr.bf16.gmra.mxu1 %v12569_v36  ;;  %9845 = vmatpush3.bf16.msra.mxu0 %v10575_v57  ;;  %v10598_v7 = vld [vmem:[%s13041_s3 + $0x11f8] sm:$0xff]  }
 0x224   : > { %v9471_v49 = vpop.f32.mrf.mxu0  ;;  %v9499_v58 = vpop.f32.mrf.mxu1  ;;  %9873 = vmatpush3.bf16.msra.mxu1 %v10576_v59  ;;  %9846 = vmatprep.subr.bf16.mxu0 %v10577_v32  ;;  %v10602_v59 = vld [vmem:[%s13041_s3 + $0x11f0] sm:$0xff]  }
 0x225   : > { %v4111_v56 = vadd.f32 %v9497_v2, %v4063_v3  ;;  %v9472_v60 = vadd.f32 %v9471_v49, %v9470_v45  ;;  %v9500_v17 = vadd.f32 %v9499_v58, %v9498_v13  ;;  %6895 = vmatprep.mubr.bf16.mxu0 %v12349_v21  ;;  %9874 = vmatprep.subr.bf16.mxu1 %v10578_v14  ;;  %v10582_v21 = vld [vmem:[%s13041_s3 + $0x10d8] sm:$0xff]   ;;  %v10601_v58 = vld [vmem:[%s13041_s3 + $0x1170] sm:$0xff]   ;;  %v10607_v14 = vld [vmem:[%s13041_s3 + $0x1128] sm:$0xff]  }
 0x226   : > { %v9473_v20 = vpop.f32.mrf.mxu0  ;;  %v9501_v47 = vpop.f32.mrf.mxu1  ;;  %6943 = vmatprep.mubr.bf16.mxu1 %v12354_v43  ;;  %v10599_v2 = vld [vmem:[%s13041_s3 + $0x1138] sm:$0xff]  }
 0x227   : > { %v4125_v1 = vrot.slane %v4111_v56, 1  ;;  %v4068_v29 = vadd.f32 %v9472_v60, %v12662_v54  ;;  %v10580_v54 = vld [vmem:[%s13041_s3 + $0x10a0] sm:$0xff]   ;;  %9847 = vmatpush3.bf16.msra.mxu0 %v10579_v53  ;;  %v10600_v13 = vld [vmem:[%s13041_s3 + $0x11b8] sm:$0xff]   ;;  %v10605_v20 = vld [vmem:[%s13041_s3 + $0x1168] sm:$0xff]  }
 0x228   : > { %v9474_v22 = vpop.f32.mrf.mxu0  ;;  %v9502_v4 = vpop.f32.mrf.mxu1  ;;  %9875 = vmatpush3.bf16.msra.mxu1 %v10580_v54  ;;  %9848 = vmatprep.subr.bf16.mxu0 %v10581_v52 }
 0x229   : > { %v4126_v35 = vsel %vm1905_vm0, %v4124_v24, %v4125_v1  ;;  %v4116_v27 = vadd.f32 %v9500_v17, %v4068_v29  ;;  %9876 = vmatprep.subr.bf16.mxu1 %v10582_v21  ;;  %v10604_v17 = vld [vmem:[%s13041_s3 + $0x11b0] sm:$0xff]   ;;  %v10608_v22 = vld [vmem:[%s13041_s3 + $0x11a8] sm:$0xff]  }
 0x22a   : > { %v12784_v31 = vadd.f32 %v4126_v35, %v12513_v55  ;;  %v10584_v55 = vld [vmem:[%s13041_s3 + $0x1098] sm:$0xff]  }
 0x22b   : > { %v4127_v34 = vrot.slane %v4116_v27, 1  ;;  %9849 = vmatpush3.bf16.msra.mxu0 %v10583_v9  ;;  %v10609_v27 = vld [vmem:[%s13041_s3 + $0x1160] sm:$0xff]  }
 0x22c   : > { %9877 = vmatpush3.bf16.msra.mxu1 %v10584_v55  ;;  %9850 = vmatprep.subr.bf16.mxu0 %v10585_v11  ;;  %v10611_v9 = vld [vmem:[%s13041_s3 + $0x1120] sm:$0xff]   ;;  %v10614_v11 = vld [vmem:[%s13041_s3 + $0x11d8] sm:$0xff]  }
 0x22d   : > { %v4128_v43 = vsel %vm1905_vm0, %v4125_v1, %v4127_v34  ;;  %9878 = vmatprep.subr.bf16.mxu1 %v10586_v12  ;;  %v10610_v34 = vld [vmem:[%s13041_s3 + $0x11e0] sm:$0xff]   ;;  %v10617_v12 = vld [vmem:[%s13041_s3 + $0x1150] sm:$0xff]  }
 0x22e   : > { %v12800_v8 = vadd.f32 %v4128_v43, %v12529_v50  ;;  %v10589_v50 = vld [vmem:[%s13041_s3 + $0x1048] sm:$0xff]  }
 0x22f   : > { %9851 = vmatpush3.bf16.msra.mxu0 %v10587_v5  ;;  %v10618_v5 = vld [vmem:[%s13041_s3 + $0x11d0] sm:$0xff]  }
 0x230   : > { %9879 = vmatpush3.bf16.msra.mxu1 %v10588_v16  ;;  %9852 = vmatprep.subr.bf16.mxu0 %v10589_v50  ;;  %v10619_v16 = vld [vmem:[%s13041_s3 + $0x1110] sm:$0xff]  }
 0x231   : > { %9880 = vmatprep.subr.bf16.mxu1 %v10590_v19  ;;  %v10620_v50 = vld [vmem:[%s13041_s3 + $0x1190] sm:$0xff]   ;;  %v10621_v19 = vld [vmem:[%s13041_s3 + $0x1148] sm:$0xff]  }
 0x233   : > { %9853 = vmatpush3.bf16.msra.mxu0 %v10591_v23  ;;  %v10622_v23 = vld [vmem:[%s13041_s3 + $0x11c8] sm:$0xff]  }
 0x234   : > { %9881 = vmatpush3.bf16.msra.mxu1 %v10592_v25  ;;  %9854 = vmatprep.subr.bf16.mxu0 %v10593_v28  ;;  %v10623_v25 = vld [vmem:[%s13041_s3 + $0x1108] sm:$0xff]  }
 0x235   : > { %9882 = vmatprep.subr.bf16.mxu1 %v10594_v0  ;;  %v10624_v28 = vld [vmem:[%s13041_s3 + $0x1188] sm:$0xff]   ;;  %v10625_v0 = vld [vmem:[%s13041_s3 + $0x1140] sm:$0xff]  }
 0x237   : > { %9855 = vmatpush3.bf16.msra.mxu0 %v10595_v63  ;;  %v10626_v63 = vld [vmem:[%s13041_s3 + $0x11c0] sm:$0xff]  }
 0x238   : > { %9883 = vmatpush3.bf16.msra.mxu1 %v10596_v40  ;;  %9896 = vmatprep.subr.bf16.mxu0 %v10597_v30  ;;  %v10627_v40 = vld [vmem:[%s13041_s3 + $0x1100] sm:$0xff]  }
 0x239   : > { %9924 = vmatprep.subr.bf16.mxu1 %v10598_v7 }
 0x23a   : > { %v9520_v26 = vpop.f32.mrf.mxu0  ;;  %v9548_v39 = vpop.f32.mrf.mxu1  ;;  %6896 = vmatmul.mubr.bf16.vlgmr.msra.gmra.mxu0 %v12347_v18  ;;  %v10603_v18 = vld [vmem:[%s13041_s3 + $0x1130] sm:$0xff]  }
 0x23b   : > { %6944 = vmatmul.mubr.bf16.vlgmr.msra.gmra.mxu1 %v12352_v41  ;;  %9897 = vmatpush3.bf16.msra.mxu0 %v10599_v2 }
 0x23c   : > { %v9521_v45 = vpop.f32.mrf.mxu0  ;;  %v9549_v42 = vpop.f32.mrf.mxu1  ;;  %9925 = vmatpush3.bf16.msra.mxu1 %v10600_v13  ;;  %9898 = vmatprep.subr.bf16.mxu0 %v10601_v58 }
 0x23d   : > { %v9522_v3 = vadd.f32 %v9521_v45, %v9520_v26  ;;  %v9550_v15 = vadd.f32 %v9549_v42, %v9548_v39  ;;  %6903 = vmatprep.mubr.bf16.mxu0 %v12426_v33  ;;  %9926 = vmatprep.subr.bf16.mxu1 %v10602_v59  ;;  %v10606_v33 = vld [vmem:[%s13041_s3 + $0x11e8] sm:$0xff]   ;;  %v10628_v26 = vld [vmem:[%s13041_s3 + $0x1180] sm:$0xff]  }
 0x23e   : > { %v9523_v57 = vpop.f32.mrf.mxu0  ;;  %v9551_v49 = vpop.f32.mrf.mxu1  ;;  %6951 = vmatprep.mubr.bf16.mxu1 %v12430_v6 }
 0x23f   : > { %v12852_v56 = vadd.f32 %v9550_v15, %v9522_v3  ;;  %9899 = vmatpush3.bf16.msra.mxu0 %v10603_v18 }
 0x240   : > { %v9524_v41 = vpop.f32.mrf.mxu0  ;;  %v9552_v60 = vpop.f32.mrf.mxu1  ;;  %9927 = vmatpush3.bf16.msra.mxu1 %v10604_v17  ;;  %9900 = vmatprep.subr.bf16.mxu0 %v10605_v20 }
 0x241   : > { %v9525_v24 = vadd.f32 %v9524_v41, %v9523_v57  ;;  %v9553_v32 = vadd.f32 %v9552_v60, %v9551_v49  ;;  %9928 = vmatprep.subr.bf16.mxu1 %v10606_v33 }
 0x242   : > { %v9526_v47 = vpop.f32.mrf.mxu0  ;;  %v9554_v1 = vpop.f32.mrf.mxu1  ;;  %6904 = vmatmul.mubr.bf16.gmra.mxu0 %v12428_v38  ;;  %v10612_v38 = vld [vmem:[%s13041_s3 + $0x11a0] sm:$0xff]  }
 0x243   : > { %v12868_v29 = vadd.f32 %v9553_v32, %v9525_v24  ;;  %6952 = vmatmul.mubr.bf16.gmra.mxu1 %v12435_v61  ;;  %9901 = vmatpush3.bf16.msra.mxu0 %v10607_v14  ;;  %v10613_v61 = vld [vmem:[%s13041_s3 + $0x1158] sm:$0xff]  }
 0x244   : > { %v9527_v6 = vpop.f32.mrf.mxu0  ;;  %v9555_v53 = vpop.f32.mrf.mxu1  ;;  %9929 = vmatpush3.bf16.msra.mxu1 %v10608_v22  ;;  %9902 = vmatprep.subr.bf16.mxu0 %v10609_v27 }
 0x245   : > { %v9528_v4 = vadd.f32 %v9527_v6, %v9526_v47  ;;  %v9556_v35 = vadd.f32 %v9555_v53, %v9554_v1  ;;  %6991 = vmatprep.mubr.bf16.mxu0 %v12479_v44  ;;  %9930 = vmatprep.subr.bf16.mxu1 %v10610_v34  ;;  %v10615_v44 = vld [vmem:[%s13041_s3 + $0x1118] sm:$0xff]  }
 0x246   : > { %v9529_v54 = vpop.f32.mrf.mxu0  ;;  %v9557_v52 = vpop.f32.mrf.mxu1  ;;  %7039 = vmatprep.mubr.bf16.mxu1 %v12484_v51  ;;  %v10616_v51 = vld [vmem:[%s13041_s3 + $0x1198] sm:$0xff]  }
 0x247   : > { %v12887_v21 = vadd.f32 %v9556_v35, %v9528_v4  ;;  %9903 = vmatpush3.bf16.msra.mxu0 %v10611_v9 }
 0x248   : > { %v9530_v43 = vpop.f32.mrf.mxu0  ;;  %v9558_v55 = vpop.f32.mrf.mxu1  ;;  %9931 = vmatpush3.bf16.msra.mxu1 %v10612_v38  ;;  %9904 = vmatprep.subr.bf16.mxu0 %v10613_v61 }
 0x249   : > { %9932 = vmatprep.subr.bf16.mxu1 %v10614_v11 }
 0x24b   : > { %9905 = vmatpush3.bf16.msra.mxu0 %v10615_v44 }
 0x24c   : > { %9933 = vmatpush3.bf16.msra.mxu1 %v10616_v51  ;;  %9906 = vmatprep.subr.bf16.mxu0 %v10617_v12 }
 0x24d   : > { %9934 = vmatprep.subr.bf16.mxu1 %v10618_v5 }
 0x24f   : > { %9907 = vmatpush3.bf16.msra.mxu0 %v10619_v16 }
 0x250   : > { %9935 = vmatpush3.bf16.msra.mxu1 %v10620_v50  ;;  %9908 = vmatprep.subr.bf16.mxu0 %v10621_v19 }
 0x251   : > { %9936 = vmatprep.subr.bf16.mxu1 %v10622_v23 }
 0x253   : > { %9909 = vmatpush3.bf16.msra.mxu0 %v10623_v25 }
 0x254   : > { %9937 = vmatpush3.bf16.msra.mxu1 %v10624_v28  ;;  %9910 = vmatprep.subr.bf16.mxu0 %v10625_v0 }
 0x255   : > { %9938 = vmatprep.subr.bf16.mxu1 %v10626_v63 }
 0x257   : > { %9911 = vmatpush3.bf16.msra.mxu0 %v10627_v40 }
 0x258   : > { %9939 = vmatpush3.bf16.msra.mxu1 %v10628_v26 }
 0x25a   : > { %v9576_v39 = vpop.f32.mrf.mxu0  ;;  %v9604_v30 = vpop.f32.mrf.mxu1  ;;  %6992 = vmatmul.mubr.bf16.vlgmr.msra.gmra.mxu0 %v12477_v10 }
 0x25b   : > { %7040 = vmatmul.mubr.bf16.vlgmr.msra.gmra.mxu1 %v12482_v46  ;;  %6999 = vmatprep.mubr.bf16.mxu0 %v12560_v48 }
 0x25c   : > { %v9577_v7 = vpop.f32.mrf.mxu0  ;;  %v9605_v2 = vpop.f32.mrf.mxu1  ;;  %7047 = vmatprep.mubr.bf16.mxu1 %v12564_v62 }
 0x25d   : > { %v9578_v45 = vadd.f32 %v9577_v7, %v9576_v39  ;;  %v9606_v42 = vadd.f32 %v9605_v2, %v9604_v30 }
 0x25e   : > { %v9579_v13 = vpop.f32.mrf.mxu0  ;;  %v9607_v3 = vpop.f32.mrf.mxu1 }
 0x25f   : > { %v4777_v15 = vadd.f32 %v9578_v45, %v12852_v56 }
 0x260   : > { %v9580_v57 = vpop.f32.mrf.mxu0  ;;  %v9608_v49 = vpop.f32.mrf.mxu1 }
 0x261   : > { %v4825_v58 = vadd.f32 %v9606_v42, %v4777_v15  ;;  %v9581_v59 = vadd.f32 %v9580_v57, %v9579_v13  ;;  %v9609_v18 = vadd.f32 %v9608_v49, %v9607_v3 }
 0x262   : > { %v9582_v41 = vpop.f32.mrf.mxu0  ;;  %v9610_v60 = vpop.f32.mrf.mxu1  ;;  %7000 = vmatmul.mubr.bf16.gmra.mxu0 %v12562_v37 }
 0x263   : > { %v4780_v17 = vadd.f32 %v9581_v59, %v12868_v29  ;;  %7048 = vmatmul.mubr.bf16.gmra.mxu1 %v12569_v36  ;;  %v4841_v56 = vrot.slane %v4825_v58, 2 }
 0x264   : > { %v9583_v10 = vpop.f32.mrf.mxu0  ;;  %v9611_v24 = vpop.f32.mrf.mxu1 }
 0x265   : > { %v4828_v46 = vadd.f32 %v9609_v18, %v4780_v17  ;;  %v9584_v32 = vadd.f32 %v9583_v10, %v9582_v41  ;;  %v9612_v20 = vadd.f32 %v9611_v24, %v9610_v60 }
 0x266   : > { %v9585_v48 = vpop.f32.mrf.mxu0  ;;  %v9613_v62 = vpop.f32.mrf.mxu1 }
 0x267   : > { %v4842_v47 = vrot.slane %v4828_v46, 2  ;;  %v4785_v1 = vadd.f32 %v9584_v32, %v12887_v21 }
 0x268   : > { %v9586_v33 = vpop.f32.mrf.mxu0  ;;  %v9614_v14 = vpop.f32.mrf.mxu1 }
 0x269   : > { %v4833_v6 = vadd.f32 %v9612_v20, %v4785_v1  ;;  %v4843_v29 = vsel %vm2623_vm1, %v4841_v56, %v4842_v47 }
 0x26a   : > { %v4848_v53 = vadd.f32 %v4843_v29, %v12784_v31 }
 0x26b   : > { %v4844_v22 = vrot.slane %v4833_v6, 2 }
 0x26d   : > { %v4845_v4 = vsel %vm2623_vm1, %v4842_v47, %v4844_v22 }
 0x26e   : > { %v4849_v37 = vadd.f32 %v4845_v4, %v12800_v8 }
 0x27a   : > { %v9632_v35 = vpop.f32.mrf.mxu0  ;;  %v9660_v36 = vpop.f32.mrf.mxu1 }
 0x27c   : > { %v9633_v27 = vpop.f32.mrf.mxu0  ;;  %v9661_v52 = vpop.f32.mrf.mxu1 }
 0x27d   : > { %v9634_v54 = vadd.f32 %v9633_v27, %v9632_v35  ;;  %v9662_v34 = vadd.f32 %v9661_v52, %v9660_v36 }
 0x27e   : > { %v9635_v9 = vpop.f32.mrf.mxu0  ;;  %v9663_v21 = vpop.f32.mrf.mxu1 }
 0x27f   : > { %v5525_v43 = vadd.f32 %v9662_v34, %v9634_v54 }
 0x280   : > { %v9636_v55 = vpop.f32.mrf.mxu0  ;;  %v9664_v61 = vpop.f32.mrf.mxu1 }
 0x281   : > { %v9637_v38 = vadd.f32 %v9636_v55, %v9635_v9  ;;  %v9665_v11 = vadd.f32 %v9664_v61, %v9663_v21 }
 0x282   : > { %v9638_v31 = vpop.f32.mrf.mxu0  ;;  %v9666_v51 = vpop.f32.mrf.mxu1 }
 0x283   : > { %v5528_v44 = vadd.f32 %v9665_v11, %v9637_v38 }
 0x284   : > { %v9639_v12 = vpop.f32.mrf.mxu0  ;;  %v9667_v5 = vpop.f32.mrf.mxu1 }
 0x286   : > { %v9641_v16 = vpop.f32.mrf.mxu0  ;;  %v9669_v8 = vpop.f32.mrf.mxu1 }
 0x288   : > { %v9642_v50 = vpop.f32.mrf.mxu0  ;;  %v9670_v19 = vpop.f32.mrf.mxu1 }
 0x29a   : > { %v9688_v23 = vpop.f32.mrf.mxu0  ;;  %v9716_v25 = vpop.f32.mrf.mxu1 }
 0x29c   : > { %v9689_v28 = vpop.f32.mrf.mxu0  ;;  %v9717_v63 = vpop.f32.mrf.mxu1 }
 0x29d   : > { %v9690_v0 = vadd.f32 %v9689_v28, %v9688_v23  ;;  %v9718_v40 = vadd.f32 %v9717_v63, %v9716_v25 }
 0x29e   : > { %v9691_v26 = vpop.f32.mrf.mxu0  ;;  %v9719_v30 = vpop.f32.mrf.mxu1 }
 0x29f   : > { %v5572_v39 = vadd.f32 %v9690_v0, %v5525_v43 }
 0x2a0   : > { %v9692_v7 = vpop.f32.mrf.mxu0  ;;  %v9720_v42 = vpop.f32.mrf.mxu1 }
 0x2a1   : > { %v5619_v2 = vadd.f32 %v9718_v40, %v5572_v39  ;;  %v9693_v45 = vadd.f32 %v9692_v7, %v9691_v26  ;;  %v9721_v13 = vadd.f32 %v9720_v42, %v9719_v30 }
 0x2a2   : > { %v9694_v58 = vpop.f32.mrf.mxu0  ;;  %v9722_v59 = vpop.f32.mrf.mxu1 }
 0x2a3   : > { %v12958_v3 = vadd.f32 %v5619_v2, %v4848_v53  ;;  %v5575_v15 = vadd.f32 %v9693_v45, %v5528_v44 }
 0x2a4   : > { %v9695_v18 = vpop.f32.mrf.mxu0  ;;  %v9723_v41 = vpop.f32.mrf.mxu1 }
 0x2a5   : > { %v5622_v57 = vadd.f32 %v9721_v13, %v5575_v15 }
 0x2a6   : > { %v9697_v60 = vpop.f32.mrf.mxu0  ;;  %v9725_v17 = vpop.f32.mrf.mxu1 }
 0x2a7   : > { %v12960_v49 = vadd.f32 %v5622_v57, %v4849_v37 }
 0x2a8   : > { %v9698_v10 = vpop.f32.mrf.mxu0  ;;  %v9726_v24 = vpop.f32.mrf.mxu1 }
 0x2ba   : > { %v9744_v46 = vpop.f32.mrf.mxu0 }
 0x2bb   : > { %v9772_v32 = vpop.f32.mrf.mxu1 }
 0x2bc   : > { %v9745_v20 = vpop.f32.mrf.mxu0 }
 0x2bd   : > { %v9773_v48 = vpop.f32.mrf.mxu1  ;;  %v9746_v62 = vadd.f32 %v9745_v20, %v9744_v46 }
 0x2be   : > { %v9774_v56 = vadd.f32 %v9773_v48, %v9772_v32  ;;  %v9747_v47 = vpop.f32.mrf.mxu0 }
 0x2bf   : > { %v9775_v1 = vpop.f32.mrf.mxu1 }
 0x2c0   : > { %v6229_v33 = vadd.f32 %v9774_v56, %v9746_v62  ;;  %v9748_v14 = vpop.f32.mrf.mxu0 }
 0x2c1   : > { %v9776_v6 = vpop.f32.mrf.mxu1  ;;  %v9749_v29 = vadd.f32 %v9748_v14, %v9747_v47 }
 0x2c2   : > { %v9777_v53 = vadd.f32 %v9776_v6, %v9775_v1  ;;  %v9750_v22 = vpop.f32.mrf.mxu0 }
 0x2c3   : > { %v9778_v4 = vpop.f32.mrf.mxu1 }
 0x2c4   : > { %v6232_v37 = vadd.f32 %v9777_v53, %v9749_v29  ;;  %v9751_v35 = vpop.f32.mrf.mxu0 }
 0x2c5   : > { %v9779_v36 = vpop.f32.mrf.mxu1  ;;  %v9752_v27 = vadd.f32 %v9751_v35, %v9750_v22 }
 0x2c6   : > { %v9780_v54 = vadd.f32 %v9779_v36, %v9778_v4  ;;  %v9753_v52 = vpop.f32.mrf.mxu0 }
 0x2c7   : > { %v9781_v34 = vpop.f32.mrf.mxu1 }
 0x2c8   : > { %v6237_v9 = vadd.f32 %v9780_v54, %v9752_v27  ;;  %v9754_v21 = vpop.f32.mrf.mxu0 }
 0x2c9   : > { %v9782_v43 = vpop.f32.mrf.mxu1 }
 0x2da   : > { %v9800_v55 = vpop.f32.mrf.mxu0 }
 0x2db   : > { %v9828_v38 = vpop.f32.mrf.mxu1 }
 0x2dc   : > { %v9801_v61 = vpop.f32.mrf.mxu0 }
 0x2dd   : > { %v9829_v11 = vpop.f32.mrf.mxu1  ;;  %v9802_v44 = vadd.f32 %v9801_v61, %v9800_v55 }
 0x2de   : > { %v9830_v31 = vadd.f32 %v9829_v11, %v9828_v38  ;;  %v9803_v51 = vpop.f32.mrf.mxu0 }
 0x2df   : > { %v9831_v12 = vpop.f32.mrf.mxu1  ;;  %v6277_v5 = vadd.f32 %v9802_v44, %v6229_v33 }
 0x2e0   : > { %v9804_v16 = vpop.f32.mrf.mxu0 }
 0x2e1   : > { %v9832_v8 = vpop.f32.mrf.mxu1  ;;  %v6325_v50 = vadd.f32 %v9830_v31, %v6277_v5  ;;  %v9805_v19 = vadd.f32 %v9804_v16, %v9803_v51 }
 0x2e2   : > { %v9833_v23 = vadd.f32 %v9832_v8, %v9831_v12  ;;  %v9806_v25 = vpop.f32.mrf.mxu0 }
 0x2e3   : > { %v9834_v28 = vpop.f32.mrf.mxu1  ;;  %v6280_v0 = vadd.f32 %v9805_v19, %v6232_v37  ;;  %v6341_v45 = vrot.slane %v6325_v50, 1 }
 0x2e4   : > { %v9807_v63 = vpop.f32.mrf.mxu0 }
 0x2e5   : > { %v9835_v40 = vpop.f32.mrf.mxu1  ;;  %v6328_v26 = vadd.f32 %v9833_v23, %v6280_v0  ;;  %v9808_v39 = vadd.f32 %v9807_v63, %v9806_v25 }
 0x2e6   : > { %v9836_v30 = vadd.f32 %v9835_v40, %v9834_v28  ;;  %v9809_v7 = vpop.f32.mrf.mxu0 }
 0x2e7   : > { %v9837_v2 = vpop.f32.mrf.mxu1  ;;  %v6342_v42 = vrot.slane %v6328_v26, 1  ;;  %v6285_v13 = vadd.f32 %v9808_v39, %v6237_v9 }
 0x2e8   : > { %v9810_v15 = vpop.f32.mrf.mxu0 }
 0x2e9   : > { %v9838_v57 = vpop.f32.mrf.mxu1  ;;  %v6343_v58 = vsel %vm1905_vm0, %v6341_v45, %v6342_v42  ;;  %v6333_v59 = vadd.f32 %v9836_v30, %v6285_v13  ;;  %v8936_v13 = vld [vmem:[%s13042_s4] ss:$0 sm:$0xff] }
 0x2ea   : > { %v6348_v18 = vadd.f32 %v6343_v58, %v12958_v3  ;;  %v8937_v58 = vld [vmem:[%s13043_s5] ss:$0 sm:$0xff] }
 0x2eb   : > { %v6344_v41 = vrot.slane %v6333_v59, 1 }
 0x2ed   : > { %v6345_v60 = vsel %vm1905_vm0, %v6342_v42, %v6344_v41 }
 0x2ee   : > { %v12966_v17 = vadd.f32 %v6345_v60, %v12960_v49 }
 0x2fa   : > { %v9856_v10 = vpop.f32.mrf.mxu0 }
 0x2fb   : > { %v9884_v24 = vpop.f32.mrf.mxu1 }
 0x2fc   : > { %v9857_v46 = vpop.f32.mrf.mxu0 }
 0x2fd   : > { %v9885_v32 = vpop.f32.mrf.mxu1  ;;  %v9858_v22 = vadd.f32 %v9857_v46, %v9856_v10 }
 0x2fe   : > { %v9859_v20 = vpop.f32.mrf.mxu0  ;;  %v9886_v4 = vadd.f32 %v9885_v32, %v9884_v24 }
 0x2ff   : > { %v9887_v48 = vpop.f32.mrf.mxu1 }
 0x300   : > { %v9860_v62 = vpop.f32.mrf.mxu0  ;;  %v6946_v52 = vadd.f32 %v9886_v4, %v9858_v22 }
 0x301   : > { %v9888_v56 = vpop.f32.mrf.mxu1  ;;  %v9861_v35 = vadd.f32 %v9860_v62, %v9859_v20 }
 0x302   : > { %v9862_v47 = vpop.f32.mrf.mxu0  ;;  %v9889_v36 = vadd.f32 %v9888_v56, %v9887_v48 }
 0x303   : > { %v9890_v1 = vpop.f32.mrf.mxu1 }
 0x304   : > { %v9863_v33 = vpop.f32.mrf.mxu0  ;;  %v6949_v55 = vadd.f32 %v9889_v36, %v9861_v35 }
 0x305   : > { %v9891_v14 = vpop.f32.mrf.mxu1  ;;  %v9864_v11 = vadd.f32 %v9863_v33, %v9862_v47 }
 0x306   : > { %v9865_v6 = vpop.f32.mrf.mxu0  ;;  %v9892_v44 = vadd.f32 %v9891_v14, %v9890_v1 }
 0x307   : > { %v9893_v3 = vpop.f32.mrf.mxu1 }
 0x308   : > { %v9866_v29 = vpop.f32.mrf.mxu0  ;;  %v6954_v25 = vadd.f32 %v9892_v44, %v9864_v11 }
 0x309   : > { %v9894_v53 = vpop.f32.mrf.mxu1 }
 0x31a   : > { %v9912_v49 = vpop.f32.mrf.mxu0 }
 0x31b   : > { %v9940_v37 = vpop.f32.mrf.mxu1 }
 0x31c   : > { %v9913_v27 = vpop.f32.mrf.mxu0 }
 0x31d   : > { %v9941_v54 = vpop.f32.mrf.mxu1  ;;  %v9914_v34 = vadd.f32 %v9913_v27, %v9912_v49 }
 0x31e   : > { %v9915_v9 = vpop.f32.mrf.mxu0  ;;  %v9942_v31 = vadd.f32 %v9941_v54, %v9940_v37 }
 0x31f   : > { %v9943_v21 = vpop.f32.mrf.mxu1  ;;  %v6994_v43 = vadd.f32 %v9914_v34, %v6946_v52 }
 0x320   : > { %v9916_v38 = vpop.f32.mrf.mxu0 }
 0x321   : > { %v9944_v61 = vpop.f32.mrf.mxu1  ;;  %v9917_v51 = vadd.f32 %v9916_v38, %v9915_v9  ;;  %v7042_v16 = vadd.f32 %v9942_v31, %v6994_v43 }
 0x322   : > { %v9918_v12 = vpop.f32.mrf.mxu0  ;;  %v9945_v50 = vadd.f32 %v9944_v61, %v9943_v21 }
 0x323   : > { %v9946_v5 = vpop.f32.mrf.mxu1  ;;  %v6997_v8 = vadd.f32 %v9917_v51, %v6949_v55  ;;  %v7058_v26 = vrot.slane %v7042_v16, 2 }
 0x324   : > { %v9919_v19 = vpop.f32.mrf.mxu0 }
 0x325   : > { %v9947_v23 = vpop.f32.mrf.mxu1  ;;  %v7045_v28 = vadd.f32 %v9945_v50, %v6997_v8  ;;  %v9920_v0 = vadd.f32 %v9919_v19, %v9918_v12 }
 0x326   : > { %v9921_v63 = vpop.f32.mrf.mxu0  ;;  %v9948_v7 = vadd.f32 %v9947_v23, %v9946_v5 }
 0x327   : > { %v9949_v40 = vpop.f32.mrf.mxu1  ;;  %v7059_v39 = vrot.slane %v7045_v28, 2  ;;  %v7002_v30 = vadd.f32 %v9920_v0, %v6954_v25 }
 0x328   : > { %v9922_v2 = vpop.f32.mrf.mxu0 }
 0x329   : > { %v9950_v45 = vpop.f32.mrf.mxu1  ;;  %v7060_v42 = vsel %vm2623_vm1, %v7058_v26, %v7059_v39  ;;  %v7050_v15 = vadd.f32 %v9948_v7, %v7002_v30 }
 0x32a   : > { %v7065_v57 = vadd.f32 %v7060_v42, %v6348_v18 }
 0x32b   : > { %v7061_v59 = vrot.slane %v7050_v15, 2 }
 0x32c   : > { %v7074_v41 = vmul.f32 %v8936_v13, %v7065_v57 }
 0x32d   : > { %v7062_v60 = vsel %vm2623_vm1, %v7059_v39, %v7061_v59 }
 0x32e   : > { %v7083_v10 = vadd.f32 %v8937_v58, %v7074_v41  ;;  %v7066_v24 = vadd.f32 %v7062_v60, %v12966_v17 }
 0x330   : > { %v7085_v46 = vmax.f32 %v7083_v10, 0.0  ;;  %v7075_v32 = vmul.f32 %v8936_v13, %v7066_v24 }
 0x332   : > { %v7084_v18 = vadd.f32 %v8937_v58, %v7075_v32  ;;  %7087 = vst [vmem:[%s372_s13] sm:$0xff] %v7085_v46 }
 0x334   : > { %v7086_v20 = vmax.f32 %v7084_v18, 0.0 }
 0x336   : > { %7088 = vst [vmem:[%s372_s13 + $0x8] sm:$0xff] %v7086_v20 }
 0x337   : > { %10642 = shalt.err (!%p10639_p10)
}
 0x338   : > { %s10643_s16 = scalar_lea.hbm %s12983_s9, 256  ;;  %s10647_s8 = scalar_lea.hbm %s13044_s6, 8192 }
 0x339   : > { %p10644_p11 = scmp.ne.s32.totalorder %s12983_s9, %s10643_s16  ;;  %p10648_p0 = scmp.lt.s32.totalorder %s12983_s9, %s13044_s6 }
 0x33a   : > { %p10649_p1 = scmp.lt.s32.totalorder %s10647_s8, %s10643_s16 }
 0x33b   : > { %p10645_p12 = pnand %p10644_p11, %p10812_p3 }
 0x33c   : > { %p10650_p2 = por %p10649_p1, %p10648_p0 }
 0x33d   : > { %p10646_p13 = pneg %p10645_p12 }
 0x33f   : > { %p10651_p4 = pnand %p10650_p2, %p10646_p13 }
 0x341   : > { %10654 = shalt.err (!%p10651_p4)
}
 0x342   : > { %s10724_s25 = smov 128   ;;  %s10725_s14 = smov 8  }
 0x343   : > { %9956 = dma.vmem_to_hbm [thread:$0]  (%p10812_p3), %s12985_s24, 256, %s12983_s9, %s12987_s7, %s10724_s25, %s10724_s25, %s10725_s14  }
 0x344 PF: > { %p9962_p5 = scmp.ge.s32.totalorder %s10721_s28, 2  ;;  %s7121_s30 = sand.u32 1, %s10693_s21  }
 0x345   : > { %s7122_s18 = scalar_lea.sflag [#allocation3], %s7121_s30 }
 0x346   : > { %p9959_p6 = pnand %p9962_p5, %p10821_p8 }
 0x348   : > { %p9960_p7 = pneg %p9959_p6 }
 0x34a   : > { %10688 = dma.done.wait (%p9960_p7), %s7122_s18, 256  }
 0x34b   : > { %10690 = vsyncadd (%p9960_p7), %s7122_s18, 4294967040  ;;  %s19_s28 = sadd.s32 1, %s10721_s28   ;;  %s13052_s10 = sld [smem:[#allocation5_spill]] }
 0x34c   : > { %p16_p9 = scmp.ge.s32.totalorder %s19_s28, 34   ;;  %s13053_s9 = sld [smem:[#allocation6_spill]] }
 0x34d   : > { %s13054_s21 = smov %s10697_s22  ;;  %s13055_s22 = smov %s10701_s23 }
 0x34e   : > { %s13056_s23 = smov %s10830_s15  ;;  %s13057_s24 = smov %s10713_s26 }
 0x34f   : > { %s13058_s25 = smov %s10717_s27  ;;  %18 = sbr.rel (!%p16_p9) target bundleno = 5 (0x5), region = 102 }
 0x351   : > { %s13059_s26 = smov %s13052_s10 }
 0x352   : > { %s13060_s27 = smov %s13053_s9 }
 0x354   :  { %7127 = vsyncpa [#allocation3], 1 }
 0x355   :  { %7129 = vsyncpa [#allocation3 + $0x1], 1 }

</bundles_post_ra>
